<compile_context>
chip_gen: v7x
topology: tpu7x:2x2x1
jax: 0.10.0
libtpu: 0.0.40
codegen_flags: <defaults>
</compile_context>

<pallas_src>
import math

import jax
import jax.numpy as jnp
from jax.experimental import pallas as pl
from jax.experimental.pallas import tpu as pltpu  # noqa: F401  (TPU backend)

# ---------------- config (small, consistent with the module) ----------------
BATCH = 2
IMG = 16
PATCH = 4
IN_CH = 3
EMBED = 64
DEPTH = 2
HEADS = 4
MLP_RATIO = 4.0
NUM_CLASSES = 16

N_PATCHES = (IMG // PATCH) ** 2          # 16
SEQ = N_PATCHES + 1                      # 17 (cls token + patches)
SEQ_PAD = ((SEQ + 7) // 8) * 8           # 24: pad tokens to a sublane multiple
ROWS = BATCH * SEQ_PAD                   # 48
PATCH_DIM = IN_CH * PATCH * PATCH        # 48
HEAD_DIM = EMBED // HEADS                # 16
MLP_HIDDEN = int(EMBED * MLP_RATIO)      # 256
SCALE = 1.0 / math.sqrt(HEAD_DIM)

# ----- layout of the packed "small parameter" array: (N_SMALL_PAD, PACK_W) ---
PACK_W = MLP_HIDDEN                       # 256 (widest small param: b_fc1)
ROW_BPATCH = 0
ROW_CLS = 1
ROW_POS = 2                               # SEQ rows of pos_embed
ROW_BLK0 = ROW_POS + SEQ                  # 19
ROWS_PER_BLK = 8                          # g1,b1,b_qkv,b_proj,g2,b2,b_fc1,b_fc2
ROW_GF = ROW_BLK0 + ROWS_PER_BLK * DEPTH  # 35
ROW_BF = ROW_GF + 1                       # 36
ROW_BHEAD = ROW_BF + 1                    # 37
N_SMALL = ROW_BHEAD + 1                   # 38
N_SMALL_PAD = ((N_SMALL + 7) // 8) * 8    # 40


# --------------------------- in-kernel helpers -------------------------------
def _bf16(x):
    return x.astype(jnp.bfloat16)


def _layernorm(x, gamma, beta, eps=1e-5):
    mean = jnp.mean(x, axis=-1, keepdims=True)
    var = jnp.mean(jnp.square(x - mean), axis=-1, keepdims=True)
    return (x - mean) * jax.lax.rsqrt(var + eps) * gamma + beta


def _gelu_exact(x):
    # matches torch.nn.GELU() (erf formulation)
    return 0.5 * x * (1.0 + jax.lax.erf(x * (1.0 / math.sqrt(2.0))))


def _softmax_masked(logits, key_mask):
    # key_mask is pre-broadcast to logits' full shape (no per-call broadcast)
    logits = logits + key_mask
    logits = logits - jnp.max(logits, axis=-1, keepdims=True)
    p = jnp.exp(logits)
    inv = pl.reciprocal(jnp.sum(p, axis=-1, keepdims=True), approx=True)
    return p * inv


# ------------------------------ fused kernel ---------------------------------
def _vit_kernel(patches_ref, small_ref, wpatch_ref, wqkv_ref, wproj_ref,
                wfc1_ref, wfc2_ref, whead_ref, o_ref):
    f32 = jnp.float32

    # ------------- small params (one packed f32 array, static slices) --------
    b_patch = small_ref[ROW_BPATCH:ROW_BPATCH + 1, 0:EMBED]        # (1, E)
    cls_tok = small_ref[ROW_CLS:ROW_CLS + 1, 0:EMBED]              # (1, E)
    pos = small_ref[ROW_POS:ROW_POS + SEQ, 0:EMBED]                # (SEQ, E)

    # ---- patch embedding: (B*Np, Pd) @ (Pd, E) + b  (conv k=stride=patch) ----
    emb = jnp.dot(patches_ref[...], wpatch_ref[...],
                  preferred_element_type=f32) + b_patch            # (B*Np, E)

    # ---- padded token matrix (cls | patches | zero-pad), built as a value ----
    emb_b = emb.reshape(BATCH, N_PATCHES, EMBED)
    cls_row = cls_tok + pos[0:1, :]                                 # (1, E)
    x = jnp.concatenate([
        jnp.broadcast_to(cls_row[None, :, :], (BATCH, 1, EMBED)),
        emb_b + pos[None, 1:SEQ, :],
        jnp.zeros((BATCH, SEQ_PAD - SEQ, EMBED), f32),
    ], axis=1).reshape(ROWS, EMBED)                                 # (ROWS, E)
    # TODO(synk): dropout is an identity here (inference-mode forward).

    # additive mask for padded key columns, pre-broadcast ONCE to full shape
    key_ids = jax.lax.broadcasted_iota(jnp.int32, (BATCH, SEQ_PAD, SEQ_PAD), 2)
    key_mask = jnp.where(key_ids < SEQ, 0.0, -1e30).astype(f32)     # (B, S, S)

    for d in range(DEPTH):
        r = ROW_BLK0 + d * ROWS_PER_BLK
        g1 = small_ref[r + 0:r + 1, 0:EMBED]
        b1 = small_ref[r + 1:r + 2, 0:EMBED]
        b_qkv = small_ref[r + 2:r + 3, 0:3 * EMBED]
        b_proj = small_ref[r + 3:r + 4, 0:EMBED]
        g2 = small_ref[r + 4:r + 5, 0:EMBED]
        b2 = small_ref[r + 5:r + 6, 0:EMBED]
        b_fc1 = small_ref[r + 6:r + 7, 0:MLP_HIDDEN]
        b_fc2 = small_ref[r + 7:r + 8, 0:EMBED]

        # ---- attention branch: x + proj(MHA(LN1(x))) ----
        h1 = _layernorm(x, g1, b1)
        qkv = jnp.dot(_bf16(h1), wqkv_ref[d],
                      preferred_element_type=f32) + b_qkv           # (ROWS, 3E)
        qkv = qkv.reshape(BATCH, SEQ_PAD, 3 * EMBED)                 # (B, S, 3E)

        ctx_heads = []
        for hh in range(HEADS):
            c = hh * HEAD_DIM
            qh = qkv[:, :, c:c + HEAD_DIM]                           # (B, S, hd)
            kh = qkv[:, :, EMBED + c:EMBED + c + HEAD_DIM]
            vh = qkv[:, :, 2 * EMBED + c:2 * EMBED + c + HEAD_DIM]
            logits = jnp.einsum('bqd,bkd->bqk', qh, kh,
                                preferred_element_type=f32) * SCALE  # (B, S, S)
            p = _softmax_masked(logits, key_mask)
            ctx_heads.append(jnp.einsum('bqk,bkd->bqd', p, vh,
                                        preferred_element_type=f32))  # (B,S,hd)
        ctx = jnp.concatenate(ctx_heads, axis=-1).reshape(ROWS, EMBED)

        attn = jnp.dot(_bf16(ctx), wproj_ref[d],
                       preferred_element_type=f32) + b_proj          # (ROWS, E)
        x = x + attn

        # ---- MLP branch: x + fc2(GELU(fc1(LN2(x)))) ----
        h2 = _layernorm(x, g2, b2)
        h2 = jnp.dot(_bf16(h2), wfc1_ref[d],
                     preferred_element_type=f32) + b_fc1             # (ROWS, H)
        h2 = _gelu_exact(h2)
        h2 = jnp.dot(_bf16(h2), wfc2_ref[d],
                     preferred_element_type=f32) + b_fc2             # (ROWS, E)
        x = x + h2

    # ---- final LayerNorm + classifier head, on the B cls rows only ----
    g_f = small_ref[ROW_GF:ROW_GF + 1, 0:EMBED]
    b_f = small_ref[ROW_BF:ROW_BF + 1, 0:EMBED]
    b_head = small_ref[ROW_BHEAD:ROW_BHEAD + 1, 0:NUM_CLASSES]
    cls_final = x.reshape(BATCH, SEQ_PAD, EMBED)[:, 0, :]            # (B, E)
    hf = _layernorm(cls_final, g_f, b_f)
    logits_out = jnp.dot(_bf16(hf), whead_ref[...],
                         preferred_element_type=f32) + b_head        # (B, NC)
    o_ref[...] = logits_out.astype(o_ref.dtype)


# ------------------------------ glue (plain JAX) ------------------------------
def extract_patches(x, patch):
    # x: (B, C, H, W) NCHW -> (B, Np, C*p*p), patch vector ordered (c, ph, pw)
    B, C, H, W = x.shape
    hp, wp = H // patch, W // patch
    x = x.reshape(B, C, hp, patch, wp, patch)
    x = x.transpose(0, 2, 4, 1, 3, 5)            # (B, hp, wp, C, p, p)
    return x.reshape(B, hp * wp, C * patch * patch)


@jax.jit
def vit_forward(x_img, params):
    patches = extract_patches(x_img, PATCH).reshape(BATCH * N_PATCHES, PATCH_DIM)
    patches = patches.astype(jnp.bfloat16)
    return pl.pallas_call(
        _vit_kernel,
        out_shape=jax.ShapeDtypeStruct((BATCH, NUM_CLASSES), jnp.float32),
    )(patches, params["small"], params["w_patch"], params["w_qkv"],
      params["w_proj"], params["w_fc1"], params["w_fc2"], params["w_head"])


# ------------------------- deterministic parameters ---------------------------
def init_vit_params(key):
    def nxt():
        nonlocal key
        key, sub = jax.random.split(key)
        return sub

    def normal(shape, std=0.02):
        return (std * jax.random.normal(nxt(), shape)).astype(jnp.float32)

    D = DEPTH
    return {
        "w_patch": normal((PATCH_DIM, EMBED)),
        "b_patch": jnp.zeros((1, EMBED), jnp.float32),
        "cls_token": normal((1, EMBED)),
        "pos_embed": normal((SEQ, EMBED)),
        # per-block parameters stacked along a leading depth axis
        "g1": jnp.ones((D, 1, EMBED), jnp.float32),
        "b1": jnp.zeros((D, 1, EMBED), jnp.float32),
        "w_qkv": normal((D, EMBED, 3 * EMBED)),
        "b_qkv": jnp.zeros((D, 1, 3 * EMBED), jnp.float32),
        "w_proj": normal((D, EMBED, EMBED)),
        "b_proj": jnp.zeros((D, 1, EMBED), jnp.float32),
        "g2": jnp.ones((D, 1, EMBED), jnp.float32),
        "b2": jnp.zeros((D, 1, EMBED), jnp.float32),
        "w_fc1": normal((D, EMBED, MLP_HIDDEN)),
        "b_fc1": jnp.zeros((D, 1, MLP_HIDDEN), jnp.float32),
        "w_fc2": normal((D, MLP_HIDDEN, EMBED)),
        "b_fc2": jnp.zeros((D, 1, EMBED), jnp.float32),
        "g_f": jnp.ones((1, EMBED), jnp.float32),
        "b_f": jnp.zeros((1, EMBED), jnp.float32),
        "w_head": normal((EMBED, NUM_CLASSES)),
        "b_head": jnp.zeros((1, NUM_CLASSES), jnp.float32),
    }


def pack_vit_params(p):
    """One-time repack: small params -> one (N_SMALL_PAD, PACK_W) f32 array,
    big weight matrices -> bf16 (halves weight HBM->VMEM bytes, fewer DMAs)."""
    def row(v):
        v = jnp.asarray(v, jnp.float32).reshape(1, -1)
        return jnp.pad(v, ((0, 0), (0, PACK_W - v.shape[1])))

    rows = [row(p["b_patch"]), row(p["cls_token"]),
            jnp.pad(p["pos_embed"].astype(jnp.float32),
                    ((0, 0), (0, PACK_W - EMBED)))]
    for d in range(DEPTH):
        for name in ("g1", "b1", "b_qkv", "b_proj", "g2", "b2", "b_fc1", "b_fc2"):
            rows.append(row(p[name][d]))
    rows += [row(p["g_f"]), row(p["b_f"]), row(p["b_head"])]
    small = jnp.concatenate(rows, axis=0)
    small = jnp.pad(small, ((0, N_SMALL_PAD - small.shape[0]), (0, 0)))
    return {
        "small": small,
        "w_patch": p["w_patch"].astype(jnp.bfloat16),
        "w_qkv": p["w_qkv"].astype(jnp.bfloat16),
        "w_proj": p["w_proj"].astype(jnp.bfloat16),
        "w_fc1": p["w_fc1"].astype(jnp.bfloat16),
        "w_fc2": p["w_fc2"].astype(jnp.bfloat16),
        "w_head": p["w_head"].astype(jnp.bfloat16),
    }


if __name__ == "__main__":
    key = jax.random.PRNGKey(0)
    pkey, xkey = jax.random.split(key)
    raw_params = init_vit_params(pkey)
    params = pack_vit_params(raw_params)
    x = jax.random.normal(xkey, (BATCH, IN_CH, IMG, IMG), dtype=jnp.float32)

    logits = vit_forward(x, params)
    logits = jax.block_until_ready(logits)
    assert logits.shape == (BATCH, NUM_CLASSES), logits.shape
    assert bool(jnp.all(jnp.isfinite(logits)))
    print("KERNEL_OK")
</pallas_src>

<mosaic_0001>
module attributes {stable_mosaic.version = 11 : i64} {
  func.func @_vit_kernel(%arg0: memref<32x48xbf16, #tpu.memory_space<vmem>>, %arg1: memref<40x256xf32, #tpu.memory_space<vmem>>, %arg2: memref<48x64xbf16, #tpu.memory_space<vmem>>, %arg3: memref<2x64x192xbf16, #tpu.memory_space<vmem>>, %arg4: memref<2x64x64xbf16, #tpu.memory_space<vmem>>, %arg5: memref<2x64x256xbf16, #tpu.memory_space<vmem>>, %arg6: memref<2x256x64xbf16, #tpu.memory_space<vmem>>, %arg7: memref<64x16xbf16, #tpu.memory_space<vmem>>, %arg8: memref<2x16xf32, #tpu.memory_space<vmem>>) attributes {dimension_semantics = [], scalar_prefetch = 0 : i64, scratch_operands = 0 : i64, tpu.core_type = #tpu.core_type<tc>} {
    %c0 = arith.constant 0 : index
    %c0_0 = arith.constant 0 : index
    %0 = vector.load %arg1[%c0, %c0_0] : memref<40x256xf32, #tpu.memory_space<vmem>>, vector<1x64xf32>
    %c1 = arith.constant 1 : index
    %c0_1 = arith.constant 0 : index
    %1 = vector.load %arg1[%c1, %c0_1] : memref<40x256xf32, #tpu.memory_space<vmem>>, vector<1x64xf32>
    %c2 = arith.constant 2 : index
    %c0_2 = arith.constant 0 : index
    %2 = vector.load %arg1[%c2, %c0_2] : memref<40x256xf32, #tpu.memory_space<vmem>>, vector<17x64xf32>
    %c0_3 = arith.constant 0 : index
    %c0_4 = arith.constant 0 : index
    %3 = vector.load %arg0[%c0_3, %c0_4] : memref<32x48xbf16, #tpu.memory_space<vmem>>, vector<32x48xbf16>
    %c0_5 = arith.constant 0 : index
    %c0_6 = arith.constant 0 : index
    %4 = vector.load %arg2[%c0_5, %c0_6] : memref<48x64xbf16, #tpu.memory_space<vmem>>, vector<48x64xbf16>
    %cst = arith.constant dense<0.000000e+00> : vector<32x64xf32>
    %5 = tpu.matmul %3, %4, %cst {dimension_numbers = #tpu.dot_dimension_numbers<[1], [0], [0], [1], [0, 0, 1, 1], [], []>} : vector<32x48xbf16>, vector<48x64xbf16>, vector<32x64xf32> -> vector<32x64xf32>
    %6 = vector.broadcast %0 : vector<1x64xf32> to vector<32x64xf32>
    %7 = arith.addf %5, %6 : vector<32x64xf32>
    %8 = vector.shape_cast %7 : vector<32x64xf32> to vector<2x16x64xf32>
    %9 = vector.extract_strided_slice %2 {offsets = [0, 0], sizes = [1, 64], strides = [1, 1]} : vector<17x64xf32> to vector<1x64xf32>
    %10 = arith.addf %1, %9 : vector<1x64xf32>
    %11 = vector.shape_cast %10 : vector<1x64xf32> to vector<1x1x64xf32>
    %12 = vector.shape_cast %11 : vector<1x1x64xf32> to vector<1x1x64xf32>
    %13 = vector.broadcast %12 : vector<1x1x64xf32> to vector<2x1x64xf32>
    %14 = vector.extract_strided_slice %2 {offsets = [1, 0], sizes = [16, 64], strides = [1, 1]} : vector<17x64xf32> to vector<16x64xf32>
    %15 = vector.shape_cast %14 : vector<16x64xf32> to vector<1x16x64xf32>
    %16 = vector.broadcast %15 : vector<1x16x64xf32> to vector<2x16x64xf32>
    %17 = arith.addf %8, %16 : vector<2x16x64xf32>
    %cst_7 = arith.constant 0.000000e+00 : f32
    %18 = vector.broadcast %cst_7 : f32 to vector<2x7x64xf32>
    %19 = tpu.concatenate %13, %17, %18 in 1 : vector<2x1x64xf32>, vector<2x16x64xf32>, vector<2x7x64xf32> -> vector<2x24x64xf32>
    %20 = vector.shape_cast %19 : vector<2x24x64xf32> to vector<48x64xf32>
    %21 = tpu.iota {dimensions = array<i32: 2>} : vector<2x24x24xi32>
    %c17_i32 = arith.constant 17 : i32
    %22 = vector.broadcast %c17_i32 : i32 to vector<2x24x24xi32>
    %23 = arith.cmpi slt, %21, %22 : vector<2x24x24xi32>
    %cst_8 = arith.constant 0.000000e+00 : f32
    %cst_9 = arith.constant -1.000000e+30 : f32
    %24 = vector.broadcast %cst_8 : f32 to vector<2x24x24xf32>
    %25 = vector.broadcast %cst_9 : f32 to vector<2x24x24xf32>
    %26 = arith.select %23, %24, %25 : vector<2x24x24xi1>, vector<2x24x24xf32>
    %c19 = arith.constant 19 : index
    %c0_10 = arith.constant 0 : index
    %27 = vector.load %arg1[%c19, %c0_10] : memref<40x256xf32, #tpu.memory_space<vmem>>, vector<1x64xf32>
    %c20 = arith.constant 20 : index
    %c0_11 = arith.constant 0 : index
    %28 = vector.load %arg1[%c20, %c0_11] : memref<40x256xf32, #tpu.memory_space<vmem>>, vector<1x64xf32>
    %c21 = arith.constant 21 : index
    %c0_12 = arith.constant 0 : index
    %29 = vector.load %arg1[%c21, %c0_12] : memref<40x256xf32, #tpu.memory_space<vmem>>, vector<1x192xf32>
    %c22 = arith.constant 22 : index
    %c0_13 = arith.constant 0 : index
    %30 = vector.load %arg1[%c22, %c0_13] : memref<40x256xf32, #tpu.memory_space<vmem>>, vector<1x64xf32>
    %c23 = arith.constant 23 : index
    %c0_14 = arith.constant 0 : index
    %31 = vector.load %arg1[%c23, %c0_14] : memref<40x256xf32, #tpu.memory_space<vmem>>, vector<1x64xf32>
    %c24 = arith.constant 24 : index
    %c0_15 = arith.constant 0 : index
    %32 = vector.load %arg1[%c24, %c0_15] : memref<40x256xf32, #tpu.memory_space<vmem>>, vector<1x64xf32>
    %c25 = arith.constant 25 : index
    %c0_16 = arith.constant 0 : index
    %33 = vector.load %arg1[%c25, %c0_16] : memref<40x256xf32, #tpu.memory_space<vmem>>, vector<1x256xf32>
    %c26 = arith.constant 26 : index
    %c0_17 = arith.constant 0 : index
    %34 = vector.load %arg1[%c26, %c0_17] : memref<40x256xf32, #tpu.memory_space<vmem>>, vector<1x64xf32>
    %cst_18 = arith.constant dense<0.000000e+00> : vector<48xf32>
    %35 = vector.multi_reduction <add>, %20, %cst_18 [1] : vector<48x64xf32> to vector<48xf32>
    %36 = vector.shape_cast %35 : vector<48xf32> to vector<48x1xf32>
    %cst_19 = arith.constant 6.400000e+01 : f32
    %37 = vector.broadcast %cst_19 : f32 to vector<48x1xf32>
    %38 = arith.divf %36, %37 : vector<48x1xf32>
    %39 = vector.broadcast %38 : vector<48x1xf32> to vector<48x64xf32>
    %40 = arith.subf %20, %39 : vector<48x64xf32>
    %41 = arith.mulf %40, %40 : vector<48x64xf32>
    %cst_20 = arith.constant dense<0.000000e+00> : vector<48xf32>
    %42 = vector.multi_reduction <add>, %41, %cst_20 [1] : vector<48x64xf32> to vector<48xf32>
    %43 = vector.shape_cast %42 : vector<48xf32> to vector<48x1xf32>
    %cst_21 = arith.constant 6.400000e+01 : f32
    %44 = vector.broadcast %cst_21 : f32 to vector<48x1xf32>
    %45 = arith.divf %43, %44 : vector<48x1xf32>
    %46 = vector.broadcast %38 : vector<48x1xf32> to vector<48x64xf32>
    %47 = arith.subf %20, %46 : vector<48x64xf32>
    %cst_22 = arith.constant 9.99999974E-6 : f32
    %48 = vector.broadcast %cst_22 : f32 to vector<48x1xf32>
    %49 = arith.addf %45, %48 : vector<48x1xf32>
    %50 = math.rsqrt %49 : vector<48x1xf32>
    %51 = vector.broadcast %50 : vector<48x1xf32> to vector<48x64xf32>
    %52 = arith.mulf %47, %51 : vector<48x64xf32>
    %53 = vector.broadcast %27 : vector<1x64xf32> to vector<48x64xf32>
    %54 = arith.mulf %52, %53 : vector<48x64xf32>
    %55 = vector.broadcast %28 : vector<1x64xf32> to vector<48x64xf32>
    %56 = arith.addf %54, %55 : vector<48x64xf32>
    %57 = arith.truncf %56 : vector<48x64xf32> to vector<48x64xbf16>
    %c0_23 = arith.constant 0 : index
    %c0_24 = arith.constant 0 : index
    %c0_25 = arith.constant 0 : index
    %58 = vector.load %arg3[%c0_23, %c0_24, %c0_25] : memref<2x64x192xbf16, #tpu.memory_space<vmem>>, vector<1x64x192xbf16>
    %59 = vector.shape_cast %58 : vector<1x64x192xbf16> to vector<64x192xbf16>
    %cst_26 = arith.constant dense<0.000000e+00> : vector<48x192xf32>
    %60 = tpu.matmul %57, %59, %cst_26 {dimension_numbers = #tpu.dot_dimension_numbers<[1], [0], [0], [1], [0, 0, 1, 1], [], []>} : vector<48x64xbf16>, vector<64x192xbf16>, vector<48x192xf32> -> vector<48x192xf32>
    %61 = vector.broadcast %29 : vector<1x192xf32> to vector<48x192xf32>
    %62 = arith.addf %60, %61 : vector<48x192xf32>
    %63 = vector.shape_cast %62 : vector<48x192xf32> to vector<2x24x192xf32>
    %64 = vector.extract_strided_slice %63 {offsets = [0, 0, 0], sizes = [2, 24, 16], strides = [1, 1, 1]} : vector<2x24x192xf32> to vector<2x24x16xf32>
    %65 = vector.extract_strided_slice %63 {offsets = [0, 0, 64], sizes = [2, 24, 16], strides = [1, 1, 1]} : vector<2x24x192xf32> to vector<2x24x16xf32>
    %66 = vector.extract_strided_slice %63 {offsets = [0, 0, 128], sizes = [2, 24, 16], strides = [1, 1, 1]} : vector<2x24x192xf32> to vector<2x24x16xf32>
    "tpu.trace_start"() <{level = 10 : i32, message = "bqd,bkd->bqk"}> : () -> ()
    %cst_27 = arith.constant dense<0.000000e+00> : vector<2x24x24xf32>
    %67 = tpu.matmul %64, %65, %cst_27 {dimension_numbers = #tpu.dot_dimension_numbers<[2], [2], [1], [1], [0, 0, 0, 1, 1, 1], [0], [0]>} : vector<2x24x16xf32>, vector<2x24x16xf32>, vector<2x24x24xf32> -> vector<2x24x24xf32>
    "tpu.trace_stop"() : () -> ()
    %cst_28 = arith.constant 2.500000e-01 : f32
    %68 = vector.broadcast %cst_28 : f32 to vector<2x24x24xf32>
    %69 = arith.mulf %67, %68 : vector<2x24x24xf32>
    %70 = arith.addf %69, %26 : vector<2x24x24xf32>
    %cst_29 = arith.constant dense<0xFF800000> : vector<2x24xf32>
    %71 = vector.multi_reduction <maximumf>, %70, %cst_29 [2] : vector<2x24x24xf32> to vector<2x24xf32>
    %72 = vector.shape_cast %71 : vector<2x24xf32> to vector<2x24x1xf32>
    %73 = vector.broadcast %72 : vector<2x24x1xf32> to vector<2x24x24xf32>
    %74 = arith.subf %70, %73 : vector<2x24x24xf32>
    %75 = math.exp %74 : vector<2x24x24xf32>
    %cst_30 = arith.constant dense<0.000000e+00> : vector<2x24xf32>
    %76 = vector.multi_reduction <add>, %75, %cst_30 [2] : vector<2x24x24xf32> to vector<2x24xf32>
    %77 = vector.shape_cast %76 : vector<2x24xf32> to vector<2x24x1xf32>
    %78 = tpu.reciprocal %77 {approx = true} : vector<2x24x1xf32> -> vector<2x24x1xf32>
    %79 = vector.broadcast %78 : vector<2x24x1xf32> to vector<2x24x24xf32>
    %80 = arith.mulf %75, %79 : vector<2x24x24xf32>
    "tpu.trace_start"() <{level = 10 : i32, message = "bqk,bkd->bqd"}> : () -> ()
    %cst_31 = arith.constant dense<0.000000e+00> : vector<2x24x16xf32>
    %81 = tpu.matmul %80, %66, %cst_31 {dimension_numbers = #tpu.dot_dimension_numbers<[2], [1], [1], [2], [0, 0, 0, 1, 1, 2], [0], [0]>} : vector<2x24x24xf32>, vector<2x24x16xf32>, vector<2x24x16xf32> -> vector<2x24x16xf32>
    "tpu.trace_stop"() : () -> ()
    %82 = vector.extract_strided_slice %63 {offsets = [0, 0, 16], sizes = [2, 24, 16], strides = [1, 1, 1]} : vector<2x24x192xf32> to vector<2x24x16xf32>
    %83 = vector.extract_strided_slice %63 {offsets = [0, 0, 80], sizes = [2, 24, 16], strides = [1, 1, 1]} : vector<2x24x192xf32> to vector<2x24x16xf32>
    %84 = vector.extract_strided_slice %63 {offsets = [0, 0, 144], sizes = [2, 24, 16], strides = [1, 1, 1]} : vector<2x24x192xf32> to vector<2x24x16xf32>
    "tpu.trace_start"() <{level = 10 : i32, message = "bqd,bkd->bqk"}> : () -> ()
    %cst_32 = arith.constant dense<0.000000e+00> : vector<2x24x24xf32>
    %85 = tpu.matmul %82, %83, %cst_32 {dimension_numbers = #tpu.dot_dimension_numbers<[2], [2], [1], [1], [0, 0, 0, 1, 1, 1], [0], [0]>} : vector<2x24x16xf32>, vector<2x24x16xf32>, vector<2x24x24xf32> -> vector<2x24x24xf32>
    "tpu.trace_stop"() : () -> ()
    %cst_33 = arith.constant 2.500000e-01 : f32
    %86 = vector.broadcast %cst_33 : f32 to vector<2x24x24xf32>
    %87 = arith.mulf %85, %86 : vector<2x24x24xf32>
    %88 = arith.addf %87, %26 : vector<2x24x24xf32>
    %cst_34 = arith.constant dense<0xFF800000> : vector<2x24xf32>
    %89 = vector.multi_reduction <maximumf>, %88, %cst_34 [2] : vector<2x24x24xf32> to vector<2x24xf32>
    %90 = vector.shape_cast %89 : vector<2x24xf32> to vector<2x24x1xf32>
    %91 = vector.broadcast %90 : vector<2x24x1xf32> to vector<2x24x24xf32>
    %92 = arith.subf %88, %91 : vector<2x24x24xf32>
    %93 = math.exp %92 : vector<2x24x24xf32>
    %cst_35 = arith.constant dense<0.000000e+00> : vector<2x24xf32>
    %94 = vector.multi_reduction <add>, %93, %cst_35 [2] : vector<2x24x24xf32> to vector<2x24xf32>
    %95 = vector.shape_cast %94 : vector<2x24xf32> to vector<2x24x1xf32>
    %96 = tpu.reciprocal %95 {approx = true} : vector<2x24x1xf32> -> vector<2x24x1xf32>
    %97 = vector.broadcast %96 : vector<2x24x1xf32> to vector<2x24x24xf32>
    %98 = arith.mulf %93, %97 : vector<2x24x24xf32>
    "tpu.trace_start"() <{level = 10 : i32, message = "bqk,bkd->bqd"}> : () -> ()
    %cst_36 = arith.constant dense<0.000000e+00> : vector<2x24x16xf32>
    %99 = tpu.matmul %98, %84, %cst_36 {dimension_numbers = #tpu.dot_dimension_numbers<[2], [1], [1], [2], [0, 0, 0, 1, 1, 2], [0], [0]>} : vector<2x24x24xf32>, vector<2x24x16xf32>, vector<2x24x16xf32> -> vector<2x24x16xf32>
    "tpu.trace_stop"() : () -> ()
    %100 = vector.extract_strided_slice %63 {offsets = [0, 0, 32], sizes = [2, 24, 16], strides = [1, 1, 1]} : vector<2x24x192xf32> to vector<2x24x16xf32>
    %101 = vector.extract_strided_slice %63 {offsets = [0, 0, 96], sizes = [2, 24, 16], strides = [1, 1, 1]} : vector<2x24x192xf32> to vector<2x24x16xf32>
    %102 = vector.extract_strided_slice %63 {offsets = [0, 0, 160], sizes = [2, 24, 16], strides = [1, 1, 1]} : vector<2x24x192xf32> to vector<2x24x16xf32>
    "tpu.trace_start"() <{level = 10 : i32, message = "bqd,bkd->bqk"}> : () -> ()
    %cst_37 = arith.constant dense<0.000000e+00> : vector<2x24x24xf32>
    %103 = tpu.matmul %100, %101, %cst_37 {dimension_numbers = #tpu.dot_dimension_numbers<[2], [2], [1], [1], [0, 0, 0, 1, 1, 1], [0], [0]>} : vector<2x24x16xf32>, vector<2x24x16xf32>, vector<2x24x24xf32> -> vector<2x24x24xf32>
    "tpu.trace_stop"() : () -> ()
    %cst_38 = arith.constant 2.500000e-01 : f32
    %104 = vector.broadcast %cst_38 : f32 to vector<2x24x24xf32>
    %105 = arith.mulf %103, %104 : vector<2x24x24xf32>
    %106 = arith.addf %105, %26 : vector<2x24x24xf32>
    %cst_39 = arith.constant dense<0xFF800000> : vector<2x24xf32>
    %107 = vector.multi_reduction <maximumf>, %106, %cst_39 [2] : vector<2x24x24xf32> to vector<2x24xf32>
    %108 = vector.shape_cast %107 : vector<2x24xf32> to vector<2x24x1xf32>
    %109 = vector.broadcast %108 : vector<2x24x1xf32> to vector<2x24x24xf32>
    %110 = arith.subf %106, %109 : vector<2x24x24xf32>
    %111 = math.exp %110 : vector<2x24x24xf32>
    %cst_40 = arith.constant dense<0.000000e+00> : vector<2x24xf32>
    %112 = vector.multi_reduction <add>, %111, %cst_40 [2] : vector<2x24x24xf32> to vector<2x24xf32>
    %113 = vector.shape_cast %112 : vector<2x24xf32> to vector<2x24x1xf32>
    %114 = tpu.reciprocal %113 {approx = true} : vector<2x24x1xf32> -> vector<2x24x1xf32>
    %115 = vector.broadcast %114 : vector<2x24x1xf32> to vector<2x24x24xf32>
    %116 = arith.mulf %111, %115 : vector<2x24x24xf32>
    "tpu.trace_start"() <{level = 10 : i32, message = "bqk,bkd->bqd"}> : () -> ()
    %cst_41 = arith.constant dense<0.000000e+00> : vector<2x24x16xf32>
    %117 = tpu.matmul %116, %102, %cst_41 {dimension_numbers = #tpu.dot_dimension_numbers<[2], [1], [1], [2], [0, 0, 0, 1, 1, 2], [0], [0]>} : vector<2x24x24xf32>, vector<2x24x16xf32>, vector<2x24x16xf32> -> vector<2x24x16xf32>
    "tpu.trace_stop"() : () -> ()
    %118 = vector.extract_strided_slice %63 {offsets = [0, 0, 48], sizes = [2, 24, 16], strides = [1, 1, 1]} : vector<2x24x192xf32> to vector<2x24x16xf32>
    %119 = vector.extract_strided_slice %63 {offsets = [0, 0, 112], sizes = [2, 24, 16], strides = [1, 1, 1]} : vector<2x24x192xf32> to vector<2x24x16xf32>
    %120 = vector.extract_strided_slice %63 {offsets = [0, 0, 176], sizes = [2, 24, 16], strides = [1, 1, 1]} : vector<2x24x192xf32> to vector<2x24x16xf32>
    "tpu.trace_start"() <{level = 10 : i32, message = "bqd,bkd->bqk"}> : () -> ()
    %cst_42 = arith.constant dense<0.000000e+00> : vector<2x24x24xf32>
    %121 = tpu.matmul %118, %119, %cst_42 {dimension_numbers = #tpu.dot_dimension_numbers<[2], [2], [1], [1], [0, 0, 0, 1, 1, 1], [0], [0]>} : vector<2x24x16xf32>, vector<2x24x16xf32>, vector<2x24x24xf32> -> vector<2x24x24xf32>
    "tpu.trace_stop"() : () -> ()
    %cst_43 = arith.constant 2.500000e-01 : f32
    %122 = vector.broadcast %cst_43 : f32 to vector<2x24x24xf32>
    %123 = arith.mulf %121, %122 : vector<2x24x24xf32>
    %124 = arith.addf %123, %26 : vector<2x24x24xf32>
    %cst_44 = arith.constant dense<0xFF800000> : vector<2x24xf32>
    %125 = vector.multi_reduction <maximumf>, %124, %cst_44 [2] : vector<2x24x24xf32> to vector<2x24xf32>
    %126 = vector.shape_cast %125 : vector<2x24xf32> to vector<2x24x1xf32>
    %127 = vector.broadcast %126 : vector<2x24x1xf32> to vector<2x24x24xf32>
    %128 = arith.subf %124, %127 : vector<2x24x24xf32>
    %129 = math.exp %128 : vector<2x24x24xf32>
    %cst_45 = arith.constant dense<0.000000e+00> : vector<2x24xf32>
    %130 = vector.multi_reduction <add>, %129, %cst_45 [2] : vector<2x24x24xf32> to vector<2x24xf32>
    %131 = vector.shape_cast %130 : vector<2x24xf32> to vector<2x24x1xf32>
    %132 = tpu.reciprocal %131 {approx = true} : vector<2x24x1xf32> -> vector<2x24x1xf32>
    %133 = vector.broadcast %132 : vector<2x24x1xf32> to vector<2x24x24xf32>
    %134 = arith.mulf %129, %133 : vector<2x24x24xf32>
    "tpu.trace_start"() <{level = 10 : i32, message = "bqk,bkd->bqd"}> : () -> ()
    %cst_46 = arith.constant dense<0.000000e+00> : vector<2x24x16xf32>
    %135 = tpu.matmul %134, %120, %cst_46 {dimension_numbers = #tpu.dot_dimension_numbers<[2], [1], [1], [2], [0, 0, 0, 1, 1, 2], [0], [0]>} : vector<2x24x24xf32>, vector<2x24x16xf32>, vector<2x24x16xf32> -> vector<2x24x16xf32>
    "tpu.trace_stop"() : () -> ()
    %136 = tpu.concatenate %81, %99, %117, %135 in 2 : vector<2x24x16xf32>, vector<2x24x16xf32>, vector<2x24x16xf32>, vector<2x24x16xf32> -> vector<2x24x64xf32>
    %137 = vector.shape_cast %136 : vector<2x24x64xf32> to vector<48x64xf32>
    %138 = arith.truncf %137 : vector<48x64xf32> to vector<48x64xbf16>
    %c0_47 = arith.constant 0 : index
    %c0_48 = arith.constant 0 : index
    %c0_49 = arith.constant 0 : index
    %139 = vector.load %arg4[%c0_47, %c0_48, %c0_49] : memref<2x64x64xbf16, #tpu.memory_space<vmem>>, vector<1x64x64xbf16>
    %140 = vector.shape_cast %139 : vector<1x64x64xbf16> to vector<64x64xbf16>
    %cst_50 = arith.constant dense<0.000000e+00> : vector<48x64xf32>
    %141 = tpu.matmul %138, %140, %cst_50 {dimension_numbers = #tpu.dot_dimension_numbers<[1], [0], [0], [1], [0, 0, 1, 1], [], []>} : vector<48x64xbf16>, vector<64x64xbf16>, vector<48x64xf32> -> vector<48x64xf32>
    %142 = vector.broadcast %30 : vector<1x64xf32> to vector<48x64xf32>
    %143 = arith.addf %141, %142 : vector<48x64xf32>
    %144 = arith.addf %20, %143 : vector<48x64xf32>
    %cst_51 = arith.constant dense<0.000000e+00> : vector<48xf32>
    %145 = vector.multi_reduction <add>, %144, %cst_51 [1] : vector<48x64xf32> to vector<48xf32>
    %146 = vector.shape_cast %145 : vector<48xf32> to vector<48x1xf32>
    %cst_52 = arith.constant 6.400000e+01 : f32
    %147 = vector.broadcast %cst_52 : f32 to vector<48x1xf32>
    %148 = arith.divf %146, %147 : vector<48x1xf32>
    %149 = vector.broadcast %148 : vector<48x1xf32> to vector<48x64xf32>
    %150 = arith.subf %144, %149 : vector<48x64xf32>
    %151 = arith.mulf %150, %150 : vector<48x64xf32>
    %cst_53 = arith.constant dense<0.000000e+00> : vector<48xf32>
    %152 = vector.multi_reduction <add>, %151, %cst_53 [1] : vector<48x64xf32> to vector<48xf32>
    %153 = vector.shape_cast %152 : vector<48xf32> to vector<48x1xf32>
    %cst_54 = arith.constant 6.400000e+01 : f32
    %154 = vector.broadcast %cst_54 : f32 to vector<48x1xf32>
    %155 = arith.divf %153, %154 : vector<48x1xf32>
    %156 = vector.broadcast %148 : vector<48x1xf32> to vector<48x64xf32>
    %157 = arith.subf %144, %156 : vector<48x64xf32>
    %cst_55 = arith.constant 9.99999974E-6 : f32
    %158 = vector.broadcast %cst_55 : f32 to vector<48x1xf32>
    %159 = arith.addf %155, %158 : vector<48x1xf32>
    %160 = math.rsqrt %159 : vector<48x1xf32>
    %161 = vector.broadcast %160 : vector<48x1xf32> to vector<48x64xf32>
    %162 = arith.mulf %157, %161 : vector<48x64xf32>
    %163 = vector.broadcast %31 : vector<1x64xf32> to vector<48x64xf32>
    %164 = arith.mulf %162, %163 : vector<48x64xf32>
    %165 = vector.broadcast %32 : vector<1x64xf32> to vector<48x64xf32>
    %166 = arith.addf %164, %165 : vector<48x64xf32>
    %167 = arith.truncf %166 : vector<48x64xf32> to vector<48x64xbf16>
    %c0_56 = arith.constant 0 : index
    %c0_57 = arith.constant 0 : index
    %c0_58 = arith.constant 0 : index
    %168 = vector.load %arg5[%c0_56, %c0_57, %c0_58] : memref<2x64x256xbf16, #tpu.memory_space<vmem>>, vector<1x64x256xbf16>
    %169 = vector.shape_cast %168 : vector<1x64x256xbf16> to vector<64x256xbf16>
    %cst_59 = arith.constant dense<0.000000e+00> : vector<48x256xf32>
    %170 = tpu.matmul %167, %169, %cst_59 {dimension_numbers = #tpu.dot_dimension_numbers<[1], [0], [0], [1], [0, 0, 1, 1], [], []>} : vector<48x64xbf16>, vector<64x256xbf16>, vector<48x256xf32> -> vector<48x256xf32>
    %171 = vector.broadcast %33 : vector<1x256xf32> to vector<48x256xf32>
    %172 = arith.addf %170, %171 : vector<48x256xf32>
    %cst_60 = arith.constant 5.000000e-01 : f32
    %173 = vector.broadcast %cst_60 : f32 to vector<48x256xf32>
    %174 = arith.mulf %173, %172 : vector<48x256xf32>
    %cst_61 = arith.constant 0.707106769 : f32
    %175 = vector.broadcast %cst_61 : f32 to vector<48x256xf32>
    %176 = arith.mulf %172, %175 : vector<48x256xf32>
    %177 = math.erf %176 : vector<48x256xf32>
    %cst_62 = arith.constant 1.000000e+00 : f32
    %178 = vector.broadcast %cst_62 : f32 to vector<48x256xf32>
    %179 = arith.addf %178, %177 : vector<48x256xf32>
    %180 = arith.mulf %174, %179 : vector<48x256xf32>
    %181 = arith.truncf %180 : vector<48x256xf32> to vector<48x256xbf16>
    %c0_63 = arith.constant 0 : index
    %c0_64 = arith.constant 0 : index
    %c0_65 = arith.constant 0 : index
    %182 = vector.load %arg6[%c0_63, %c0_64, %c0_65] : memref<2x256x64xbf16, #tpu.memory_space<vmem>>, vector<1x256x64xbf16>
    %183 = vector.shape_cast %182 : vector<1x256x64xbf16> to vector<256x64xbf16>
    %cst_66 = arith.constant dense<0.000000e+00> : vector<48x64xf32>
    %184 = tpu.matmul %181, %183, %cst_66 {dimension_numbers = #tpu.dot_dimension_numbers<[1], [0], [0], [1], [0, 0, 1, 1], [], []>} : vector<48x256xbf16>, vector<256x64xbf16>, vector<48x64xf32> -> vector<48x64xf32>
    %185 = vector.broadcast %34 : vector<1x64xf32> to vector<48x64xf32>
    %186 = arith.addf %184, %185 : vector<48x64xf32>
    %187 = arith.addf %144, %186 : vector<48x64xf32>
    %c27 = arith.constant 27 : index
    %c0_67 = arith.constant 0 : index
    %188 = vector.load %arg1[%c27, %c0_67] : memref<40x256xf32, #tpu.memory_space<vmem>>, vector<1x64xf32>
    %c28 = arith.constant 28 : index
    %c0_68 = arith.constant 0 : index
    %189 = vector.load %arg1[%c28, %c0_68] : memref<40x256xf32, #tpu.memory_space<vmem>>, vector<1x64xf32>
    %c29 = arith.constant 29 : index
    %c0_69 = arith.constant 0 : index
    %190 = vector.load %arg1[%c29, %c0_69] : memref<40x256xf32, #tpu.memory_space<vmem>>, vector<1x192xf32>
    %c30 = arith.constant 30 : index
    %c0_70 = arith.constant 0 : index
    %191 = vector.load %arg1[%c30, %c0_70] : memref<40x256xf32, #tpu.memory_space<vmem>>, vector<1x64xf32>
    %c31 = arith.constant 31 : index
    %c0_71 = arith.constant 0 : index
    %192 = vector.load %arg1[%c31, %c0_71] : memref<40x256xf32, #tpu.memory_space<vmem>>, vector<1x64xf32>
    %c32 = arith.constant 32 : index
    %c0_72 = arith.constant 0 : index
    %193 = vector.load %arg1[%c32, %c0_72] : memref<40x256xf32, #tpu.memory_space<vmem>>, vector<1x64xf32>
    %c33 = arith.constant 33 : index
    %c0_73 = arith.constant 0 : index
    %194 = vector.load %arg1[%c33, %c0_73] : memref<40x256xf32, #tpu.memory_space<vmem>>, vector<1x256xf32>
    %c34 = arith.constant 34 : index
    %c0_74 = arith.constant 0 : index
    %195 = vector.load %arg1[%c34, %c0_74] : memref<40x256xf32, #tpu.memory_space<vmem>>, vector<1x64xf32>
    %cst_75 = arith.constant dense<0.000000e+00> : vector<48xf32>
    %196 = vector.multi_reduction <add>, %187, %cst_75 [1] : vector<48x64xf32> to vector<48xf32>
    %197 = vector.shape_cast %196 : vector<48xf32> to vector<48x1xf32>
    %cst_76 = arith.constant 6.400000e+01 : f32
    %198 = vector.broadcast %cst_76 : f32 to vector<48x1xf32>
    %199 = arith.divf %197, %198 : vector<48x1xf32>
    %200 = vector.broadcast %199 : vector<48x1xf32> to vector<48x64xf32>
    %201 = arith.subf %187, %200 : vector<48x64xf32>
    %202 = arith.mulf %201, %201 : vector<48x64xf32>
    %cst_77 = arith.constant dense<0.000000e+00> : vector<48xf32>
    %203 = vector.multi_reduction <add>, %202, %cst_77 [1] : vector<48x64xf32> to vector<48xf32>
    %204 = vector.shape_cast %203 : vector<48xf32> to vector<48x1xf32>
    %cst_78 = arith.constant 6.400000e+01 : f32
    %205 = vector.broadcast %cst_78 : f32 to vector<48x1xf32>
    %206 = arith.divf %204, %205 : vector<48x1xf32>
    %207 = vector.broadcast %199 : vector<48x1xf32> to vector<48x64xf32>
    %208 = arith.subf %187, %207 : vector<48x64xf32>
    %cst_79 = arith.constant 9.99999974E-6 : f32
    %209 = vector.broadcast %cst_79 : f32 to vector<48x1xf32>
    %210 = arith.addf %206, %209 : vector<48x1xf32>
    %211 = math.rsqrt %210 : vector<48x1xf32>
    %212 = vector.broadcast %211 : vector<48x1xf32> to vector<48x64xf32>
    %213 = arith.mulf %208, %212 : vector<48x64xf32>
    %214 = vector.broadcast %188 : vector<1x64xf32> to vector<48x64xf32>
    %215 = arith.mulf %213, %214 : vector<48x64xf32>
    %216 = vector.broadcast %189 : vector<1x64xf32> to vector<48x64xf32>
    %217 = arith.addf %215, %216 : vector<48x64xf32>
    %218 = arith.truncf %217 : vector<48x64xf32> to vector<48x64xbf16>
    %c1_80 = arith.constant 1 : index
    %c0_81 = arith.constant 0 : index
    %c0_82 = arith.constant 0 : index
    %219 = vector.load %arg3[%c1_80, %c0_81, %c0_82] : memref<2x64x192xbf16, #tpu.memory_space<vmem>>, vector<1x64x192xbf16>
    %220 = vector.shape_cast %219 : vector<1x64x192xbf16> to vector<64x192xbf16>
    %cst_83 = arith.constant dense<0.000000e+00> : vector<48x192xf32>
    %221 = tpu.matmul %218, %220, %cst_83 {dimension_numbers = #tpu.dot_dimension_numbers<[1], [0], [0], [1], [0, 0, 1, 1], [], []>} : vector<48x64xbf16>, vector<64x192xbf16>, vector<48x192xf32> -> vector<48x192xf32>
    %222 = vector.broadcast %190 : vector<1x192xf32> to vector<48x192xf32>
    %223 = arith.addf %221, %222 : vector<48x192xf32>
    %224 = vector.shape_cast %223 : vector<48x192xf32> to vector<2x24x192xf32>
    %225 = vector.extract_strided_slice %224 {offsets = [0, 0, 0], sizes = [2, 24, 16], strides = [1, 1, 1]} : vector<2x24x192xf32> to vector<2x24x16xf32>
    %226 = vector.extract_strided_slice %224 {offsets = [0, 0, 64], sizes = [2, 24, 16], strides = [1, 1, 1]} : vector<2x24x192xf32> to vector<2x24x16xf32>
    %227 = vector.extract_strided_slice %224 {offsets = [0, 0, 128], sizes = [2, 24, 16], strides = [1, 1, 1]} : vector<2x24x192xf32> to vector<2x24x16xf32>
    "tpu.trace_start"() <{level = 10 : i32, message = "bqd,bkd->bqk"}> : () -> ()
    %cst_84 = arith.constant dense<0.000000e+00> : vector<2x24x24xf32>
    %228 = tpu.matmul %225, %226, %cst_84 {dimension_numbers = #tpu.dot_dimension_numbers<[2], [2], [1], [1], [0, 0, 0, 1, 1, 1], [0], [0]>} : vector<2x24x16xf32>, vector<2x24x16xf32>, vector<2x24x24xf32> -> vector<2x24x24xf32>
    "tpu.trace_stop"() : () -> ()
    %cst_85 = arith.constant 2.500000e-01 : f32
    %229 = vector.broadcast %cst_85 : f32 to vector<2x24x24xf32>
    %230 = arith.mulf %228, %229 : vector<2x24x24xf32>
    %231 = arith.addf %230, %26 : vector<2x24x24xf32>
    %cst_86 = arith.constant dense<0xFF800000> : vector<2x24xf32>
    %232 = vector.multi_reduction <maximumf>, %231, %cst_86 [2] : vector<2x24x24xf32> to vector<2x24xf32>
    %233 = vector.shape_cast %232 : vector<2x24xf32> to vector<2x24x1xf32>
    %234 = vector.broadcast %233 : vector<2x24x1xf32> to vector<2x24x24xf32>
    %235 = arith.subf %231, %234 : vector<2x24x24xf32>
    %236 = math.exp %235 : vector<2x24x24xf32>
    %cst_87 = arith.constant dense<0.000000e+00> : vector<2x24xf32>
    %237 = vector.multi_reduction <add>, %236, %cst_87 [2] : vector<2x24x24xf32> to vector<2x24xf32>
    %238 = vector.shape_cast %237 : vector<2x24xf32> to vector<2x24x1xf32>
    %239 = tpu.reciprocal %238 {approx = true} : vector<2x24x1xf32> -> vector<2x24x1xf32>
    %240 = vector.broadcast %239 : vector<2x24x1xf32> to vector<2x24x24xf32>
    %241 = arith.mulf %236, %240 : vector<2x24x24xf32>
    "tpu.trace_start"() <{level = 10 : i32, message = "bqk,bkd->bqd"}> : () -> ()
    %cst_88 = arith.constant dense<0.000000e+00> : vector<2x24x16xf32>
    %242 = tpu.matmul %241, %227, %cst_88 {dimension_numbers = #tpu.dot_dimension_numbers<[2], [1], [1], [2], [0, 0, 0, 1, 1, 2], [0], [0]>} : vector<2x24x24xf32>, vector<2x24x16xf32>, vector<2x24x16xf32> -> vector<2x24x16xf32>
    "tpu.trace_stop"() : () -> ()
    %243 = vector.extract_strided_slice %224 {offsets = [0, 0, 16], sizes = [2, 24, 16], strides = [1, 1, 1]} : vector<2x24x192xf32> to vector<2x24x16xf32>
    %244 = vector.extract_strided_slice %224 {offsets = [0, 0, 80], sizes = [2, 24, 16], strides = [1, 1, 1]} : vector<2x24x192xf32> to vector<2x24x16xf32>
    %245 = vector.extract_strided_slice %224 {offsets = [0, 0, 144], sizes = [2, 24, 16], strides = [1, 1, 1]} : vector<2x24x192xf32> to vector<2x24x16xf32>
    "tpu.trace_start"() <{level = 10 : i32, message = "bqd,bkd->bqk"}> : () -> ()
    %cst_89 = arith.constant dense<0.000000e+00> : vector<2x24x24xf32>
    %246 = tpu.matmul %243, %244, %cst_89 {dimension_numbers = #tpu.dot_dimension_numbers<[2], [2], [1], [1], [0, 0, 0, 1, 1, 1], [0], [0]>} : vector<2x24x16xf32>, vector<2x24x16xf32>, vector<2x24x24xf32> -> vector<2x24x24xf32>
    "tpu.trace_stop"() : () -> ()
    %cst_90 = arith.constant 2.500000e-01 : f32
    %247 = vector.broadcast %cst_90 : f32 to vector<2x24x24xf32>
    %248 = arith.mulf %246, %247 : vector<2x24x24xf32>
    %249 = arith.addf %248, %26 : vector<2x24x24xf32>
    %cst_91 = arith.constant dense<0xFF800000> : vector<2x24xf32>
    %250 = vector.multi_reduction <maximumf>, %249, %cst_91 [2] : vector<2x24x24xf32> to vector<2x24xf32>
    %251 = vector.shape_cast %250 : vector<2x24xf32> to vector<2x24x1xf32>
    %252 = vector.broadcast %251 : vector<2x24x1xf32> to vector<2x24x24xf32>
    %253 = arith.subf %249, %252 : vector<2x24x24xf32>
    %254 = math.exp %253 : vector<2x24x24xf32>
    %cst_92 = arith.constant dense<0.000000e+00> : vector<2x24xf32>
    %255 = vector.multi_reduction <add>, %254, %cst_92 [2] : vector<2x24x24xf32> to vector<2x24xf32>
    %256 = vector.shape_cast %255 : vector<2x24xf32> to vector<2x24x1xf32>
    %257 = tpu.reciprocal %256 {approx = true} : vector<2x24x1xf32> -> vector<2x24x1xf32>
    %258 = vector.broadcast %257 : vector<2x24x1xf32> to vector<2x24x24xf32>
    %259 = arith.mulf %254, %258 : vector<2x24x24xf32>
    "tpu.trace_start"() <{level = 10 : i32, message = "bqk,bkd->bqd"}> : () -> ()
    %cst_93 = arith.constant dense<0.000000e+00> : vector<2x24x16xf32>
    %260 = tpu.matmul %259, %245, %cst_93 {dimension_numbers = #tpu.dot_dimension_numbers<[2], [1], [1], [2], [0, 0, 0, 1, 1, 2], [0], [0]>} : vector<2x24x24xf32>, vector<2x24x16xf32>, vector<2x24x16xf32> -> vector<2x24x16xf32>
    "tpu.trace_stop"() : () -> ()
    %261 = vector.extract_strided_slice %224 {offsets = [0, 0, 32], sizes = [2, 24, 16], strides = [1, 1, 1]} : vector<2x24x192xf32> to vector<2x24x16xf32>
    %262 = vector.extract_strided_slice %224 {offsets = [0, 0, 96], sizes = [2, 24, 16], strides = [1, 1, 1]} : vector<2x24x192xf32> to vector<2x24x16xf32>
    %263 = vector.extract_strided_slice %224 {offsets = [0, 0, 160], sizes = [2, 24, 16], strides = [1, 1, 1]} : vector<2x24x192xf32> to vector<2x24x16xf32>
    "tpu.trace_start"() <{level = 10 : i32, message = "bqd,bkd->bqk"}> : () -> ()
    %cst_94 = arith.constant dense<0.000000e+00> : vector<2x24x24xf32>
    %264 = tpu.matmul %261, %262, %cst_94 {dimension_numbers = #tpu.dot_dimension_numbers<[2], [2], [1], [1], [0, 0, 0, 1, 1, 1], [0], [0]>} : vector<2x24x16xf32>, vector<2x24x16xf32>, vector<2x24x24xf32> -> vector<2x24x24xf32>
    "tpu.trace_stop"() : () -> ()
    %cst_95 = arith.constant 2.500000e-01 : f32
    %265 = vector.broadcast %cst_95 : f32 to vector<2x24x24xf32>
    %266 = arith.mulf %264, %265 : vector<2x24x24xf32>
    %267 = arith.addf %266, %26 : vector<2x24x24xf32>
    %cst_96 = arith.constant dense<0xFF800000> : vector<2x24xf32>
    %268 = vector.multi_reduction <maximumf>, %267, %cst_96 [2] : vector<2x24x24xf32> to vector<2x24xf32>
    %269 = vector.shape_cast %268 : vector<2x24xf32> to vector<2x24x1xf32>
    %270 = vector.broadcast %269 : vector<2x24x1xf32> to vector<2x24x24xf32>
    %271 = arith.subf %267, %270 : vector<2x24x24xf32>
    %272 = math.exp %271 : vector<2x24x24xf32>
    %cst_97 = arith.constant dense<0.000000e+00> : vector<2x24xf32>
    %273 = vector.multi_reduction <add>, %272, %cst_97 [2] : vector<2x24x24xf32> to vector<2x24xf32>
    %274 = vector.shape_cast %273 : vector<2x24xf32> to vector<2x24x1xf32>
    %275 = tpu.reciprocal %274 {approx = true} : vector<2x24x1xf32> -> vector<2x24x1xf32>
    %276 = vector.broadcast %275 : vector<2x24x1xf32> to vector<2x24x24xf32>
    %277 = arith.mulf %272, %276 : vector<2x24x24xf32>
    "tpu.trace_start"() <{level = 10 : i32, message = "bqk,bkd->bqd"}> : () -> ()
    %cst_98 = arith.constant dense<0.000000e+00> : vector<2x24x16xf32>
    %278 = tpu.matmul %277, %263, %cst_98 {dimension_numbers = #tpu.dot_dimension_numbers<[2], [1], [1], [2], [0, 0, 0, 1, 1, 2], [0], [0]>} : vector<2x24x24xf32>, vector<2x24x16xf32>, vector<2x24x16xf32> -> vector<2x24x16xf32>
    "tpu.trace_stop"() : () -> ()
    %279 = vector.extract_strided_slice %224 {offsets = [0, 0, 48], sizes = [2, 24, 16], strides = [1, 1, 1]} : vector<2x24x192xf32> to vector<2x24x16xf32>
    %280 = vector.extract_strided_slice %224 {offsets = [0, 0, 112], sizes = [2, 24, 16], strides = [1, 1, 1]} : vector<2x24x192xf32> to vector<2x24x16xf32>
    %281 = vector.extract_strided_slice %224 {offsets = [0, 0, 176], sizes = [2, 24, 16], strides = [1, 1, 1]} : vector<2x24x192xf32> to vector<2x24x16xf32>
    "tpu.trace_start"() <{level = 10 : i32, message = "bqd,bkd->bqk"}> : () -> ()
    %cst_99 = arith.constant dense<0.000000e+00> : vector<2x24x24xf32>
    %282 = tpu.matmul %279, %280, %cst_99 {dimension_numbers = #tpu.dot_dimension_numbers<[2], [2], [1], [1], [0, 0, 0, 1, 1, 1], [0], [0]>} : vector<2x24x16xf32>, vector<2x24x16xf32>, vector<2x24x24xf32> -> vector<2x24x24xf32>
    "tpu.trace_stop"() : () -> ()
    %cst_100 = arith.constant 2.500000e-01 : f32
    %283 = vector.broadcast %cst_100 : f32 to vector<2x24x24xf32>
    %284 = arith.mulf %282, %283 : vector<2x24x24xf32>
    %285 = arith.addf %284, %26 : vector<2x24x24xf32>
    %cst_101 = arith.constant dense<0xFF800000> : vector<2x24xf32>
    %286 = vector.multi_reduction <maximumf>, %285, %cst_101 [2] : vector<2x24x24xf32> to vector<2x24xf32>
    %287 = vector.shape_cast %286 : vector<2x24xf32> to vector<2x24x1xf32>
    %288 = vector.broadcast %287 : vector<2x24x1xf32> to vector<2x24x24xf32>
    %289 = arith.subf %285, %288 : vector<2x24x24xf32>
    %290 = math.exp %289 : vector<2x24x24xf32>
    %cst_102 = arith.constant dense<0.000000e+00> : vector<2x24xf32>
    %291 = vector.multi_reduction <add>, %290, %cst_102 [2] : vector<2x24x24xf32> to vector<2x24xf32>
    %292 = vector.shape_cast %291 : vector<2x24xf32> to vector<2x24x1xf32>
    %293 = tpu.reciprocal %292 {approx = true} : vector<2x24x1xf32> -> vector<2x24x1xf32>
    %294 = vector.broadcast %293 : vector<2x24x1xf32> to vector<2x24x24xf32>
    %295 = arith.mulf %290, %294 : vector<2x24x24xf32>
    "tpu.trace_start"() <{level = 10 : i32, message = "bqk,bkd->bqd"}> : () -> ()
    %cst_103 = arith.constant dense<0.000000e+00> : vector<2x24x16xf32>
    %296 = tpu.matmul %295, %281, %cst_103 {dimension_numbers = #tpu.dot_dimension_numbers<[2], [1], [1], [2], [0, 0, 0, 1, 1, 2], [0], [0]>} : vector<2x24x24xf32>, vector<2x24x16xf32>, vector<2x24x16xf32> -> vector<2x24x16xf32>
    "tpu.trace_stop"() : () -> ()
    %297 = tpu.concatenate %242, %260, %278, %296 in 2 : vector<2x24x16xf32>, vector<2x24x16xf32>, vector<2x24x16xf32>, vector<2x24x16xf32> -> vector<2x24x64xf32>
    %298 = vector.shape_cast %297 : vector<2x24x64xf32> to vector<48x64xf32>
    %299 = arith.truncf %298 : vector<48x64xf32> to vector<48x64xbf16>
    %c1_104 = arith.constant 1 : index
    %c0_105 = arith.constant 0 : index
    %c0_106 = arith.constant 0 : index
    %300 = vector.load %arg4[%c1_104, %c0_105, %c0_106] : memref<2x64x64xbf16, #tpu.memory_space<vmem>>, vector<1x64x64xbf16>
    %301 = vector.shape_cast %300 : vector<1x64x64xbf16> to vector<64x64xbf16>
    %cst_107 = arith.constant dense<0.000000e+00> : vector<48x64xf32>
    %302 = tpu.matmul %299, %301, %cst_107 {dimension_numbers = #tpu.dot_dimension_numbers<[1], [0], [0], [1], [0, 0, 1, 1], [], []>} : vector<48x64xbf16>, vector<64x64xbf16>, vector<48x64xf32> -> vector<48x64xf32>
    %303 = vector.broadcast %191 : vector<1x64xf32> to vector<48x64xf32>
    %304 = arith.addf %302, %303 : vector<48x64xf32>
    %305 = arith.addf %187, %304 : vector<48x64xf32>
    %cst_108 = arith.constant dense<0.000000e+00> : vector<48xf32>
    %306 = vector.multi_reduction <add>, %305, %cst_108 [1] : vector<48x64xf32> to vector<48xf32>
    %307 = vector.shape_cast %306 : vector<48xf32> to vector<48x1xf32>
    %cst_109 = arith.constant 6.400000e+01 : f32
    %308 = vector.broadcast %cst_109 : f32 to vector<48x1xf32>
    %309 = arith.divf %307, %308 : vector<48x1xf32>
    %310 = vector.broadcast %309 : vector<48x1xf32> to vector<48x64xf32>
    %311 = arith.subf %305, %310 : vector<48x64xf32>
    %312 = arith.mulf %311, %311 : vector<48x64xf32>
    %cst_110 = arith.constant dense<0.000000e+00> : vector<48xf32>
    %313 = vector.multi_reduction <add>, %312, %cst_110 [1] : vector<48x64xf32> to vector<48xf32>
    %314 = vector.shape_cast %313 : vector<48xf32> to vector<48x1xf32>
    %cst_111 = arith.constant 6.400000e+01 : f32
    %315 = vector.broadcast %cst_111 : f32 to vector<48x1xf32>
    %316 = arith.divf %314, %315 : vector<48x1xf32>
    %317 = vector.broadcast %309 : vector<48x1xf32> to vector<48x64xf32>
    %318 = arith.subf %305, %317 : vector<48x64xf32>
    %cst_112 = arith.constant 9.99999974E-6 : f32
    %319 = vector.broadcast %cst_112 : f32 to vector<48x1xf32>
    %320 = arith.addf %316, %319 : vector<48x1xf32>
    %321 = math.rsqrt %320 : vector<48x1xf32>
    %322 = vector.broadcast %321 : vector<48x1xf32> to vector<48x64xf32>
    %323 = arith.mulf %318, %322 : vector<48x64xf32>
    %324 = vector.broadcast %192 : vector<1x64xf32> to vector<48x64xf32>
    %325 = arith.mulf %323, %324 : vector<48x64xf32>
    %326 = vector.broadcast %193 : vector<1x64xf32> to vector<48x64xf32>
    %327 = arith.addf %325, %326 : vector<48x64xf32>
    %328 = arith.truncf %327 : vector<48x64xf32> to vector<48x64xbf16>
    %c1_113 = arith.constant 1 : index
    %c0_114 = arith.constant 0 : index
    %c0_115 = arith.constant 0 : index
    %329 = vector.load %arg5[%c1_113, %c0_114, %c0_115] : memref<2x64x256xbf16, #tpu.memory_space<vmem>>, vector<1x64x256xbf16>
    %330 = vector.shape_cast %329 : vector<1x64x256xbf16> to vector<64x256xbf16>
    %cst_116 = arith.constant dense<0.000000e+00> : vector<48x256xf32>
    %331 = tpu.matmul %328, %330, %cst_116 {dimension_numbers = #tpu.dot_dimension_numbers<[1], [0], [0], [1], [0, 0, 1, 1], [], []>} : vector<48x64xbf16>, vector<64x256xbf16>, vector<48x256xf32> -> vector<48x256xf32>
    %332 = vector.broadcast %194 : vector<1x256xf32> to vector<48x256xf32>
    %333 = arith.addf %331, %332 : vector<48x256xf32>
    %cst_117 = arith.constant 5.000000e-01 : f32
    %334 = vector.broadcast %cst_117 : f32 to vector<48x256xf32>
    %335 = arith.mulf %334, %333 : vector<48x256xf32>
    %cst_118 = arith.constant 0.707106769 : f32
    %336 = vector.broadcast %cst_118 : f32 to vector<48x256xf32>
    %337 = arith.mulf %333, %336 : vector<48x256xf32>
    %338 = math.erf %337 : vector<48x256xf32>
    %cst_119 = arith.constant 1.000000e+00 : f32
    %339 = vector.broadcast %cst_119 : f32 to vector<48x256xf32>
    %340 = arith.addf %339, %338 : vector<48x256xf32>
    %341 = arith.mulf %335, %340 : vector<48x256xf32>
    %342 = arith.truncf %341 : vector<48x256xf32> to vector<48x256xbf16>
    %c1_120 = arith.constant 1 : index
    %c0_121 = arith.constant 0 : index
    %c0_122 = arith.constant 0 : index
    %343 = vector.load %arg6[%c1_120, %c0_121, %c0_122] : memref<2x256x64xbf16, #tpu.memory_space<vmem>>, vector<1x256x64xbf16>
    %344 = vector.shape_cast %343 : vector<1x256x64xbf16> to vector<256x64xbf16>
    %cst_123 = arith.constant dense<0.000000e+00> : vector<48x64xf32>
    %345 = tpu.matmul %342, %344, %cst_123 {dimension_numbers = #tpu.dot_dimension_numbers<[1], [0], [0], [1], [0, 0, 1, 1], [], []>} : vector<48x256xbf16>, vector<256x64xbf16>, vector<48x64xf32> -> vector<48x64xf32>
    %346 = vector.broadcast %195 : vector<1x64xf32> to vector<48x64xf32>
    %347 = arith.addf %345, %346 : vector<48x64xf32>
    %348 = arith.addf %305, %347 : vector<48x64xf32>
    %c35 = arith.constant 35 : index
    %c0_124 = arith.constant 0 : index
    %349 = vector.load %arg1[%c35, %c0_124] : memref<40x256xf32, #tpu.memory_space<vmem>>, vector<1x64xf32>
    %c36 = arith.constant 36 : index
    %c0_125 = arith.constant 0 : index
    %350 = vector.load %arg1[%c36, %c0_125] : memref<40x256xf32, #tpu.memory_space<vmem>>, vector<1x64xf32>
    %c37 = arith.constant 37 : index
    %c0_126 = arith.constant 0 : index
    %351 = vector.load %arg1[%c37, %c0_126] : memref<40x256xf32, #tpu.memory_space<vmem>>, vector<1x16xf32>
    %352 = vector.shape_cast %348 : vector<48x64xf32> to vector<2x24x64xf32>
    %353 = vector.extract_strided_slice %352 {offsets = [0, 0, 0], sizes = [2, 1, 64], strides = [1, 1, 1]} : vector<2x24x64xf32> to vector<2x1x64xf32>
    %354 = vector.shape_cast %353 : vector<2x1x64xf32> to vector<2x64xf32>
    %cst_127 = arith.constant dense<0.000000e+00> : vector<2xf32>
    %355 = vector.multi_reduction <add>, %354, %cst_127 [1] : vector<2x64xf32> to vector<2xf32>
    %356 = vector.shape_cast %355 : vector<2xf32> to vector<2x1xf32>
    %cst_128 = arith.constant 6.400000e+01 : f32
    %357 = vector.broadcast %cst_128 : f32 to vector<2x1xf32>
    %358 = arith.divf %356, %357 : vector<2x1xf32>
    %359 = vector.broadcast %358 : vector<2x1xf32> to vector<2x64xf32>
    %360 = arith.subf %354, %359 : vector<2x64xf32>
    %361 = arith.mulf %360, %360 : vector<2x64xf32>
    %cst_129 = arith.constant dense<0.000000e+00> : vector<2xf32>
    %362 = vector.multi_reduction <add>, %361, %cst_129 [1] : vector<2x64xf32> to vector<2xf32>
    %363 = vector.shape_cast %362 : vector<2xf32> to vector<2x1xf32>
    %cst_130 = arith.constant 6.400000e+01 : f32
    %364 = vector.broadcast %cst_130 : f32 to vector<2x1xf32>
    %365 = arith.divf %363, %364 : vector<2x1xf32>
    %366 = vector.broadcast %358 : vector<2x1xf32> to vector<2x64xf32>
    %367 = arith.subf %354, %366 : vector<2x64xf32>
    %cst_131 = arith.constant 9.99999974E-6 : f32
    %368 = vector.broadcast %cst_131 : f32 to vector<2x1xf32>
    %369 = arith.addf %365, %368 : vector<2x1xf32>
    %370 = math.rsqrt %369 : vector<2x1xf32>
    %371 = vector.broadcast %370 : vector<2x1xf32> to vector<2x64xf32>
    %372 = arith.mulf %367, %371 : vector<2x64xf32>
    %373 = vector.broadcast %349 : vector<1x64xf32> to vector<2x64xf32>
    %374 = arith.mulf %372, %373 : vector<2x64xf32>
    %375 = vector.broadcast %350 : vector<1x64xf32> to vector<2x64xf32>
    %376 = arith.addf %374, %375 : vector<2x64xf32>
    %377 = arith.truncf %376 : vector<2x64xf32> to vector<2x64xbf16>
    %c0_132 = arith.constant 0 : index
    %c0_133 = arith.constant 0 : index
    %378 = vector.load %arg7[%c0_132, %c0_133] : memref<64x16xbf16, #tpu.memory_space<vmem>>, vector<64x16xbf16>
    %cst_134 = arith.constant dense<0.000000e+00> : vector<2x16xf32>
    %379 = tpu.matmul %377, %378, %cst_134 {dimension_numbers = #tpu.dot_dimension_numbers<[1], [0], [0], [1], [0, 0, 1, 1], [], []>} : vector<2x64xbf16>, vector<64x16xbf16>, vector<2x16xf32> -> vector<2x16xf32>
    %380 = vector.broadcast %351 : vector<1x16xf32> to vector<2x16xf32>
    %381 = arith.addf %379, %380 : vector<2x16xf32>
    %c0_135 = arith.constant 0 : index
    %c0_136 = arith.constant 0 : index
    %382 = vector.load %arg8[%c0_135, %c0_136] : memref<2x16xf32, #tpu.memory_space<vmem>>, vector<2x16xf32>
    tpu.vector_store %arg8[%c0_135, %c0_136], %381 {strides = array<i32>} : memref<2x16xf32, #tpu.memory_space<vmem>>, vector<2x16xf32>,
    return
  }
}

</mosaic_0001>

<bundles_post_ra>
// kernel: vit_forward.1
= control target key start
LH: loop header
LB: loop body
LE: loop exit
PB: predicated region body
PF: predicated region fallthrough
CT: control target
= control target key end

     0   :  { %vm74_vm0 = vcmask 392192   ;;  %s9675_s0 = inlined_call_operand.vmem [shape: bf16[32,48], index: 0, kind: input, shape index: {}]   ;;  %s9676_s1 = inlined_call_operand.vmem [shape: f32[40,256], index: 1, kind: input, shape index: {}]   ;;  %s9677_s2 = inlined_call_operand.vmem [shape: bf16[48,64], index: 2, kind: input, shape index: {}]   ;;  %s9678_s3 = inlined_call_operand.vmem [shape: bf16[2,64,192], index: 3, kind: input, shape index: {}]   ;;  %s9679_s4 = inlined_call_operand.vmem [shape: bf16[2,64,64], index: 4, kind: input, shape index: {}]   ;;  %s9680_s5 = inlined_call_operand.vmem [shape: bf16[2,64,256], index: 5, kind: input, shape index: {}]   ;;  %s9681_s6 = inlined_call_operand.vmem [shape: bf16[2,256,64], index: 6, kind: input, shape index: {}]   ;;  %s9682_s7 = inlined_call_operand.vmem [shape: bf16[64,16], index: 7, kind: input, shape index: {}]   ;;  %s9683_s8 = inlined_call_operand.hbm [shape: f32[2,16], index: 8, kind: output, shape index: {}]  }
   0x1   :  { %v7449_v0 = vld [vmem:[%s9677_s2] sm:$0xff]   ;;  %v7450_v1 = vld [vmem:[%s9677_s2 + $0x8] sm:$0xff]   ;;  %v7451_v3 = vld [vmem:[%s9677_s2 + $0x10] sm:$0xff]  }
   0x2   :  { %6552 = vmatprep.subr.bf16.mxu1 %v7449_v0  ;;  %v7452_v2 = vld [vmem:[%s9675_s0] sm:$0xff]   ;;  %v7453_v4 = vld [vmem:[%s9675_s0 + $0x8] sm:$0xff]  }
   0x3   :  { %6553 = vmatpush3.bf16.msra.mxu1 %v7449_v0  ;;  %6558 = vmatprep.mubr.msk.bf16.mxu1 %vm74_vm0, %v7452_v2 }
   0x4   :  { %6554 = vmatprep.subr.bf16.mxu1 %v7450_v1 }
   0x7   :  { %6555 = vmatpush3.bf16.msra.mxu1 %v7450_v1 }
   0x8   :  { %6556 = vmatprep.subr.bf16.mxu1 %v7451_v3 }
   0xb   :  { %6557 = vmatpush3.bf16.msra.mxu1 %v7451_v3 }
   0xe   :  { %6559 = vmatmul.mubr.msk.bf16.vlgmr.msra.gmra.mrb[0].mxu1 %vm74_vm0, %v7453_v4 }
   0xf   :  { %13 = vsyncpa [#allocation3], 0  ;;  %v33_v5 = vld [vmem:[%s9676_s1] sm:$0xfc]  ;;  %v34_v6 = vld [vmem:[%s9676_s1 + $0x10] sm:$0xff]  ;;  %vm134_vm1 = vcmask 1044480  }
  0x10   :  { %v35_v7 = vld [vmem:[%s9676_s1 + $0x20] sm:$0x7]  ;;  %v135_v8 = vrot.slane %v33_v5, 3  ;;  %v136_v9 = vrot.slane %v34_v6, 3  ;;  %vm153_vm2 = vcmask 1040384   ;;  %vm184_vm3 = vcmask 523264  }
  0x11   :  { %v32_v10 = vld [vmem:[%s9676_s1 + $0x1] ss:$0 sm:$0xff]  ;;  %v31_v11 = vld [vmem:[%s9676_s1] ss:$0 sm:$0xff]  ;;  %v138_v12 = vrot.slane %v35_v7, 3  ;;  %s7862_s21 = smov 64  }
  0x12   :  { %v137_v14 = vsel %vm134_vm1, %v135_v8, %v136_v9  ;;  %v130_v15 = vadd.f32 %v33_v5, %v32_v10  ;;  %vm7864_vm4 = vmmov 0   ;;  %vm419_vm5 = vcmask 130048   ;;  %s7866_s22 = smov 48   ;;  %s7867_s23 = smov 112  }
  0x13   :  { %v139_v20 = vsel %vm134_vm1, %v136_v9, %v138_v12  ;;  %v7454_v12 = vld [vmem:[%s9678_s3] ss:$8 sps:$4 sm:$0xff]   ;;  %vm8115_vm6 = vmpackc.low %vm419_vm5, %vm419_vm5  ;;  %vm625_vm8 = vcmask 195584   ;;  %s7868_s24 = smov 32   ;;  %s7869_s25 = smov 96   ;;  %vm2400_vm9 = vcmask 261120  }
  0x14   :  { %v147_v26 = vrot.slane %v130_v15, 2  ;;  %v7462_v15 = vld [vmem:[%s9678_s3 + $0x24] ss:$8 sps:$4 sm:$0xff]   ;;  %s7870_s26 = smov 16   ;;  %s7871_s27 = smov 80   ;;  %vm5825_vm10 = vcmask 1041409  }
  0x15   :  { %vm5828_vm11 = vcmask 517120   ;;  %vm5946_vm12 = vcmask 123904  }
  0xe1   :  { %v6560_v13 = vpop.f32.mrb[0].mxu1 }
  0xe2   :  { %v124_v16 = vadd.f32 %v6560_v13, %v31_v11  ;;  %v115_v17 = vpop.f32.mrb[1].mxu1  ;;  %v7459_v13 = vld [vmem:[%s9678_s3 + $0x14] ss:$8 sps:$4 sm:$0xff]  }
  0xe3   :  { %v116_v18 = vadd.f32 %v115_v17, %v31_v11  ;;  %v6561_v19 = vpop.f32.mrb[2].mxu1  ;;  %v7463_v17 = vld [vmem:[%s9678_s3 + $0x30] ss:$8 sps:$4 sm:$0xff]  }
  0xe4   :  { %v144_v21 = vadd.f32 %v137_v14, %v124_v16  ;;  %v127_v22 = vadd.f32 %v6561_v19, %v31_v11  ;;  %v118_v23 = vpop.f32.mrb[3].mxu1  ;;  %v7460_v16 = vld [vmem:[%s9678_s3 + $0x20] ss:$8 sps:$4 sm:$0xff]   ;;  %v7860_v19 = vmov 0  }
  0xe5   :  { %v142_v24 = vadd.f32 %v137_v14, %v116_v18  ;;  %v119_v25 = vadd.f32 %v118_v23, %v31_v11  ;;  %v7456_v11 = vld [vmem:[%s9678_s3 + $0x4] ss:$8 sps:$4 sm:$0xff]   ;;  %v7457_v14 = vld [vmem:[%s9678_s3 + $0x10] ss:$8 sps:$4 sm:$0xff]   ;;  %v7465_v18 = vld [vmem:[%s9678_s3 + $0x34] ss:$8 sps:$4 sm:$0xff]   ;;  %379 = vmatprep.mubr.bf16.mxu1 %v7860_v19 }
  0xe6   :  { %v145_v27 = vadd.f32 %v139_v20, %v127_v22  ;;  %v157_v30 = vrot.slane %v144_v21, 7  ;;  %347 = vmatprep.subr.bf16.mxu1 %v7456_v11  ;;  %v7861_v11 = vmov 0.0|0.0  }
  0xe7   :  { %v154_v28 = vrot.slane %v142_v24, 7  ;;  %v143_v29 = vadd.f32 %v139_v20, %v119_v25  ;;  %348 = vmatpush1.bf16.msra.mxu1 %v7454_v12  ;;  %7094 = vmatprep.subr.bf16.mxu0 %v7861_v11 }
  0xe8   :  { %v158_v31 = vrot.slane %v145_v27, 7  ;;  %v7967_v39 = vsel %vm153_vm2, %v147_v26, %v157_v30  ;;  %349 = vmatprep.subr.bf16.mxu1 %v7459_v13  ;;  %v5969_v13 = vld [vmem:[%s9676_s1 + $0x25] ss:$8 sm:$0x3] }
  0xe9   :  { %v155_v32 = vrot.slane %v143_v29, 7  ;;  %v7951_v33 = vsel %vm153_vm2, %v147_v26, %v154_v28  ;;  %v194_v41 = vsel %vm184_vm3, %v7967_v39, 0.0 }
  0xea   :  { %v185_v34 = vsel %vm184_vm3, %v7951_v33, 0.0  ;;  %v7956_v35 = vsel %vm153_vm2, %v157_v30, %v158_v31  ;;  %v7974_v42 = vsel %vm153_vm2, %v158_v31, 0.0 }
  0xeb   :  { %186 = vadd.xlane.f32.xlu0 %v185_v34  ;;  %v7959_v36 = vsel %vm153_vm2, %v155_v32, 0.0  ;;  %v7962_v37 = vsel %vm153_vm2, %v154_v28, %v155_v32  ;;  %v197_v43 = vsel %vm184_vm3, %v7956_v35, 0.0  ;;  %v200_v44 = vsel %vm184_vm3, %v7974_v42, 0.0  ;;  %350 = vmatpush1.bf16.msra.mxu1 %v7457_v14 }
  0xec   :  { %v191_v38 = vsel %vm184_vm3, %v7959_v36, 0.0  ;;  %v188_v40 = vsel %vm184_vm3, %v7962_v37, 0.0  ;;  %351 = vmatprep.subr.bf16.mxu1 %v7462_v15 }
  0xed   :  { %192 = vadd.xlane.f32.xlu1 %v191_v38 }
  0xef   :  { %189 = vadd.xlane.f32.xlu0 %v188_v40  ;;  %352 = vmatpush1.bf16.msra.mxu1 %v7460_v16 }
  0xf0   :  { %353 = vmatprep.subr.bf16.mxu1 %v7465_v18 }
  0xf1   :  { %195 = vadd.xlane.f32.xlu1 %v194_v41 }
  0xf3   :  { %198 = vadd.xlane.f32.xlu0 %v197_v43  ;;  %354 = vmatpush1.bf16.msra.mxu1 %v7463_v17 }
  0xf4   :  { %7102 = vmatprep.subr.bf16.mxu1 %v7861_v11 }
  0xf5   :  { %201 = vadd.xlane.f32.xlu1 %v200_v44 }
 0x178   :  { %v187_v45 = vpop.xlane.xlu0 %186 }
 0x179   :  { %v204_v46 = vmul.f32 0.015625, %v187_v45 }
 0x17a   :  { %v193_v47 = vpop.xlane.xlu1 %192 }
 0x17b   :  { %v7981_v48 = vsub.f32 %v7951_v33, %v204_v46  ;;  %v206_v49 = vmul.f32 0.015625, %v193_v47  ;;  %v174_v46 = vld [vmem:[%s9676_s1 + $0x23] ss:$0 sm:$0xff] }
 0x17c   :  { %v190_v50 = vpop.xlane.xlu0 %189 }
 0x17d   :  { %v7984_v51 = vsub.f32 %v7959_v36, %v206_v49  ;;  %v205_v52 = vmul.f32 0.015625, %v190_v50  ;;  %v216_v53 = vmul.f32 %v7981_v48, %v7981_v48 }
 0x17e   :  { %v196_v54 = vpop.xlane.xlu1 %195 }
 0x17f   :  { %v7989_v55 = vsub.f32 %v7962_v37, %v205_v52  ;;  %v207_v56 = vmul.f32 0.015625, %v196_v54  ;;  %v222_v57 = vsel %vm184_vm3, %v216_v53, 0.0  ;;  %v218_v58 = vmul.f32 %v7984_v51, %v7984_v51  ;;  %v175_v53 = vld [vmem:[%s9676_s1 + $0x24] ss:$0 sm:$0xff] }
 0x180   :  { %223 = vadd.xlane.f32.xlu0 %v222_v57  ;;  %v199_v59 = vpop.xlane.xlu0 %198 }
 0x181   :  { %v7995_v60 = vsub.f32 %v7967_v39, %v207_v56  ;;  %v208_v61 = vmul.f32 0.015625, %v199_v59  ;;  %v217_v62 = vmul.f32 %v7989_v55, %v7989_v55  ;;  %v228_v0 = vsel %vm184_vm3, %v218_v58, 0.0 }
 0x182   :  { %v202_v63 = vpop.xlane.xlu1 %201 }
 0x183   :  { %v8001_v1 = vsub.f32 %v7956_v35, %v208_v61  ;;  %v209_v2 = vmul.f32 0.015625, %v202_v63  ;;  %v225_v3 = vsel %vm184_vm3, %v217_v62, 0.0  ;;  %v219_v4 = vmul.f32 %v7995_v60, %v7995_v60 }
 0x184   :  { %229 = vadd.xlane.f32.xlu0 %v228_v0  ;;  %226 = vadd.xlane.f32.xlu1 %v225_v3 }
 0x185   :  { %v8007_v5 = vsub.f32 %v7974_v42, %v209_v2  ;;  %v220_v6 = vmul.f32 %v8001_v1, %v8001_v1  ;;  %v231_v7 = vsel %vm184_vm3, %v219_v4, 0.0 }
 0x187   :  { %v234_v8 = vsel %vm184_vm3, %v220_v6, 0.0  ;;  %v221_v9 = vmul.f32 %v8007_v5, %v8007_v5 }
 0x188   :  { %232 = vadd.xlane.f32.xlu1 %v231_v7  ;;  %235 = vadd.xlane.f32.xlu0 %v234_v8 }
 0x189   :  { %v237_v10 = vsel %vm184_vm3, %v221_v9, 0.0 }
 0x18c   :  { %238 = vadd.xlane.f32.xlu1 %v237_v10 }
 0x20d   :  { %v224_v20 = vpop.xlane.xlu0 %223 }
 0x20e   :  { %v240_v21 = vmul.f32 0.015625, %v224_v20 }
 0x210   :  { %v246_v22 = vadd.f32 1e-05, %v240_v21 }
 0x211   :  { %v227_v23 = vpop.xlane.xlu1 %226  ;;  %v230_v24 = vpop.xlane.xlu0 %229 }
 0x212   :  { %7546 = vrsqrt.f32 %v246_v22  ;;  %v241_v25 = vmul.f32 0.015625, %v227_v23  ;;  %v242_v26 = vmul.f32 0.015625, %v230_v24 }
 0x214   :  { %v247_v27 = vadd.f32 1e-05, %v241_v25  ;;  %v248_v28 = vadd.f32 1e-05, %v242_v26 }
 0x215   :  { %v233_v29 = vpop.xlane.xlu1 %232  ;;  %v236_v30 = vpop.xlane.xlu0 %235 }
 0x216   :  { %7548 = vrsqrt.f32 %v247_v27  ;;  %v243_v31 = vmul.f32 0.015625, %v233_v29  ;;  %v244_v34 = vmul.f32 0.015625, %v236_v30 }
 0x217   :  { %7550 = vrsqrt.f32 %v248_v28 }
 0x218   :  { %v249_v32 = vadd.f32 1e-05, %v243_v31  ;;  %v250_v43 = vadd.f32 1e-05, %v244_v34 }
 0x219   :  { %v239_v38 = vpop.xlane.xlu1 %238 }
 0x21a   :  { %7552 = vrsqrt.f32 %v249_v32  ;;  %v245_v40 = vmul.f32 0.015625, %v239_v38  ;;  %v7863_v32 = vmov 0.0  }
 0x21b   :  { %6568 = vmatprep.mubr.msk.f32.mxu0 %vm7864_vm4, %v7863_v32 }
 0x21c   :  { %v7547_v41 = vpop.eup %7546  ;;  %v251_v44 = vadd.f32 1e-05, %v245_v40 }
 0x21d   :  { %v258_v45 = vmul.f32 %v7547_v41, %v7981_v48 }
 0x21e   :  { %7554 = vrsqrt.f32 %v251_v44 }
 0x21f   :  { %7556 = vrsqrt.f32 %v250_v43  ;;  %v264_v49 = vmul.f32 %v258_v45, %v174_v46 }
 0x220   :  { %v7549_v47 = vpop.eup %7548 }
 0x221   :  { %v259_v50 = vmul.f32 %v7549_v47, %v7989_v55  ;;  %v7551_v52 = vpop.eup %7550  ;;  %v270_v57 = vadd.f32 %v264_v49, %v175_v53 }
 0x222   :  { %v260_v48 = vmul.f32 %v7551_v52, %v7984_v51 }
 0x223   :  { %v265_v54 = vmul.f32 %v259_v50, %v174_v46 }
 0x224   :  { %v7553_v56 = vpop.eup %7552  ;;  %v266_v0 = vmul.f32 %v260_v48, %v174_v46 }
 0x225   :  { %v271_v58 = vadd.f32 %v265_v54, %v175_v53  ;;  %v261_v59 = vmul.f32 %v7553_v56, %v7995_v60 }
 0x226   :  { %v272_v4 = vadd.f32 %v266_v0, %v175_v53 }
 0x227   :  { %v276_v61 = vpack.c.bf16 %v271_v58, %v270_v57  ;;  %v267_v62 = vmul.f32 %v261_v59, %v174_v46 }
 0x228   :  { %v7555_v63 = vpop.eup %7554 }
 0x229   :  { %5979 = vmatmul.mubr.msk.bf16.vlgmr.msra.gmra.mrb[4].mxu1 %vm184_vm3, %v276_v61  ;;  %v7557_v55 = vpop.eup %7556  ;;  %v273_v2 = vadd.f32 %v267_v62, %v175_v53  ;;  %v263_v3 = vmul.f32 %v7555_v63, %v8007_v5  ;;  %v170_v5 = vlaneseq }
 0x22a   :  { %389 = vmatprep.mubr.bf16.mxu1 %v7860_v19  ;;  %v262_v6 = vmul.f32 %v7557_v55, %v8001_v1 }
 0x22b   :  { %v277_v7 = vpack.c.bf16 %v273_v2, %v272_v4  ;;  %v269_v8 = vmul.f32 %v263_v3, %v174_v46  ;;  %v289_v1 = vshrl.u32 %v170_v5, 7 }
 0x22c   :  { %v268_v51 = vmul.f32 %v262_v6, %v174_v46  ;;  %v171_v6 = vand.u32 127, %v170_v5 }
 0x22d   :  { %v275_v60 = vadd.f32 %v269_v8, %v175_v53  ;;  %v8061_v12 = vsub.s32 0, %v289_v1  ;;  %v8066_v14 = vsub.s32 1, %v289_v1 }
 0x22e   :  { %v274_v9 = vadd.f32 %v268_v51, %v175_v53  ;;  %vm172_vm7 = vcmp.lt.s32.totalorder %v171_v6, 17 }
 0x22f   :  { %v291_v15 = vrot.slane %v5969_v13, %v8061_v12  ;;  %v295_v17 = vrot.slane %v5969_v13, %v8066_v14 }
 0x230   :  { %v278_v10 = vpack.c.bf16 %v275_v60, %v274_v9 }
 0x231   :  { %5980 = vmatmul.mubr.msk.bf16.gmra.mrb[8].mxu1 %vm184_vm3, %v277_v7  ;;  %v7865_v7 = vmov -1e+30  }
 0x232   :  { %399 = vmatprep.mubr.bf16.mxu1 %v7860_v19  ;;  %v8157_v8 = vsel %vm172_vm7, 0.0, %v7865_v7 }
 0x239   :  { %5981 = vmatmul.mubr.msk.bf16.gmra.mrb[12].mxu1 %vm184_vm3, %v278_v10 }
 0x23a   :  { %6598 = vmatprep.mubr.msk.f32.mxu1 %vm7864_vm4, %v7863_v32 }
 0x2fc   :  { %v381_v16 = vpop.f32.mrb[4].mxu1 }
 0x2fd   :  { %v383_v18 = vpop.f32.mrb[5].mxu1  ;;  %v8070_v21 = vadd.f32 %v381_v16, %v291_v15 }
 0x2fe   :  { %v385_v20 = vpop.f32.mrb[6].mxu1  ;;  %v384_v24 = vadd.f32 %v383_v18, %v295_v17 }
 0x2ff   :  { %v8072_v22 = vadd.f32 %v385_v20, %v291_v15  ;;  %v387_v23 = vpop.f32.mrb[7].mxu1 }
 0x300   :  { %v388_v25 = vadd.f32 %v387_v23, %v295_v17 }
 0x301   :  { %v8076_v26 = vpack.i.bf16 %v8072_v22, %v8070_v21 }
 0x302   :  { %v7103_v27 = vpack.c.bf16 %v388_v25, %v384_v24  ;;  %v8078_v28 = vpack.i.bf16 %v388_v25, %v384_v24 }
 0x303   :  { %7220 = vrot.lane.b32.xlu0 %v8076_v26, %s7862_s21 }
 0x304   :  { %v391_v29 = vpop.f32.mrb[8].mxu1  ;;  %7104 = vmatpush3.bf16.msra.mxu1 %v7103_v27 }
 0x305   :  { %v8082_v30 = vadd.f32 %v391_v29, %v291_v15  ;;  %v393_v31 = vpop.f32.mrb[9].mxu1  ;;  %6596 = vmatprep.subr.mxu1 %v7863_v32 }
 0x306   :  { %v8087_v34 = vadd.f32 %v393_v31, %v295_v17  ;;  %v395_v38 = vpop.f32.mrb[10].mxu1 }
 0x307   :  { %v397_v40 = vpop.f32.mrb[11].mxu1  ;;  %417 = vrot.lane.b32.xlu1 %v8082_v30, %s7862_s21  ;;  %v8095_v44 = vadd.f32 %v395_v38, %v291_v15 }
 0x308   :  { %v398_v41 = vadd.f32 %v397_v40, %v295_v17  ;;  %6597 = vmatpush3.msra.mxu1 %v8087_v34 }
 0x309   :  { %7108 = vmatprep.subr.bf16.mxu1 %v7861_v11 }
 0x30c   :  { %v401_v43 = vpop.f32.mrb[12].mxu1 }
 0x30d   :  { %v8097_v45 = vadd.f32 %v401_v43, %v291_v15  ;;  %v403_v46 = vpop.f32.mrb[13].mxu1 }
 0x30e   :  { %v404_v47 = vadd.f32 %v403_v46, %v295_v17  ;;  %v405_v49 = vpop.f32.mrb[14].mxu1 }
 0x30f   :  { %v407_v50 = vpop.f32.mrb[15].mxu1  ;;  %v8101_v52 = vpack.i.bf16 %v8097_v45, %v8095_v44  ;;  %v8109_v57 = vadd.f32 %v405_v49, %v291_v15 }
 0x310   :  { %v8103_v53 = vadd.f32 %v407_v50, %v295_v17  ;;  %v7106_v54 = vpack.c.bf16 %v404_v47, %v398_v41  ;;  %v8105_v56 = vpack.i.bf16 %v404_v47, %v398_v41 }
 0x311   :  { %7225 = vrot.lane.b32.xlu1 %v8101_v52, %s7862_s21 }
 0x315   :  { %519 = vrot.lane.b32.xlu1 %v8109_v57, %s7862_s21 }
 0x375   :  { %v7221_v58 = vpop.permute.xlu0 %7220 }
 0x376   :  { %v7223_v48 = vunpack.i.h.bf16 %v7221_v58  ;;  %v7222_v59 = vunpack.i.l.bf16 %v7221_v58 }
 0x378   :  { %v7095_v62 = vpack.c.bf16 %v7223_v48, %v7222_v59 }
 0x379   :  { %v418_v63 = vpop.permute.xlu1 %417 }
 0x37a   :  { %7097 = vmatpush3.bf16.xpose.msk.msra.mxu0 %vm8115_vm6, %v7095_v62 }
 0x37b   :  { %6566 = vmatprep.subr.mxu0 %v7863_v32 }
 0x382   :  { %6567 = vmatpush3.xpose.msk.msra.mxu0 %vm419_vm5, %v418_v63 }
 0x383   :  { %v7226_v0 = vpop.permute.xlu1 %7225  ;;  %7098 = vmatprep.subr.bf16.mxu0 %v7861_v11 }
 0x384   :  { %v7228_v55 = vunpack.i.h.bf16 %v7226_v0  ;;  %v7227_v2 = vunpack.i.l.bf16 %v7226_v0 }
 0x385   :  { %6569 = vmatmul.mubr.msk.f32.vlgmr.msra.gmra.mrb[0].mxu0 %vm419_vm5, %v8070_v21 }
 0x386   :  { %v7099_v3 = vpack.c.bf16 %v7228_v55, %v7227_v2  ;;  %6571 = vmatprep.mubr.msk.f32.mxu0 %vm7864_vm4, %v7863_v32 }
 0x387   :  { %v520_v4 = vpop.permute.xlu1 %519 }
 0x388   :  { %7101 = vmatpush3.bf16.xpose.msk.msra.mxu0 %vm8115_vm6, %v7099_v3 }
 0x389   :  { %6572 = vmatmul.mubr.msk.f32.gmra.mrb[2].mxu0 %vm419_vm5, %v8072_v22  ;;  %6581 = vmatprep.subr.mxu0 %v7863_v32 }
 0x38a   :  { %6574 = vmatprep.mubr.msk.f32.mxu0 %vm7864_vm4, %v7863_v32 }
 0x38d   :  { %6575 = vmatmul.mubr.msk.f32.gmra.mrb[4].mxu0 %vm419_vm5, %v8082_v30 }
 0x38e   :  { %6583 = vmatprep.mubr.msk.f32.mxu0 %vm7864_vm4, %v7863_v32 }
 0x390   :  { %6582 = vmatpush3.xpose.msk.msra.mxu0 %vm419_vm5, %v520_v4 }
 0x391   :  { %7105 = vmatprep.subr.bf16.mxu0 %v7861_v11 }
 0x393   :  { %6584 = vmatmul.mubr.msk.f32.vlgmr.msra.gmra.mrb[6].mxu0 %vm419_vm5, %v8095_v44 }
 0x394   :  { %7107 = vmatpush3.bf16.msra.mxu0 %v7106_v54  ;;  %6586 = vmatprep.mubr.msk.f32.mxu0 %vm7864_vm4, %v7863_v32 }
 0x395   :  { %6611 = vmatprep.subr.mxu0 %v7863_v32 }
 0x397   :  { %6587 = vmatmul.mubr.msk.f32.gmra.mrb[8].mxu0 %vm419_vm5, %v8097_v45 }
 0x398   :  { %6612 = vmatpush3.msra.mxu0 %v8103_v53  ;;  %6589 = vmatprep.mubr.msk.f32.mxu0 %vm7864_vm4, %v7863_v32 }
 0x399   :  { %7112 = vmatprep.subr.bf16.mxu0 %v7861_v11 }
 0x39b   :  { %6590 = vmatmul.mubr.msk.f32.gmra.mrb[10].mxu0 %vm419_vm5, %v8109_v57 }
 0x39c   :  { %6613 = vmatprep.mubr.msk.f32.mxu0 %vm7864_vm4, %v7863_v32 }
 0x458   :  { %v498_v51 = vpop.f32.mrb[0].mxu0 }
 0x459   :  { %v613_v60 = vmul.f32 0.25, %v498_v51  ;;  %v6570_v9 = vpop.f32.mrb[1].mxu0 }
 0x45b   :  { %v619_v10 = vadd.f32 %v613_v60, %v8157_v8 }
 0x45c   :  { %v503_v1 = vpop.f32.mrb[2].mxu0 }
 0x45d   :  { %v614_v13 = vmul.f32 0.25, %v503_v1  ;;  %v6573_v15 = vpop.f32.mrb[3].mxu0  ;;  %v626_v16 = vsel %vm625_vm8, %v619_v10, -inf }
 0x45e   :  { %627 = vmax.xlane.f32.xlu0 %v626_v16 }
 0x45f   :  { %v620_v17 = vadd.f32 %v614_v13, %v8157_v8 }
 0x460   :  { %v508_v18 = vpop.f32.mrb[4].mxu0 }
 0x461   :  { %v615_v5 = vmul.f32 0.25, %v508_v18  ;;  %v6576_v20 = vpop.f32.mrb[5].mxu0  ;;  %v629_v23 = vsel %vm625_vm8, %v620_v17, -inf }
 0x462   :  { %630 = vmax.xlane.f32.xlu1 %v629_v23 }
 0x463   :  { %v621_v24 = vadd.f32 %v615_v5, %v8157_v8 }
 0x465   :  { %v632_v25 = vsel %vm625_vm8, %v621_v24, -inf }
 0x466   :  { %633 = vmax.xlane.f32.xlu0 %v632_v25  ;;  %v599_v27 = vpop.f32.mrb[6].mxu0 }
 0x467   :  { %v616_v29 = vmul.f32 0.25, %v599_v27  ;;  %v6585_v31 = vpop.f32.mrb[7].mxu0 }
 0x469   :  { %v622_v38 = vadd.f32 %v616_v29, %v8157_v8 }
 0x46a   :  { %v604_v40 = vpop.f32.mrb[8].mxu0 }
 0x46b   :  { %v617_v41 = vmul.f32 0.25, %v604_v40  ;;  %v6588_v43 = vpop.f32.mrb[9].mxu0  ;;  %v635_v46 = vsel %vm625_vm8, %v622_v38, -inf }
 0x46c   :  { %636 = vmax.xlane.f32.xlu0 %v635_v46 }
 0x46d   :  { %v623_v47 = vadd.f32 %v617_v41, %v8157_v8 }
 0x46e   :  { %v609_v49 = vpop.f32.mrb[10].mxu0 }
 0x46f   :  { %v618_v50 = vmul.f32 0.25, %v609_v49  ;;  %v6591_v54 = vpop.f32.mrb[11].mxu0  ;;  %v638_v58 = vsel %vm625_vm8, %v623_v47, -inf }
 0x470   :  { %639 = vmax.xlane.f32.xlu0 %v638_v58 }
 0x471   :  { %v624_v48 = vadd.f32 %v618_v50, %v8157_v8 }
 0x473   :  { %v641_v59 = vsel %vm625_vm8, %v624_v48, -inf }
 0x474   :  { %642 = vmax.xlane.f32.xlu1 %v641_v59 }
 0x485   :  { %880 = vrot.lane.b32.xlu1 %v8082_v30, %s7866_s22 }
 0x489   :  { %7235 = vrot.lane.b32.xlu1 %v8101_v52, %s7866_s22 }
 0x48d   :  { %870 = vrot.lane.b32.xlu1 %v8070_v21, %s7867_s23 }
 0x4eb   :  { %v628_v62 = vpop.xlane.xlu0 %627 }
 0x4ec   :  { %v644_v63 = vsub.f32 %v619_v10, %v628_v62 }
 0x4ee   :  { %v650_v0 = vmul.f32 1.442695, %v644_v63 }
 0x4ef   :  { %v631_v55 = vpop.xlane.xlu1 %630 }
 0x4f0   :  { %7558 = vpow2.f32 %v650_v0  ;;  %v645_v2 = vsub.f32 %v620_v17, %v631_v55 }
 0x4f2   :  { %v652_v3 = vmul.f32 1.442695, %v645_v2 }
 0x4f3   :  { %v634_v4 = vpop.xlane.xlu0 %633 }
 0x4f4   :  { %7560 = vpow2.f32 %v652_v3  ;;  %v646_v16 = vsub.f32 %v621_v24, %v634_v4 }
 0x4f6   :  { %v654_v18 = vmul.f32 1.442695, %v646_v16 }
 0x4f9   :  { %v637_v6 = vpop.xlane.xlu0 %636 }
 0x4fa   :  { %v7559_v7 = vpop.eup %7558  ;;  %v647_v51 = vsub.f32 %v622_v38, %v637_v6 }
 0x4fb   :  { %v662_v60 = vsel %vm625_vm8, %v7559_v7, 0.0 }
 0x4fc   :  { %v656_v9 = vmul.f32 1.442695, %v647_v51  ;;  %663 = vadd.xlane.f32.xlu0 %v662_v60 }
 0x4fd   :  { %v640_v17 = vpop.xlane.xlu0 %639 }
 0x4fe   :  { %v7561_v1 = vpop.eup %7560  ;;  %7562 = vpow2.f32 %v656_v9  ;;  %v648_v5 = vsub.f32 %v623_v47, %v640_v17 }
 0x4ff   :  { %v665_v13 = vsel %vm625_vm8, %v7561_v1, 0.0  ;;  %7564 = vpow2.f32 %v654_v18 }
 0x500   :  { %666 = vadd.xlane.f32.xlu1 %v665_v13  ;;  %v658_v20 = vmul.f32 1.442695, %v648_v5 }
 0x501   :  { %v643_v23 = vpop.xlane.xlu1 %642 }
 0x502   :  { %7566 = vpow2.f32 %v658_v20  ;;  %v649_v25 = vsub.f32 %v624_v48, %v643_v23 }
 0x504   :  { %v660_v29 = vmul.f32 1.442695, %v649_v25 }
 0x505   :  { %v881_v43 = vpop.permute.xlu1 %880 }
 0x506   :  { %7568 = vpow2.f32 %v660_v29 }
 0x508   :  { %v7563_v10 = vpop.eup %7562 }
 0x509   :  { %v671_v15 = vsel %vm625_vm8, %v7563_v10, 0.0  ;;  %v7565_v27 = vpop.eup %7564  ;;  %v7236_v46 = vpop.permute.xlu1 %7235 }
 0x50a   :  { %672 = vadd.xlane.f32.xlu1 %v671_v15  ;;  %v668_v31 = vsel %vm625_vm8, %v7565_v27, 0.0  ;;  %v7238_v3 = vunpack.i.h.bf16 %v7236_v46  ;;  %v7237_v4 = vunpack.i.l.bf16 %v7236_v46 }
 0x50c   :  { %v8185_v38 = vpop.eup %7566  ;;  %v7113_v51 = vpack.c.bf16 %v7238_v3, %v7237_v4 }
 0x50d   :  { %v674_v24 = vsel %vm625_vm8, %v8185_v38, 0.0  ;;  %v871_v47 = vpop.permute.xlu1 %870 }
 0x510   :  { %v8189_v40 = vpop.eup %7568 }
 0x511   :  { %v677_v41 = vsel %vm625_vm8, %v8189_v40, 0.0 }
 0x512   :  { %7230 = vrot.lane.b32.xlu0 %v8076_v26, %s7866_s22 }
 0x51b   :  { %874 = vrot.lane.b32.xlu1 %v8082_v30, %s7867_s23 }
 0x531   :  { %669 = vadd.xlane.f32.xlu0 %v668_v31 }
 0x535   :  { %675 = vadd.xlane.f32.xlu0 %v674_v24 }
 0x53f   :  { %678 = vadd.xlane.f32.xlu1 %v677_v41 }
 0x54b   :  { %872 = vrot.lane.b32.xlu0 %v8072_v22, %s7867_s23 }
 0x54f   :  { %984 = vrot.lane.b32.xlu0 %v8109_v57, %s7866_s22 }
 0x550   :  { %974 = vrot.lane.b32.xlu1 %v8095_v44, %s7867_s23 }
 0x553   :  { %976 = vrot.lane.b32.xlu0 %v8097_v45, %s7867_s23 }
 0x554   :  { %978 = vrot.lane.b32.xlu1 %v8109_v57, %s7867_s23 }
 0x557   :  { %7240 = vrot.lane.b32.xlu0 %v8078_v28, %s7867_s23 }
 0x558   :  { %1163 = vrot.lane.b32.xlu1 %v8087_v34, %s7867_s23 }
 0x589   :  { %v664_v49 = vpop.xlane.xlu0 %663 }
 0x58a   :  { %7570 = vrcp.f32 %v664_v49 }
 0x58d   :  { %v667_v50 = vpop.xlane.xlu1 %666  ;;  %v7231_v54 = vpop.permute.xlu0 %7230 }
 0x58e   :  { %7572 = vrcp.f32 %v667_v50  ;;  %v7233_v58 = vunpack.i.h.bf16 %v7231_v54  ;;  %v7232_v48 = vunpack.i.l.bf16 %v7231_v54 }
 0x590   :  { %v7109_v63 = vpack.c.bf16 %v7233_v58, %v7232_v48 }
 0x594   :  { %v7571_v59 = vpop.eup %7570 }
 0x595   :  { %v686_v62 = vmul.f32 %v7571_v59, %v7559_v7 }
 0x597   :  { %6599 = vmatmul.mubr.msk.f32.vlgmr.msra.gmra.mrb[16].mxu1 %vm625_vm8, %v686_v62  ;;  %v673_v0 = vpop.xlane.xlu1 %672 }
 0x598   :  { %v7573_v55 = vpop.eup %7572  ;;  %7111 = vmatpush3.bf16.xpose.msk.msra.mxu1 %vm8115_vm6, %v7109_v63  ;;  %7574 = vrcp.f32 %v673_v0  ;;  %6601 = vmatprep.mubr.msk.f32.mxu1 %vm7864_vm4, %v7863_v32 }
 0x599   :  { %v687_v2 = vmul.f32 %v7573_v55, %v7561_v1  ;;  %6626 = vmatprep.subr.mxu1 %v7863_v32 }
 0x59b   :  { %6602 = vmatmul.mubr.msk.f32.gmra.mrb[18].mxu1 %vm625_vm8, %v687_v2  ;;  %v875_v13 = vpop.permute.xlu1 %874 }
 0x59c   :  { %6604 = vmatprep.mubr.msk.f32.mxu1 %vm7864_vm4, %v7863_v32 }
 0x5a0   :  { %6627 = vmatpush3.xpose.msk.msra.mxu1 %vm419_vm5, %v881_v43 }
 0x5a1   :  { %7116 = vmatprep.subr.bf16.mxu1 %v7861_v11 }
 0x5a2   :  { %v7575_v6 = vpop.eup %7574 }
 0x5a3   :  { %v689_v7 = vmul.f32 %v7575_v6, %v7563_v10 }
 0x5a5   :  { %6614 = vmatmul.mubr.msk.f32.vlgmr.msra.gmra.mrb[12].mxu0 %vm625_vm8, %v689_v7 }
 0x5a6   :  { %7115 = vmatpush3.bf16.xpose.msk.msra.mxu0 %vm8115_vm6, %v7113_v51  ;;  %6616 = vmatprep.mubr.msk.f32.mxu0 %vm7864_vm4, %v7863_v32 }
 0x5a7   :  { %6641 = vmatprep.subr.mxu0 %v7863_v32 }
 0x5be   :  { %v670_v60 = vpop.xlane.xlu0 %669 }
 0x5bf   :  { %7576 = vrcp.f32 %v670_v60 }
 0x5c2   :  { %v676_v9 = vpop.xlane.xlu0 %675 }
 0x5c3   :  { %7578 = vrcp.f32 %v676_v9 }
 0x5c6   :  { %v873_v1 = vpop.permute.xlu0 %872 }
 0x5c9   :  { %v7577_v15 = vpop.eup %7576 }
 0x5ca   :  { %v985_v16 = vpop.permute.xlu0 %984  ;;  %v688_v10 = vmul.f32 %v7577_v15, %v7565_v27 }
 0x5cb   :  { %6642 = vmatpush3.xpose.msk.msra.mxu0 %vm419_vm5, %v985_v16 }
 0x5cc   :  { %6605 = vmatmul.mubr.msk.f32.gmra.mrb[20].mxu1 %vm625_vm8, %v688_v10  ;;  %v679_v17 = vpop.xlane.xlu1 %678  ;;  %7119 = vmatprep.subr.bf16.mxu0 %v7861_v11 }
 0x5cd   :  { %v7579_v18 = vpop.eup %7578  ;;  %7580 = vrcp.f32 %v679_v17  ;;  %6628 = vmatprep.mubr.msk.f32.mxu1 %vm7864_vm4, %v7863_v32 }
 0x5ce   :  { %v977_v5 = vpop.permute.xlu0 %976  ;;  %v690_v20 = vmul.f32 %v7579_v18, %v8185_v38 }
 0x5d0   :  { %6617 = vmatmul.mubr.msk.f32.gmra.mrb[14].mxu0 %vm625_vm8, %v690_v20  ;;  %6629 = vmatmul.mubr.msk.f32.vlgmr.msra.gmra.mrb[22].mxu1 %vm419_vm5, %v871_v47  ;;  %v975_v23 = vpop.permute.xlu1 %974 }
 0x5d1   :  { %6631 = vmatprep.mubr.msk.f32.mxu1 %vm7864_vm4, %v7863_v32  ;;  %6619 = vmatprep.mubr.msk.f32.mxu0 %vm7864_vm4, %v7863_v32 }
 0x5d2   :  { %v7241_v25 = vpop.permute.xlu0 %7240 }
 0x5d3   :  { %v7243_v27 = vunpack.i.h.bf16 %v7241_v25  ;;  %v7242_v29 = vunpack.i.l.bf16 %v7241_v25 }
 0x5d4   :  { %6632 = vmatmul.mubr.msk.f32.gmra.mrb[24].mxu1 %vm419_vm5, %v873_v1  ;;  %v979_v31 = vpop.permute.xlu1 %978 }
 0x5d5   :  { %v7117_v24 = vpack.c.bf16 %v7243_v27, %v7242_v29  ;;  %6634 = vmatprep.mubr.msk.f32.mxu1 %vm7864_vm4, %v7863_v32 }
 0x5d7   :  { %v7581_v38 = vpop.eup %7580  ;;  %7118 = vmatpush3.bf16.msra.mxu1 %v7117_v24 }
 0x5d8   :  { %6635 = vmatmul.mubr.msk.f32.gmra.mrb[26].mxu1 %vm419_vm5, %v875_v13  ;;  %v691_v41 = vmul.f32 %v7581_v38, %v8189_v40  ;;  %6656 = vmatprep.subr.mxu1 %v7863_v32  ;;  %v1164_v43 = vpop.permute.xlu1 %1163 }
 0x5d9   :  { %6658 = vmatprep.mubr.msk.f32.mxu1 %vm7864_vm4, %v7863_v32 }
 0x5da   :  { %6620 = vmatmul.mubr.msk.f32.gmra.mrb[16].mxu0 %vm625_vm8, %v691_v41 }
 0x5db   :  { %6657 = vmatpush3.msra.mxu1 %v1164_v43  ;;  %6643 = vmatprep.mubr.msk.f32.mxu0 %vm7864_vm4, %v7863_v32 }
 0x5dc   :  { %7122 = vmatprep.subr.bf16.mxu1 %v7861_v11 }
 0x5de   :  { %6644 = vmatmul.mubr.msk.f32.vlgmr.msra.gmra.mrb[18].mxu0 %vm419_vm5, %v975_v23 }
 0x5df   :  { %6646 = vmatprep.mubr.msk.f32.mxu0 %vm7864_vm4, %v7863_v32 }
 0x5e2   :  { %6647 = vmatmul.mubr.msk.f32.gmra.mrb[20].mxu0 %vm419_vm5, %v977_v5 }
 0x5e3   :  { %6649 = vmatprep.mubr.msk.f32.mxu0 %vm7864_vm4, %v7863_v32 }
 0x5e6   :  { %6650 = vmatmul.mubr.msk.f32.gmra.mrb[22].mxu0 %vm419_vm5, %v979_v31 }
 0x5e7   :  { %6673 = vmatprep.mubr.msk.f32.mxu0 %vm7864_vm4, %v7863_v32 }
 0x66a   :  { %v8257_v40 = vpop.f32.mrb[16].mxu1 }
 0x66b   :  { %v6600_v46 = vpop.f32.mrb[17].mxu1 }
 0x66e   :  { %v8259_v47 = vpop.f32.mrb[18].mxu1 }
 0x66f   :  { %v6603_v49 = vpop.f32.mrb[19].mxu1 }
 0x678   :  { %v8261_v50 = vpop.f32.mrb[12].mxu0 }
 0x679   :  { %v6615_v54 = vpop.f32.mrb[13].mxu0 }
 0x69f   :  { %v8263_v58 = vpop.f32.mrb[20].mxu1 }
 0x6a0   :  { %v6606_v48 = vpop.f32.mrb[21].mxu1 }
 0x6a3   :  { %v8265_v59 = vpop.f32.mrb[14].mxu0  ;;  %v960_v62 = vpop.f32.mrb[22].mxu1 }
 0x6a4   :  { %v1078_v63 = vmul.f32 0.25, %v960_v62  ;;  %v6618_v0 = vpop.f32.mrb[15].mxu0  ;;  %v6630_v55 = vpop.f32.mrb[23].mxu1 }
 0x6a6   :  { %v1084_v2 = vadd.f32 %v1078_v63, %v8157_v8 }
 0x6a7   :  { %v965_v3 = vpop.f32.mrb[24].mxu1 }
 0x6a8   :  { %v1079_v4 = vmul.f32 0.25, %v965_v3  ;;  %v6633_v6 = vpop.f32.mrb[25].mxu1  ;;  %v1090_v7 = vsel %vm625_vm8, %v1084_v2, -inf }
 0x6a9   :  { %1091 = vmax.xlane.f32.xlu0 %v1090_v7 }
 0x6aa   :  { %v1085_v51 = vadd.f32 %v1079_v4, %v8157_v8 }
 0x6ab   :  { %v970_v60 = vpop.f32.mrb[26].mxu1 }
 0x6ac   :  { %v1080_v9 = vmul.f32 0.25, %v970_v60  ;;  %v6636_v1 = vpop.f32.mrb[27].mxu1  ;;  %v1093_v13 = vsel %vm625_vm8, %v1085_v51, -inf }
 0x6ad   :  { %1094 = vmax.xlane.f32.xlu1 %v1093_v13  ;;  %v8271_v15 = vpop.f32.mrb[16].mxu0 }
 0x6ae   :  { %v6621_v16 = vpop.f32.mrb[17].mxu0  ;;  %v1086_v10 = vadd.f32 %v1080_v9, %v8157_v8 }
 0x6b0   :  { %v1096_v17 = vsel %vm625_vm8, %v1086_v10, -inf }
 0x6b1   :  { %1097 = vmax.xlane.f32.xlu0 %v1096_v17  ;;  %v1064_v18 = vpop.f32.mrb[18].mxu0 }
 0x6b2   :  { %v1081_v5 = vmul.f32 0.25, %v1064_v18  ;;  %v6645_v20 = vpop.f32.mrb[19].mxu0 }
 0x6b4   :  { %v1087_v23 = vadd.f32 %v1081_v5, %v8157_v8 }
 0x6b5   :  { %v1069_v25 = vpop.f32.mrb[20].mxu0 }
 0x6b6   :  { %v1082_v27 = vmul.f32 0.25, %v1069_v25  ;;  %v6648_v29 = vpop.f32.mrb[21].mxu0  ;;  %v1099_v31 = vsel %vm625_vm8, %v1087_v23, -inf }
 0x6b7   :  { %1100 = vmax.xlane.f32.xlu0 %v1099_v31 }
 0x6b8   :  { %v1088_v24 = vadd.f32 %v1082_v27, %v8157_v8 }
 0x6b9   :  { %v1074_v38 = vpop.f32.mrb[22].mxu0 }
 0x6ba   :  { %v6651_v41 = vpop.f32.mrb[23].mxu0  ;;  %v1102_v43 = vsel %vm625_vm8, %v1088_v24, -inf  ;;  %v1083_v46 = vmul.f32 0.25, %v1074_v38 }
 0x6bb   :  { %1103 = vmax.xlane.f32.xlu0 %v1102_v43 }
 0x6bc   :  { %v1089_v49 = vadd.f32 %v1083_v46, %v8157_v8 }
 0x6be   :  { %7250 = vrot.lane.b32.xlu1 %v8105_v56, %s7867_s23  ;;  %v1105_v54 = vsel %vm625_vm8, %v1089_v49, -inf }
 0x6d1   :  { %7245 = vrot.lane.b32.xlu0 %v8076_v26, %s7868_s24 }
 0x6e2   :  { %1106 = vmax.xlane.f32.xlu1 %v1105_v54 }
 0x6f3   :  { %1368 = vrot.lane.b32.xlu1 %v8082_v30, %s7868_s24 }
 0x736   :  { %v1092_v48 = vpop.xlane.xlu0 %1091 }
 0x737   :  { %v1108_v62 = vsub.f32 %v1084_v2, %v1092_v48 }
 0x739   :  { %v1114_v63 = vmul.f32 1.442695, %v1108_v62 }
 0x73a   :  { %v1095_v0 = vpop.xlane.xlu1 %1094 }
 0x73b   :  { %7582 = vpow2.f32 %v1114_v63  ;;  %v1109_v55 = vsub.f32 %v1085_v51, %v1095_v0 }
 0x73d   :  { %v1116_v3 = vmul.f32 1.442695, %v1109_v55 }
 0x73e   :  { %v7251_v4 = vpop.permute.xlu1 %7250  ;;  %v1098_v51 = vpop.xlane.xlu0 %1097 }
 0x73f   :  { %7584 = vpow2.f32 %v1116_v3  ;;  %v7253_v6 = vunpack.i.h.bf16 %v7251_v4  ;;  %v7252_v7 = vunpack.i.l.bf16 %v7251_v4  ;;  %v1110_v16 = vsub.f32 %v1086_v10, %v1098_v51 }
 0x741   :  { %v7120_v60 = vpack.c.bf16 %v7253_v6, %v7252_v7  ;;  %v1118_v18 = vmul.f32 1.442695, %v1110_v16 }
 0x743   :  { %7121 = vmatpush3.bf16.msra.mxu0 %v7120_v60  ;;  %7586 = vpow2.f32 %v1118_v18 }
 0x744   :  { %6671 = vmatprep.subr.mxu0 %v7863_v32  ;;  %v1101_v17 = vpop.xlane.xlu0 %1100 }
 0x745   :  { %v7583_v9 = vpop.eup %7582  ;;  %v1111_v5 = vsub.f32 %v1087_v23, %v1101_v17 }
 0x746   :  { %v1126_v1 = vsel %vm625_vm8, %v7583_v9, 0.0 }
 0x747   :  { %1127 = vadd.xlane.f32.xlu0 %v1126_v1  ;;  %v1120_v25 = vmul.f32 1.442695, %v1111_v5 }
 0x748   :  { %v1104_v20 = vpop.xlane.xlu0 %1103 }
 0x749   :  { %v7585_v13 = vpop.eup %7584  ;;  %v1112_v27 = vsub.f32 %v1088_v24, %v1104_v20  ;;  %7588 = vpow2.f32 %v1120_v25 }
 0x74a   :  { %v1129_v2 = vsel %vm625_vm8, %v7585_v13, 0.0 }
 0x74b   :  { %1130 = vadd.xlane.f32.xlu1 %v1129_v2  ;;  %v1122_v31 = vmul.f32 1.442695, %v1112_v27 }
 0x74c   :  { %v7246_v62 = vpop.permute.xlu0 %7245 }
 0x74d   :  { %v7587_v41 = vpop.eup %7586  ;;  %7590 = vpow2.f32 %v1122_v31  ;;  %v7248_v4 = vunpack.i.h.bf16 %v7246_v62  ;;  %v7247_v6 = vunpack.i.l.bf16 %v7246_v62 }
 0x74e   :  { %v1132_v46 = vsel %vm625_vm8, %v7587_v41, 0.0 }
 0x74f   :  { %v7123_v1 = vpack.c.bf16 %v7248_v4, %v7247_v6 }
 0x753   :  { %v8297_v54 = vpop.eup %7588 }
 0x754   :  { %v1135_v10 = vsel %vm625_vm8, %v8297_v54, 0.0 }
 0x757   :  { %v8301_v23 = vpop.eup %7590 }
 0x758   :  { %v1138_v24 = vsel %vm625_vm8, %v8301_v23, 0.0 }
 0x75c   :  { %1358 = vrot.lane.b32.xlu1 %v8070_v21, %s7869_s25 }
 0x75d   :  { %1264 = vrot.lane.b32.xlu0 %v8103_v53, %s7867_s23 }
 0x760   :  { %1362 = vrot.lane.b32.xlu1 %v8082_v30, %s7869_s25 }
 0x76f   :  { %v1107_v29 = vpop.xlane.xlu1 %1106 }
 0x770   :  { %v1113_v38 = vsub.f32 %v1089_v49, %v1107_v29 }
 0x772   :  { %v1124_v43 = vmul.f32 1.442695, %v1113_v38 }
 0x773   :  { %v1369_v63 = vpop.permute.xlu1 %1368 }
 0x774   :  { %7592 = vpow2.f32 %v1124_v43 }
 0x77c   :  { %1133 = vadd.xlane.f32.xlu0 %v1132_v46 }
 0x77e   :  { %v8305_v48 = vpop.eup %7592 }
 0x77f   :  { %v1141_v49 = vsel %vm625_vm8, %v8305_v48, 0.0 }
 0x784   :  { %1136 = vadd.xlane.f32.xlu1 %v1135_v10 }
 0x788   :  { %1139 = vadd.xlane.f32.xlu1 %v1138_v24 }
 0x78c   :  { %1142 = vadd.xlane.f32.xlu1 %v1141_v49 }
 0x792   :  { %7255 = vrot.lane.b32.xlu0 %v8101_v52, %s7868_s24 }
 0x796   :  { %1360 = vrot.lane.b32.xlu0 %v8072_v22, %s7869_s25 }
 0x79a   :  { %1472 = vrot.lane.b32.xlu0 %v8109_v57, %s7868_s24 }
 0x79d   :  { %1462 = vrot.lane.b32.xlu1 %v8095_v44, %s7869_s25 }
 0x79e   :  { %1464 = vrot.lane.b32.xlu0 %v8097_v45, %s7869_s25 }
 0x7a1   :  { %1466 = vrot.lane.b32.xlu1 %v8109_v57, %s7869_s25 }
 0x7a2   :  { %7260 = vrot.lane.b32.xlu0 %v8078_v28, %s7869_s25 }
 0x7a5   :  { %1648 = vrot.lane.b32.xlu1 %v8087_v34, %s7869_s25 }
 0x7d4   :  { %v1128_v0 = vpop.xlane.xlu0 %1127 }
 0x7d5   :  { %7594 = vrcp.f32 %v1128_v0 }
 0x7d8   :  { %v1265_v55 = vpop.permute.xlu0 %1264  ;;  %v1131_v3 = vpop.xlane.xlu1 %1130 }
 0x7d9   :  { %7596 = vrcp.f32 %v1131_v3  ;;  %6672 = vmatpush3.msra.mxu0 %v1265_v55 }
 0x7da   :  { %7126 = vmatprep.subr.bf16.mxu0 %v7861_v11 }
 0x7df   :  { %v7595_v7 = vpop.eup %7594 }
 0x7e0   :  { %v1150_v60 = vmul.f32 %v7595_v7, %v7583_v9  ;;  %v1359_v9 = vpop.permute.xlu1 %1358 }
 0x7e2   :  { %6659 = vmatmul.mubr.msk.f32.vlgmr.msra.gmra.mrb[28].mxu1 %vm625_vm8, %v1150_v60 }
 0x7e3   :  { %v7597_v2 = vpop.eup %7596  ;;  %7125 = vmatpush3.bf16.xpose.msk.msra.mxu1 %vm8115_vm6, %v7123_v1  ;;  %6661 = vmatprep.mubr.msk.f32.mxu1 %vm7864_vm4, %v7863_v32 }
 0x7e4   :  { %v1151_v51 = vmul.f32 %v7597_v2, %v7585_v13  ;;  %6686 = vmatprep.subr.mxu1 %v7863_v32  ;;  %v1363_v17 = vpop.permute.xlu1 %1362 }
 0x7e6   :  { %6662 = vmatmul.mubr.msk.f32.gmra.mrb[30].mxu1 %vm625_vm8, %v1151_v51 }
 0x7e7   :  { %6664 = vmatprep.mubr.msk.f32.mxu1 %vm7864_vm4, %v7863_v32 }
 0x7eb   :  { %6687 = vmatpush3.xpose.msk.msra.mxu1 %vm419_vm5, %v1369_v63 }
 0x7ec   :  { %7130 = vmatprep.subr.bf16.mxu1 %v7861_v11 }
 0x809   :  { %v1134_v16 = vpop.xlane.xlu0 %1133 }
 0x80a   :  { %7598 = vrcp.f32 %v1134_v16 }
 0x80d   :  { %v7256_v18 = vpop.permute.xlu0 %7255 }
 0x80e   :  { %v7258_v43 = vunpack.i.h.bf16 %v7256_v18  ;;  %v7257_v46 = vunpack.i.l.bf16 %v7256_v18 }
 0x810   :  { %v7127_v62 = vpack.c.bf16 %v7258_v43, %v7257_v46 }
 0x811   :  { %v1361_v5 = vpop.permute.xlu0 %1360  ;;  %v1137_v20 = vpop.xlane.xlu1 %1136 }
 0x812   :  { %7600 = vrcp.f32 %v1137_v20 }
 0x814   :  { %v7599_v13 = vpop.eup %7598 }
 0x815   :  { %v1473_v25 = vpop.permute.xlu0 %1472  ;;  %v1140_v27 = vpop.xlane.xlu1 %1139  ;;  %v1152_v29 = vmul.f32 %v7599_v13, %v7587_v41 }
 0x816   :  { %7602 = vrcp.f32 %v1140_v27 }
 0x817   :  { %6665 = vmatmul.mubr.msk.f32.gmra.mrb[32].mxu1 %vm625_vm8, %v1152_v29 }
 0x818   :  { %6688 = vmatprep.mubr.msk.f32.mxu1 %vm7864_vm4, %v7863_v32 }
 0x819   :  { %v1465_v31 = vpop.permute.xlu0 %1464  ;;  %v1143_v38 = vpop.xlane.xlu1 %1142 }
 0x81a   :  { %7604 = vrcp.f32 %v1143_v38 }
 0x81b   :  { %6689 = vmatmul.mubr.msk.f32.vlgmr.msra.gmra.mrb[34].mxu1 %vm419_vm5, %v1359_v9 }
 0x81c   :  { %v7601_v10 = vpop.eup %7600  ;;  %6691 = vmatprep.mubr.msk.f32.mxu1 %vm7864_vm4, %v7863_v32 }
 0x81d   :  { %v1153_v24 = vmul.f32 %v7601_v10, %v8297_v54  ;;  %v7261_v41 = vpop.permute.xlu0 %7260  ;;  %v1463_v49 = vpop.permute.xlu1 %1462 }
 0x81e   :  { %v7263_v63 = vunpack.i.h.bf16 %v7261_v41  ;;  %v7262_v0 = vunpack.i.l.bf16 %v7261_v41 }
 0x81f   :  { %6674 = vmatmul.mubr.msk.f32.vlgmr.msra.gmra.mrb[24].mxu0 %vm625_vm8, %v1153_v24  ;;  %6692 = vmatmul.mubr.msk.f32.gmra.mrb[36].mxu1 %vm419_vm5, %v1361_v5 }
 0x820   :  { %v7603_v55 = vpop.eup %7602  ;;  %v7131_v3 = vpack.c.bf16 %v7263_v63, %v7262_v0  ;;  %7129 = vmatpush3.bf16.xpose.msk.msra.mxu0 %vm8115_vm6, %v7127_v62  ;;  %6676 = vmatprep.mubr.msk.f32.mxu0 %vm7864_vm4, %v7863_v32 }
 0x821   :  { %v1467_v4 = vpop.permute.xlu1 %1466  ;;  %6694 = vmatprep.mubr.msk.f32.mxu1 %vm7864_vm4, %v7863_v32  ;;  %v1154_v54 = vmul.f32 %v7603_v55, %v8301_v23  ;;  %6701 = vmatprep.subr.mxu0 %v7863_v32 }
 0x822   :  { %7132 = vmatpush3.bf16.msra.mxu1 %v7131_v3 }
 0x823   :  { %6677 = vmatmul.mubr.msk.f32.gmra.mrb[26].mxu0 %vm625_vm8, %v1154_v54  ;;  %6695 = vmatmul.mubr.msk.f32.gmra.mrb[38].mxu1 %vm419_vm5, %v1363_v17 }
 0x824   :  { %v7605_v6 = vpop.eup %7604  ;;  %6716 = vmatprep.subr.mxu1 %v7863_v32  ;;  %6679 = vmatprep.mubr.msk.f32.mxu0 %vm7864_vm4, %v7863_v32 }
 0x825   :  { %v1649_v7 = vpop.permute.xlu1 %1648  ;;  %v1155_v60 = vmul.f32 %v7605_v6, %v8305_v48  ;;  %6718 = vmatprep.mubr.msk.f32.mxu1 %vm7864_vm4, %v7863_v32 }
 0x826   :  { %6717 = vmatpush3.msra.mxu1 %v1649_v7 }
 0x827   :  { %6680 = vmatmul.mubr.msk.f32.gmra.mrb[28].mxu0 %vm625_vm8, %v1155_v60  ;;  %7136 = vmatprep.subr.bf16.mxu1 %v7861_v11 }
 0x828   :  { %6702 = vmatpush3.xpose.msk.msra.mxu0 %vm419_vm5, %v1473_v25  ;;  %6703 = vmatprep.mubr.msk.f32.mxu0 %vm7864_vm4, %v7863_v32 }
 0x829   :  { %7133 = vmatprep.subr.bf16.mxu0 %v7861_v11 }
 0x82b   :  { %6704 = vmatmul.mubr.msk.f32.vlgmr.msra.gmra.mrb[30].mxu0 %vm419_vm5, %v1463_v49 }
 0x82c   :  { %6706 = vmatprep.mubr.msk.f32.mxu0 %vm7864_vm4, %v7863_v32 }
 0x82f   :  { %6707 = vmatmul.mubr.msk.f32.gmra.mrb[32].mxu0 %vm419_vm5, %v1465_v31 }
 0x830   :  { %6709 = vmatprep.mubr.msk.f32.mxu0 %vm7864_vm4, %v7863_v32 }
 0x833   :  { %6710 = vmatmul.mubr.msk.f32.gmra.mrb[34].mxu0 %vm419_vm5, %v1467_v4 }
 0x834   :  { %6733 = vmatprep.mubr.msk.f32.mxu0 %vm7864_vm4, %v7863_v32 }
 0x8b5   :  { %v8377_v23 = vpop.f32.mrb[28].mxu1 }
 0x8b6   :  { %v6660_v48 = vpop.f32.mrb[29].mxu1 }
 0x8b9   :  { %v8379_v1 = vpop.f32.mrb[30].mxu1 }
 0x8ba   :  { %v7289_v2 = vpack.i.bf16 %v8379_v1, %v8377_v23  ;;  %v6663_v51 = vpop.f32.mrb[31].mxu1 }
 0x8ea   :  { %v8383_v9 = vpop.f32.mrb[32].mxu1 }
 0x8eb   :  { %v6666_v16 = vpop.f32.mrb[33].mxu1 }
 0x8ee   :  { %v1448_v17 = vpop.f32.mrb[34].mxu1 }
 0x8ef   :  { %v1566_v18 = vmul.f32 0.25, %v1448_v17  ;;  %v6690_v5 = vpop.f32.mrb[35].mxu1 }
 0x8f1   :  { %v1572_v20 = vadd.f32 %v1566_v18, %v8157_v8 }
 0x8f2   :  { %v8386_v13 = vpop.f32.mrb[24].mxu0  ;;  %v1453_v25 = vpop.f32.mrb[36].mxu1 }
 0x8f3   :  { %v7304_v27 = vpack.i.bf16 %v8386_v13, %v8383_v9  ;;  %v1567_v29 = vmul.f32 0.25, %v1453_v25  ;;  %v6675_v31 = vpop.f32.mrb[25].mxu0  ;;  %v6693_v38 = vpop.f32.mrb[37].mxu1  ;;  %v1578_v43 = vsel %vm625_vm8, %v1572_v20, -inf }
 0x8f4   :  { %1579 = vmax.xlane.f32.xlu0 %v1578_v43 }
 0x8f5   :  { %v1573_v46 = vadd.f32 %v1567_v29, %v8157_v8 }
 0x8f6   :  { %v8392_v10 = vpop.f32.mrb[26].mxu0  ;;  %v1458_v24 = vpop.f32.mrb[38].mxu1 }
 0x8f7   :  { %v1568_v41 = vmul.f32 0.25, %v1458_v24  ;;  %v6678_v49 = vpop.f32.mrb[27].mxu0  ;;  %v6696_v62 = vpop.f32.mrb[39].mxu1  ;;  %v1581_v63 = vsel %vm625_vm8, %v1573_v46, -inf }
 0x8f8   :  { %1582 = vmax.xlane.f32.xlu1 %v1581_v63 }
 0x8f9   :  { %v1574_v0 = vadd.f32 %v1568_v41, %v8157_v8 }
 0x8fa   :  { %v8396_v55 = vpop.f32.mrb[28].mxu0 }
 0x8fb   :  { %v7319_v3 = vpack.i.bf16 %v8396_v55, %v8392_v10  ;;  %v6681_v4 = vpop.f32.mrb[29].mxu0  ;;  %v1584_v54 = vsel %vm625_vm8, %v1574_v0, -inf }
 0x8fc   :  { %1585 = vmax.xlane.f32.xlu0 %v1584_v54 }
 0x8fe   :  { %v1552_v6 = vpop.f32.mrb[30].mxu0 }
 0x8ff   :  { %v1569_v7 = vmul.f32 0.25, %v1552_v6  ;;  %v6705_v60 = vpop.f32.mrb[31].mxu0 }
 0x901   :  { %v1575_v48 = vadd.f32 %v1569_v7, %v8157_v8 }
 0x902   :  { %v1557_v51 = vpop.f32.mrb[32].mxu0 }
 0x903   :  { %v1570_v16 = vmul.f32 0.25, %v1557_v51  ;;  %v6708_v17 = vpop.f32.mrb[33].mxu0  ;;  %v1587_v18 = vsel %vm625_vm8, %v1575_v48, -inf }
 0x904   :  { %1588 = vmax.xlane.f32.xlu0 %v1587_v18 }
 0x905   :  { %v1576_v5 = vadd.f32 %v1570_v16, %v8157_v8 }
 0x906   :  { %v1562_v25 = vpop.f32.mrb[34].mxu0 }
 0x907   :  { %v6711_v29 = vpop.f32.mrb[35].mxu0  ;;  %v1590_v31 = vsel %vm625_vm8, %v1576_v5, -inf  ;;  %v1571_v38 = vmul.f32 0.25, %v1562_v25 }
 0x908   :  { %1591 = vmax.xlane.f32.xlu0 %v1590_v31 }
 0x909   :  { %7270 = vrot.lane.b32.xlu1 %v8105_v56, %s7869_s25  ;;  %v1577_v43 = vadd.f32 %v1571_v38, %v8157_v8 }
 0x90b   :  { %v1593_v24 = vsel %vm625_vm8, %v1577_v43, -inf }
 0x91e   :  { %7265 = vrot.lane.b32.xlu0 %v8076_v26, %s7870_s26 }
 0x92d   :  { %1594 = vmax.xlane.f32.xlu1 %v1593_v24 }
 0x93e   :  { %1850 = vrot.lane.b32.xlu1 %v8082_v30, %s7870_s26 }
 0x981   :  { %v1580_v41 = vpop.xlane.xlu0 %1579 }
 0x982   :  { %v1596_v49 = vsub.f32 %v1572_v20, %v1580_v41 }
 0x984   :  { %v1602_v62 = vmul.f32 1.442695, %v1596_v49 }
 0x985   :  { %v1583_v63 = vpop.xlane.xlu1 %1582 }
 0x986   :  { %7606 = vpow2.f32 %v1602_v62  ;;  %v1597_v4 = vsub.f32 %v1573_v46, %v1583_v63 }
 0x988   :  { %v1604_v54 = vmul.f32 1.442695, %v1597_v4 }
 0x989   :  { %v7271_v6 = vpop.permute.xlu1 %7270  ;;  %v1586_v46 = vpop.xlane.xlu0 %1585 }
 0x98a   :  { %7608 = vpow2.f32 %v1604_v54  ;;  %v7273_v7 = vunpack.i.h.bf16 %v7271_v6  ;;  %v7272_v26 = vunpack.i.l.bf16 %v7271_v6  ;;  %v1598_v18 = vsub.f32 %v1574_v0, %v1586_v46 }
 0x98c   :  { %v7134_v60 = vpack.c.bf16 %v7273_v7, %v7272_v26  ;;  %v1606_v29 = vmul.f32 1.442695, %v1598_v18 }
 0x98e   :  { %7135 = vmatpush3.bf16.msra.mxu0 %v7134_v60  ;;  %7610 = vpow2.f32 %v1606_v29 }
 0x98f   :  { %6731 = vmatprep.subr.mxu0 %v7863_v32 }
 0x990   :  { %v7607_v51 = vpop.eup %7606 }
 0x991   :  { %v1614_v16 = vsel %vm625_vm8, %v7607_v51, 0.0  ;;  %v1589_v25 = vpop.xlane.xlu0 %1588 }
 0x992   :  { %1615 = vadd.xlane.f32.xlu0 %v1614_v16  ;;  %v1599_v31 = vsub.f32 %v1575_v48, %v1589_v25 }
 0x994   :  { %v7609_v17 = vpop.eup %7608  ;;  %v1608_v24 = vmul.f32 1.442695, %v1599_v31 }
 0x995   :  { %v1617_v20 = vsel %vm625_vm8, %v7609_v17, 0.0  ;;  %v1592_v38 = vpop.xlane.xlu0 %1591 }
 0x996   :  { %1618 = vadd.xlane.f32.xlu1 %v1617_v20  ;;  %v1600_v41 = vsub.f32 %v1576_v5, %v1592_v38  ;;  %7612 = vpow2.f32 %v1608_v24 }
 0x998   :  { %v1610_v62 = vmul.f32 1.442695, %v1600_v41 }
 0x999   :  { %v7266_v26 = vpop.permute.xlu0 %7265 }
 0x99a   :  { %7614 = vpow2.f32 %v1610_v62 }
 0x9a7   :  { %1840 = vrot.lane.b32.xlu1 %v8070_v21, %s7871_s27  ;;  %v7611_v21 = vpop.eup %7610 }
 0x9a8   :  { %1746 = vrot.lane.b32.xlu0 %v8103_v53, %s7869_s25  ;;  %v1620_v54 = vsel %vm625_vm8, %v7611_v21, 0.0  ;;  %v7613_v6 = vpop.eup %7612 }
 0x9a9   :  { %v1623_v0 = vsel %vm625_vm8, %v7613_v6, 0.0  ;;  %v8424_v7 = vpop.eup %7614 }
 0x9aa   :  { %v1626_v48 = vsel %vm625_vm8, %v8424_v7, 0.0 }
 0x9ab   :  { %1954 = vrot.lane.b32.xlu1 %v8109_v57, %s7870_s26 }
 0x9ba   :  { %v1595_v49 = vpop.xlane.xlu1 %1594 }
 0x9bb   :  { %v1601_v63 = vsub.f32 %v1577_v43, %v1595_v49 }
 0x9bd   :  { %v1612_v4 = vmul.f32 1.442695, %v1601_v63 }
 0x9be   :  { %v1851_v60 = vpop.permute.xlu1 %1850 }
 0x9bf   :  { %7616 = vpow2.f32 %v1612_v4 }
 0x9c7   :  { %1621 = vadd.xlane.f32.xlu0 %v1620_v54 }
 0x9c9   :  { %v8428_v5 = vpop.eup %7616 }
 0x9ca   :  { %v1629_v43 = vsel %vm625_vm8, %v8428_v5, 0.0 }
 0x9cf   :  { %1624 = vadd.xlane.f32.xlu1 %v1623_v0 }
 0x9d3   :  { %1627 = vadd.xlane.f32.xlu1 %v1626_v48 }
 0x9d7   :  { %1630 = vadd.xlane.f32.xlu1 %v1629_v43 }
 0x9dd   :  { %7275 = vrot.lane.b32.xlu0 %v8101_v52, %s7870_s26 }
 0x9e1   :  { %1842 = vrot.lane.b32.xlu0 %v8072_v22, %s7871_s27  ;;  %v7268_v22 = vunpack.i.h.bf16 %v7266_v26 }
 0x9e5   :  { %1844 = vrot.lane.b32.xlu0 %v8082_v30, %s7871_s27  ;;  %v7267_v30 = vunpack.i.l.bf16 %v7266_v26 }
 0x9e7   :  { %v7137_v18 = vpack.c.bf16 %v7268_v22, %v7267_v30 }
 0x9e8   :  { %1944 = vrot.lane.b32.xlu1 %v8095_v44, %s7871_s27 }
 0x9e9   :  { %1946 = vrot.lane.b32.xlu0 %v8097_v45, %s7871_s27 }
 0x9ec   :  { %1948 = vrot.lane.b32.xlu1 %v8109_v57, %s7871_s27 }
 0xa1f   :  { %v1616_v16 = vpop.xlane.xlu0 %1615 }
 0xa20   :  { %7618 = vrcp.f32 %v1616_v16 }
 0xa23   :  { %v1747_v52 = vpop.permute.xlu0 %1746  ;;  %v1619_v20 = vpop.xlane.xlu1 %1618 }
 0xa24   :  { %7620 = vrcp.f32 %v1619_v20  ;;  %6732 = vmatpush3.msra.mxu0 %v1747_v52 }
 0xa25   :  { %7140 = vmatprep.subr.bf16.mxu0 %v7861_v11 }
 0xa2a   :  { %v7619_v46 = vpop.eup %7618 }
 0xa2b   :  { %v1638_v44 = vmul.f32 %v7619_v46, %v7607_v51  ;;  %v1841_v51 = vpop.permute.xlu1 %1840 }
 0xa2d   :  { %6719 = vmatmul.mubr.msk.f32.vlgmr.msra.gmra.mrb[40].mxu1 %vm625_vm8, %v1638_v44 }
 0xa2e   :  { %v7621_v45 = vpop.eup %7620  ;;  %7139 = vmatpush3.bf16.xpose.msk.msra.mxu1 %vm8115_vm6, %v7137_v18  ;;  %6721 = vmatprep.mubr.msk.f32.mxu1 %vm7864_vm4, %v7863_v32 }
 0xa2f   :  { %v1639_v57 = vmul.f32 %v7621_v45, %v7609_v17  ;;  %6746 = vmatprep.subr.mxu1 %v7863_v32  ;;  %v1955_v29 = vpop.permute.xlu1 %1954 }
 0xa31   :  { %6722 = vmatmul.mubr.msk.f32.gmra.mrb[42].mxu1 %vm625_vm8, %v1639_v57 }
 0xa32   :  { %6724 = vmatprep.mubr.msk.f32.mxu1 %vm7864_vm4, %v7863_v32 }
 0xa36   :  { %6747 = vmatpush3.xpose.msk.msra.mxu1 %vm419_vm5, %v1851_v60 }
 0xa37   :  { %7144 = vmatprep.subr.bf16.mxu1 %v7861_v11 }
 0xa54   :  { %v1622_v25 = vpop.xlane.xlu0 %1621 }
 0xa55   :  { %7622 = vrcp.f32 %v1622_v25 }
 0xa58   :  { %v7276_v41 = vpop.permute.xlu0 %7275 }
 0xa59   :  { %v7278_v62 = vunpack.i.h.bf16 %v7276_v41  ;;  %v7277_v63 = vunpack.i.l.bf16 %v7276_v41 }
 0xa5c   :  { %v1625_v31 = vpop.xlane.xlu1 %1624  ;;  %v1843_v54 = vpop.permute.xlu0 %1842 }
 0xa5d   :  { %7624 = vrcp.f32 %v1625_v31 }
 0xa5f   :  { %v7623_v38 = vpop.eup %7622 }
 0xa60   :  { %v1628_v24 = vpop.xlane.xlu1 %1627  ;;  %v1640_v17 = vmul.f32 %v7623_v38, %v7611_v21  ;;  %v7141_v21 = vpack.c.bf16 %v7278_v62, %v7277_v63 }
 0xa61   :  { %7626 = vrcp.f32 %v1628_v24 }
 0xa62   :  { %6725 = vmatmul.mubr.msk.f32.gmra.mrb[44].mxu1 %vm625_vm8, %v1640_v17 }
 0xa63   :  { %6748 = vmatprep.mubr.msk.f32.mxu1 %vm7864_vm4, %v7863_v32 }
 0xa64   :  { %v1631_v49 = vpop.xlane.xlu1 %1630 }
 0xa65   :  { %7628 = vrcp.f32 %v1631_v49 }
 0xa66   :  { %6749 = vmatmul.mubr.msk.f32.vlgmr.msra.gmra.mrb[46].mxu1 %vm419_vm5, %v1841_v51 }
 0xa67   :  { %v7625_v4 = vpop.eup %7624  ;;  %6751 = vmatprep.mubr.msk.f32.mxu1 %vm7864_vm4, %v7863_v32 }
 0xa68   :  { %v1641_v0 = vmul.f32 %v7625_v4, %v7613_v6  ;;  %v1845_v6 = vpop.permute.xlu0 %1844 }
 0xa6a   :  { %6734 = vmatmul.mubr.msk.f32.vlgmr.msra.gmra.mrb[36].mxu0 %vm625_vm8, %v1641_v0  ;;  %6752 = vmatmul.mubr.msk.f32.gmra.mrb[48].mxu1 %vm419_vm5, %v1843_v54 }
 0xa6b   :  { %v7627_v48 = vpop.eup %7626  ;;  %7143 = vmatpush3.bf16.xpose.msk.msra.mxu0 %vm8115_vm6, %v7141_v21  ;;  %6736 = vmatprep.mubr.msk.f32.mxu0 %vm7864_vm4, %v7863_v32 }
 0xa6c   :  { %6754 = vmatprep.mubr.msk.f32.mxu1 %vm7864_vm4, %v7863_v32  ;;  %v1642_v43 = vmul.f32 %v7627_v48, %v8424_v7  ;;  %6761 = vmatprep.subr.mxu0 %v7863_v32  ;;  %v1945_v7 = vpop.permute.xlu1 %1944  ;;  %v1947_v16 = vpop.permute.xlu0 %1946 }
 0xa6e   :  { %6737 = vmatmul.mubr.msk.f32.gmra.mrb[38].mxu0 %vm625_vm8, %v1642_v43  ;;  %6755 = vmatmul.mubr.msk.f32.gmra.mrb[50].mxu1 %vm419_vm5, %v1845_v6 }
 0xa6f   :  { %v7629_v26 = vpop.eup %7628  ;;  %6739 = vmatprep.mubr.msk.f32.mxu0 %vm7864_vm4, %v7863_v32  ;;  %6778 = vmatprep.mubr.msk.f32.mxu1 %vm7864_vm4, %v7863_v32 }
 0xa70   :  { %v1643_v60 = vmul.f32 %v7629_v26, %v8428_v5  ;;  %v1949_v5 = vpop.permute.xlu1 %1948 }
 0xa72   :  { %6740 = vmatmul.mubr.msk.f32.gmra.mrb[40].mxu0 %vm625_vm8, %v1643_v60 }
 0xa73   :  { %6762 = vmatpush3.xpose.msk.msra.mxu0 %vm419_vm5, %v1955_v29  ;;  %6763 = vmatprep.mubr.msk.f32.mxu0 %vm7864_vm4, %v7863_v32 }
 0xa74   :  { %7147 = vmatprep.subr.bf16.mxu0 %v7861_v11 }
 0xa76   :  { %6764 = vmatmul.mubr.msk.f32.vlgmr.msra.gmra.mrb[42].mxu0 %vm419_vm5, %v1945_v7 }
 0xa77   :  { %6766 = vmatprep.mubr.msk.f32.mxu0 %vm7864_vm4, %v7863_v32 }
 0xa7a   :  { %6767 = vmatmul.mubr.msk.f32.gmra.mrb[44].mxu0 %vm419_vm5, %v1947_v16 }
 0xa7b   :  { %6769 = vmatprep.mubr.msk.f32.mxu0 %vm7864_vm4, %v7863_v32 }
 0xa7e   :  { %6770 = vmatmul.mubr.msk.f32.gmra.mrb[46].mxu0 %vm419_vm5, %v1949_v5 }
 0xa7f   :  { %6793 = vmatprep.mubr.msk.f32.mxu0 %vm7864_vm4, %v7863_v32 }
 0xb00   :  { %v8493_v52 = vpop.f32.mrb[40].mxu1 }
 0xb01   :  { %v6720_v20 = vpop.f32.mrb[41].mxu1 }
 0xb04   :  { %v8495_v22 = vpop.f32.mrb[42].mxu1 }
 0xb05   :  { %v7294_v30 = vpack.i.bf16 %v8495_v22, %v8493_v52  ;;  %v6723_v46 = vpop.f32.mrb[43].mxu1 }
 0xb35   :  { %v8499_v44 = vpop.f32.mrb[44].mxu1 }
 0xb36   :  { %v6726_v18 = vpop.f32.mrb[45].mxu1 }
 0xb39   :  { %v1930_v45 = vpop.f32.mrb[46].mxu1 }
 0xb3a   :  { %v2048_v57 = vmul.f32 0.25, %v1930_v45  ;;  %v6750_v51 = vpop.f32.mrb[47].mxu1 }
 0xb3c   :  { %v2054_v25 = vadd.f32 %v2048_v57, %v8157_v8 }
 0xb3d   :  { %v8502_v29 = vpop.f32.mrb[36].mxu0  ;;  %v1935_v31 = vpop.f32.mrb[48].mxu1 }
 0xb3e   :  { %v7309_v38 = vpack.i.bf16 %v8502_v29, %v8499_v44  ;;  %v2049_v24 = vmul.f32 0.25, %v1935_v31  ;;  %v6735_v17 = vpop.f32.mrb[37].mxu0  ;;  %v6753_v41 = vpop.f32.mrb[49].mxu1  ;;  %v2060_v49 = vsel %vm625_vm8, %v2054_v25, -inf }
 0xb3f   :  { %2061 = vmax.xlane.f32.xlu0 %v2060_v49 }
 0xb40   :  { %v2055_v62 = vadd.f32 %v2049_v24, %v8157_v8 }
 0xb41   :  { %v8508_v63 = vpop.f32.mrb[38].mxu0  ;;  %v1940_v4 = vpop.f32.mrb[50].mxu1 }
 0xb42   :  { %v2050_v54 = vmul.f32 0.25, %v1940_v4  ;;  %v6738_v0 = vpop.f32.mrb[39].mxu0  ;;  %v6756_v21 = vpop.f32.mrb[51].mxu1  ;;  %v2063_v48 = vsel %vm625_vm8, %v2055_v62, -inf }
 0xb43   :  { %2064 = vmax.xlane.f32.xlu1 %v2063_v48 }
 0xb44   :  { %v2056_v43 = vadd.f32 %v2050_v54, %v8157_v8 }
 0xb45   :  { %v8512_v6 = vpop.f32.mrb[40].mxu0 }
 0xb46   :  { %v7324_v26 = vpack.i.bf16 %v8512_v6, %v8508_v63  ;;  %v6741_v60 = vpop.f32.mrb[41].mxu0  ;;  %v2066_v7 = vsel %vm625_vm8, %v2056_v43, -inf }
 0xb47   :  { %2067 = vmax.xlane.f32.xlu0 %v2066_v7 }
 0xb49   :  { %v2034_v16 = vpop.f32.mrb[42].mxu0 }
 0xb4a   :  { %v2051_v5 = vmul.f32 0.25, %v2034_v16  ;;  %v6765_v20 = vpop.f32.mrb[43].mxu0 }
 0xb4c   :  { %v2057_v46 = vadd.f32 %v2051_v5, %v8157_v8 }
 0xb4d   :  { %v2039_v18 = vpop.f32.mrb[44].mxu0 }
 0xb4e   :  { %v2052_v45 = vmul.f32 0.25, %v2039_v18  ;;  %v6768_v57 = vpop.f32.mrb[45].mxu0  ;;  %v2069_v51 = vsel %vm625_vm8, %v2057_v46, -inf }
 0xb4f   :  { %2070 = vmax.xlane.f32.xlu0 %v2069_v51 }
 0xb50   :  { %v2058_v31 = vadd.f32 %v2052_v45, %v8157_v8 }
 0xb51   :  { %v2044_v24 = vpop.f32.mrb[46].mxu0 }
 0xb52   :  { %v2053_v17 = vmul.f32 0.25, %v2044_v24  ;;  %v6771_v41 = vpop.f32.mrb[47].mxu0  ;;  %v2072_v49 = vsel %vm625_vm8, %v2058_v31, -inf }
 0xb53   :  { %2073 = vmax.xlane.f32.xlu0 %v2072_v49 }
 0xb54   :  { %v2059_v4 = vadd.f32 %v2053_v17, %v8157_v8 }
 0xb56   :  { %v2075_v54 = vsel %vm625_vm8, %v2059_v4, -inf }
 0xb57   :  { %2076 = vmax.xlane.f32.xlu1 %v2075_v54 }
 0xbcc   :  { %v2062_v0 = vpop.xlane.xlu0 %2061 }
 0xbcd   :  { %v2078_v21 = vsub.f32 %v2054_v25, %v2062_v0 }
 0xbcf   :  { %v2084_v48 = vmul.f32 1.442695, %v2078_v21 }
 0xbd0   :  { %v2065_v60 = vpop.xlane.xlu1 %2064 }
 0xbd1   :  { %7630 = vpow2.f32 %v2084_v48  ;;  %v2079_v7 = vsub.f32 %v2055_v62, %v2065_v60 }
 0xbd3   :  { %v2086_v16 = vmul.f32 1.442695, %v2079_v7 }
 0xbd4   :  { %v2068_v5 = vpop.xlane.xlu0 %2067 }
 0xbd5   :  { %7632 = vpow2.f32 %v2086_v16  ;;  %v2080_v20 = vsub.f32 %v2056_v43, %v2068_v5 }
 0xbd7   :  { %v2088_v18 = vmul.f32 1.442695, %v2080_v20 }
 0xbd9   :  { %7634 = vpow2.f32 %v2088_v18 }
 0xbdb   :  { %v7631_v45 = vpop.eup %7630 }
 0xbdc   :  { %v2071_v57 = vpop.xlane.xlu0 %2070  ;;  %v2096_v51 = vsel %vm625_vm8, %v7631_v45, 0.0 }
 0xbdd   :  { %v2081_v24 = vsub.f32 %v2057_v46, %v2071_v57  ;;  %2097 = vadd.xlane.f32.xlu0 %v2096_v51 }
 0xbdf   :  { %v7633_v17 = vpop.eup %7632  ;;  %v2090_v41 = vmul.f32 1.442695, %v2081_v24 }
 0xbe0   :  { %v2074_v49 = vpop.xlane.xlu0 %2073  ;;  %v2099_v25 = vsel %vm625_vm8, %v7633_v17, 0.0 }
 0xbe1   :  { %7636 = vpow2.f32 %v2090_v41  ;;  %v2082_v54 = vsub.f32 %v2058_v31, %v2074_v49  ;;  %2100 = vadd.xlane.f32.xlu1 %v2099_v25 }
 0xbe3   :  { %v7635_v62 = vpop.eup %7634  ;;  %v2092_v0 = vmul.f32 1.442695, %v2082_v54 }
 0xbe4   :  { %v2102_v43 = vsel %vm625_vm8, %v7635_v62, 0.0  ;;  %v2077_v31 = vpop.xlane.xlu1 %2076 }
 0xbe5   :  { %7638 = vpow2.f32 %v2092_v0  ;;  %2103 = vadd.xlane.f32.xlu0 %v2102_v43  ;;  %v2083_v7 = vsub.f32 %v2059_v4, %v2077_v31  ;;  %v7469_v31 = vld [vmem:[%s9679_s4 + $0x18] sm:$0xff]  }
 0xbe7   :  { %v2094_v16 = vmul.f32 1.442695, %v2083_v7 }
 0xbe9   :  { %7640 = vpow2.f32 %v2094_v16 }
 0xbeb   :  { %v7637_v21 = vpop.eup %7636 }
 0xbec   :  { %v2105_v48 = vsel %vm625_vm8, %v7637_v21, 0.0 }
 0xbed   :  { %2106 = vadd.xlane.f32.xlu1 %v2105_v48 }
 0xbef   :  { %v8527_v46 = vpop.eup %7638 }
 0xbf0   :  { %v2108_v60 = vsel %vm625_vm8, %v8527_v46, 0.0 }
 0xbf1   :  { %2109 = vadd.xlane.f32.xlu0 %v2108_v60  ;;  %v7468_v60 = vld [vmem:[%s9679_s4 + $0x10] sm:$0xff]  }
 0xbf3   :  { %v7641_v5 = vpop.eup %7640 }
 0xbf4   :  { %v2111_v20 = vsel %vm625_vm8, %v7641_v5, 0.0 }
 0xbfe   :  { %2130 = vrot.lane.b32.xlu1 %v8087_v34, %s7871_s27 }
 0xc02   :  { %7285 = vrot.lane.b32.xlu1 %v8105_v56, %s7871_s27 }
 0xc07   :  { %7280 = vrot.lane.b32.xlu0 %v8078_v28, %s7871_s27 }
 0xc0b   :  { %7290 = vrot.lane.b32.xlu0 %v7289_v2, %s7870_s26 }
 0xc26   :  { %2112 = vadd.xlane.f32.xlu1 %v2111_v20 }
 0xc37   :  { %2228 = vrot.lane.b32.xlu1 %v8103_v53, %s7871_s27 }
 0xc3b   :  { %7295 = vrot.lane.b32.xlu1 %v7294_v30, %s7868_s24 }
 0xc3f   :  { %7305 = vrot.lane.b32.xlu1 %v7304_v27, %s7870_s26 }
 0xc6a   :  { %v2098_v28 = vpop.xlane.xlu0 %2097 }
 0xc6b   :  { %7642 = vrcp.f32 %v2098_v28 }
 0xc6e   :  { %v2101_v34 = vpop.xlane.xlu1 %2100 }
 0xc6f   :  { %7644 = vrcp.f32 %v2101_v34 }
 0xc72   :  { %v2104_v56 = vpop.xlane.xlu0 %2103 }
 0xc73   :  { %7646 = vrcp.f32 %v2104_v56 }
 0xc75   :  { %v7643_v24 = vpop.eup %7642 }
 0xc76   :  { %v2120_v9 = vmul.f32 %v7643_v24, %v7631_v45 }
 0xc79   :  { %v7645_v13 = vpop.eup %7644 }
 0xc7a   :  { %v2107_v23 = vpop.xlane.xlu1 %2106  ;;  %v2121_v27 = vmul.f32 %v7645_v13, %v7633_v17 }
 0xc7b   :  { %7648 = vrcp.f32 %v2107_v23 }
 0xc7d   :  { %v7647_v41 = vpop.eup %7646 }
 0xc7e   :  { %v2110_v1 = vpop.xlane.xlu0 %2109  ;;  %v2131_v2 = vpop.permute.xlu1 %2130  ;;  %v2122_v49 = vmul.f32 %v7647_v41, %v7635_v62 }
 0xc7f   :  { %7650 = vrcp.f32 %v2110_v1 }
 0xc82   :  { %v7281_v4 = vpop.permute.xlu0 %7280  ;;  %v7286_v53 = vpop.permute.xlu1 %7285 }
 0xc83   :  { %v7283_v18 = vunpack.i.h.bf16 %v7281_v4  ;;  %v7282_v57 = vunpack.i.l.bf16 %v7281_v4  ;;  %v7288_v51 = vunpack.i.h.bf16 %v7286_v53  ;;  %v7287_v52 = vunpack.i.l.bf16 %v7286_v53 }
 0xc85   :  { %v7145_v22 = vpack.c.bf16 %v7283_v18, %v7282_v57  ;;  %v7148_v30 = vpack.c.bf16 %v7288_v51, %v7287_v52  ;;  %v7649_v25 = vpop.eup %7648 }
 0xc86   :  { %v2123_v54 = vmul.f32 %v7649_v25, %v7637_v21  ;;  %v7466_v21 = vld [vmem:[%s9679_s4] sm:$0xff]  }
 0xc87   :  { %7146 = vmatpush3.bf16.msra.mxu1 %v7145_v22  ;;  %7149 = vmatpush3.bf16.msra.mxu0 %v7148_v30 }
 0xc88   :  { %6776 = vmatprep.subr.mxu1 %v7863_v32  ;;  %6791 = vmatprep.subr.mxu0 %v7863_v32 }
 0xc89   :  { %v7651_v17 = vpop.eup %7650 }
 0xc8a   :  { %v2124_v62 = vmul.f32 %v7651_v17, %v8527_v46  ;;  %v7467_v46 = vld [vmem:[%s9679_s4 + $0x8] sm:$0xff]  }
 0xc8b   :  { %6777 = vmatpush3.msra.mxu1 %v2131_v2 }
 0xc8c   :  { %6779 = vmatmul.mubr.msk.f32.vlgmr.msra.gmra.mrb[52].mxu1 %vm625_vm8, %v2120_v9  ;;  %6802 = vmatprep.subr.bf16.mxu1 %v7863_v32 }
 0xc8d   :  { %6781 = vmatprep.mubr.msk.f32.mxu1 %vm7864_vm4, %v7863_v32  ;;  %6803 = vmatpush3.bf16.msra.mxu1 %v7466_v21 }
 0xc8e   :  { %6804 = vmatprep.subr.bf16.mxu1 %v7863_v32 }
 0xc90   :  { %6782 = vmatmul.mubr.msk.f32.gmra.mrb[54].mxu1 %vm625_vm8, %v2121_v27 }
 0xc91   :  { %6784 = vmatprep.mubr.msk.f32.mxu1 %vm7864_vm4, %v7863_v32  ;;  %6805 = vmatpush3.bf16.msra.mxu1 %v7467_v46 }
 0xc92   :  { %6806 = vmatprep.subr.bf16.mxu1 %v7863_v32 }
 0xc94   :  { %6785 = vmatmul.mubr.msk.f32.gmra.mrb[56].mxu1 %vm625_vm8, %v2122_v49 }
 0xc95   :  { %6810 = vmatprep.mubr.msk.bf16.mxu1 %vm7864_vm4, %v7863_v32  ;;  %6807 = vmatpush3.bf16.msra.mxu1 %v7468_v60 }
 0xc96   :  { %6808 = vmatprep.subr.bf16.mxu1 %v7863_v32 }
 0xc99   :  { %6809 = vmatpush3.bf16.msra.mxu1 %v7469_v31 }
 0xcb3   :  { %v2113_v45 = vpop.xlane.xlu1 %2112 }
 0xcb4   :  { %7652 = vrcp.f32 %v2113_v45 }
 0xcb7   :  { %v2229_v0 = vpop.permute.xlu1 %2228 }
 0xcb8   :  { %6792 = vmatpush3.msra.mxu0 %v2229_v0 }
 0xcb9   :  { %6794 = vmatmul.mubr.msk.f32.vlgmr.msra.gmra.mrb[48].mxu0 %vm625_vm8, %v2123_v54 }
 0xcba   :  { %6796 = vmatprep.mubr.msk.f32.mxu0 %vm7864_vm4, %v7863_v32 }
 0xcbb   :  { %v7296_v10 = vpop.permute.xlu1 %7295 }
 0xcbc   :  { %v7298_v57 = vunpack.i.h.bf16 %v7296_v10  ;;  %v7297_v51 = vunpack.i.l.bf16 %v7296_v10 }
 0xcbd   :  { %6797 = vmatmul.mubr.msk.f32.gmra.mrb[50].mxu0 %vm625_vm8, %v2124_v62 }
 0xcbe   :  { %v7653_v43 = vpop.eup %7652  ;;  %6799 = vmatprep.mubr.msk.f32.mxu0 %vm7864_vm4, %v7863_v32 }
 0xcbf   :  { %v2125_v48 = vmul.f32 %v7653_v43, %v7641_v5 }
 0xcc1   :  { %6800 = vmatmul.mubr.msk.f32.gmra.mrb[52].mxu0 %vm625_vm8, %v2125_v48 }
 0xcc2   :  { %2713 = vmatprep.mubr.bf16.mxu0 %v7860_v19 }
 0xd5f   :  { %v2210_v7 = vpop.f32.mrb[52].mxu1 }
 0xd60   :  { %v6780_v16 = vpop.f32.mrb[53].mxu1 }
 0xd63   :  { %v2215_v5 = vpop.f32.mrb[54].mxu1 }
 0xd64   :  { %v7299_v20 = vpack.i.bf16 %v2215_v5, %v2210_v7  ;;  %v6783_v28 = vpop.f32.mrb[55].mxu1 }
 0xd66   :  { %7300 = vrot.lane.b32.xlu0 %v7299_v20, %s7866_s22 }
 0xd67   :  { %v2220_v34 = vpop.f32.mrb[56].mxu1 }
 0xd68   :  { %v6786_v56 = vpop.f32.mrb[57].mxu1 }
 0xd6a   :  { %7310 = vrot.lane.b32.xlu0 %v7309_v38, %s7868_s24  ;;  %v7291_v38 = vpop.permute.xlu0 %7290 }
 0xd6b   :  { %v7293_v55 = vunpack.i.h.bf16 %v7291_v38 }
 0xd6d   :  { %v2395_v22 = vsel %vm419_vm5, %v8259_v47, %v7293_v55  ;;  %v7306_v47 = vpop.permute.xlu1 %7305 }
 0xd6e   :  { %7320 = vrot.lane.b32.xlu0 %v7319_v3, %s7870_s26  ;;  %v7292_v3 = vunpack.i.l.bf16 %v7291_v38  ;;  %v2402_v30 = vsel %vm2400_vm9, %v2395_v22, %v7298_v57  ;;  %v7308_v49 = vunpack.i.h.bf16 %v7306_v47 }
 0xd70   :  { %v2394_v63 = vsel %vm419_vm5, %v8257_v40, %v7292_v3  ;;  %v7307_v40 = vunpack.i.l.bf16 %v7306_v47  ;;  %v2397_v0 = vsel %vm419_vm5, %v8261_v50, %v7308_v49 }
 0xd71   :  { %v2401_v24 = vsel %vm2400_vm9, %v2394_v63, %v7297_v51 }
 0xd72   :  { %v2396_v17 = vsel %vm419_vm5, %v8263_v58, %v7307_v40 }
 0xd8c   :  { %v2308_v23 = vpop.f32.mrb[48].mxu0 }
 0xd8d   :  { %v7314_v1 = vpack.i.bf16 %v2308_v23, %v2220_v34  ;;  %v6795_v2 = vpop.f32.mrb[49].mxu0 }
 0xd8f   :  { %7315 = vrot.lane.b32.xlu1 %v7314_v1, %s7866_s22 }
 0xd90   :  { %v2313_v4 = vpop.f32.mrb[50].mxu0 }
 0xd91   :  { %v6798_v53 = vpop.f32.mrb[51].mxu0 }
 0xd93   :  { %7325 = vrot.lane.b32.xlu1 %v7324_v26, %s7868_s24 }
 0xd94   :  { %v2318_v18 = vpop.f32.mrb[52].mxu0 }
 0xd95   :  { %v7329_v44 = vpack.i.bf16 %v2318_v18, %v2313_v4  ;;  %v6801_v29 = vpop.f32.mrb[53].mxu0 }
 0xd97   :  { %7330 = vrot.lane.b32.xlu0 %v7329_v44, %s7866_s22 }
 0xdd8   :  { %v7301_v52 = vpop.permute.xlu0 %7300 }
 0xdd9   :  { %v7303_v6 = vunpack.i.h.bf16 %v7301_v52  ;;  %v7302_v26 = vunpack.i.l.bf16 %v7301_v52 }
 0xddb   :  { %v2407_v9 = vsel %vm74_vm0, %v2401_v24, %v7302_v26  ;;  %v2408_v13 = vsel %vm74_vm0, %v2402_v30, %v7303_v6 }
 0xddc   :  { %v2413_v27 = vpack.c.bf16 %v2408_v13, %v2407_v9  ;;  %v7311_v41 = vpop.permute.xlu0 %7310 }
 0xddd   :  { %v7313_v45 = vunpack.i.h.bf16 %v7311_v41  ;;  %v7312_v25 = vunpack.i.l.bf16 %v7311_v41 }
 0xdde   :  { %6811 = vmatmul.mubr.msk.bf16.vlgmr.msra.gmra.mrb[60].mxu1 %vm184_vm3, %v2413_v27 }
 0xddf   :  { %6814 = vmatprep.mubr.msk.bf16.mxu1 %vm7864_vm4, %v7863_v32  ;;  %v2403_v48 = vsel %vm2400_vm9, %v2396_v17, %v7312_v25  ;;  %v2404_v21 = vsel %vm2400_vm9, %v2397_v0, %v7313_v45 }
 0xde0   :  { %v7321_v46 = vpop.permute.xlu0 %7320 }
 0xde1   :  { %v7323_v5 = vunpack.i.h.bf16 %v7321_v46  ;;  %v7322_v20 = vunpack.i.l.bf16 %v7321_v46 }
 0xde3   :  { %v2399_v34 = vsel %vm419_vm5, %v8271_v15, %v7323_v5  ;;  %v2398_v56 = vsel %vm419_vm5, %v8265_v59, %v7322_v20  ;;  %v178_v15 = vld [vmem:[%s9676_s1 + $0x26] ss:$0 sm:$0xff]  ;;  %v7475_v5 = vld [vmem:[%s9680_s5 + $0x14] ss:$8 sps:$4 sm:$0xff]   ;;  %v7473_v20 = vld [vmem:[%s9680_s5 + $0x10] ss:$8 sps:$4 sm:$0xff]  }
 0xe01   :  { %v7316_v54 = vpop.permute.xlu1 %7315 }
 0xe02   :  { %v7318_v62 = vunpack.i.h.bf16 %v7316_v54  ;;  %v7317_v43 = vunpack.i.l.bf16 %v7316_v54 }
 0xe04   :  { %v2410_v60 = vsel %vm74_vm0, %v2404_v21, %v7318_v62  ;;  %v2409_v31 = vsel %vm74_vm0, %v2403_v48, %v7317_v43 }
 0xe05   :  { %v7326_v7 = vpop.permute.xlu1 %7325  ;;  %v2414_v16 = vpack.c.bf16 %v2410_v60, %v2409_v31 }
 0xe06   :  { %v7328_v28 = vunpack.i.h.bf16 %v7326_v7  ;;  %v7327_v50 = vunpack.i.l.bf16 %v7326_v7  ;;  %v7472_v7 = vld [vmem:[%s9680_s5 + $0x4] ss:$8 sps:$4 sm:$0xff]  }
 0xe07   :  { %6815 = vmatmul.mubr.msk.bf16.gmra.mrb[64].mxu1 %vm184_vm3, %v2414_v16  ;;  %v7470_v16 = vld [vmem:[%s9680_s5] ss:$8 sps:$4 sm:$0xff]   ;;  %2681 = vmatprep.subr.bf16.mxu0 %v7472_v7 }
 0xe08   :  { %6818 = vmatprep.mubr.msk.bf16.mxu1 %vm7864_vm4, %v7863_v32  ;;  %v2406_v2 = vsel %vm2400_vm9, %v2399_v34, %v7328_v28  ;;  %v2405_v4 = vsel %vm2400_vm9, %v2398_v56, %v7327_v50  ;;  %2682 = vmatpush1.bf16.msra.mxu0 %v7470_v16  ;;  %v7478_v28 = vld [vmem:[%s9680_s5 + $0x24] ss:$8 sps:$4 sm:$0xff]   ;;  %v7476_v50 = vld [vmem:[%s9680_s5 + $0x20] ss:$8 sps:$4 sm:$0xff]   ;;  %v7479_v56 = vld [vmem:[%s9680_s5 + $0x30] ss:$8 sps:$4 sm:$0xff]  }
 0xe09   :  { %v7331_v58 = vpop.permute.xlu0 %7330  ;;  %2683 = vmatprep.subr.bf16.mxu0 %v7475_v5 }
 0xe0a   :  { %v7333_v23 = vunpack.i.h.bf16 %v7331_v58  ;;  %v7332_v1 = vunpack.i.l.bf16 %v7331_v58 }
 0xe0c   :  { %v2412_v53 = vsel %vm74_vm0, %v2406_v2, %v7333_v23  ;;  %v2411_v18 = vsel %vm74_vm0, %v2405_v4, %v7332_v1  ;;  %2684 = vmatpush1.bf16.msra.mxu0 %v7473_v20  ;;  %v7481_v23 = vld [vmem:[%s9680_s5 + $0x34] ss:$8 sps:$4 sm:$0xff]  }
 0xe0d   :  { %v2415_v44 = vpack.c.bf16 %v2412_v53, %v2411_v18  ;;  %2685 = vmatprep.subr.bf16.mxu0 %v7478_v28 }
 0xe0f   :  { %6819 = vmatmul.mubr.msk.bf16.gmra.mrb[68].mxu1 %vm184_vm3, %v2415_v44 }
 0xe10   :  { %2686 = vmatpush1.bf16.msra.mxu0 %v7476_v50 }
 0xe11   :  { %2687 = vmatprep.subr.bf16.mxu0 %v7481_v23 }
 0xe14   :  { %2688 = vmatpush1.bf16.msra.mxu0 %v7479_v56 }
 0xeb1   :  { %v2491_v29 = vpop.f32.mrb[60].mxu1 }
 0xeb2   :  { %v2492_v38 = vadd.f32 %v2491_v29, %v178_v15  ;;  %v6812_v59 = vpop.f32.mrb[61].mxu1 }
 0xeb3   :  { %v2494_v10 = vpop.f32.mrb[62].mxu1 }
 0xeb4   :  { %v8638_v55 = vadd.f32 %v2492_v38, %v7951_v33  ;;  %v2495_v3 = vadd.f32 %v2494_v10, %v178_v15  ;;  %v6813_v57 = vpop.f32.mrb[63].mxu1 }
 0xeb6   :  { %v8641_v51 = vadd.f32 %v2495_v3, %v7962_v37  ;;  %v2520_v52 = vsel %vm184_vm3, %v8638_v55, 0.0 }
 0xeb7   :  { %2521 = vadd.xlane.f32.xlu1 %v2520_v52 }
 0xeb8   :  { %v2523_v22 = vsel %vm184_vm3, %v8641_v51, 0.0 }
 0xeb9   :  { %2524 = vadd.xlane.f32.xlu0 %v2523_v22 }
 0xeda   :  { %v2499_v63 = vpop.f32.mrb[64].mxu1 }
 0xedb   :  { %v2500_v6 = vadd.f32 %v2499_v63, %v178_v15  ;;  %v6816_v26 = vpop.f32.mrb[65].mxu1 }
 0xedc   :  { %v2502_v30 = vpop.f32.mrb[66].mxu1 }
 0xedd   :  { %v8648_v33 = vadd.f32 %v2500_v6, %v7959_v36  ;;  %v2503_v24 = vadd.f32 %v2502_v30, %v178_v15  ;;  %v6817_v9 = vpop.f32.mrb[67].mxu1  ;;  %v7482_v30 = vld [vmem:[%s9681_s6 + $0x40] sm:$0xff]  }
 0xede   :  { %v7484_v9 = vld [vmem:[%s9681_s6 + $0x48] sm:$0xff]   ;;  %6376 = vmatprep.subr.bf16.mxu1 %v7482_v30 }
 0xedf   :  { %v8651_v37 = vadd.f32 %v2503_v24, %v7967_v39  ;;  %v2526_v13 = vsel %vm184_vm3, %v8648_v33, 0.0  ;;  %v7483_v24 = vld [vmem:[%s9681_s6] sm:$0xff]  }
 0xee0   :  { %2527 = vadd.xlane.f32.xlu0 %v2526_v13  ;;  %6377 = vmatpush3.bf16.msra.mxu1 %v7483_v24  ;;  %v7485_v13 = vld [vmem:[%s9681_s6 + $0x8] sm:$0xff]  }
 0xee1   :  { %v2529_v49 = vsel %vm184_vm3, %v8651_v37, 0.0  ;;  %6378 = vmatprep.subr.bf16.mxu1 %v7484_v9  ;;  %v7488_v9 = vld [vmem:[%s9681_s6 + $0x58] sm:$0xff]  }
 0xee2   :  { %v2507_v27 = vpop.f32.mrb[68].mxu1 }
 0xee3   :  { %v2508_v47 = vadd.f32 %v2507_v27, %v178_v15  ;;  %v6820_v41 = vpop.f32.mrb[69].mxu1 }
 0xee4   :  { %2530 = vadd.xlane.f32.xlu0 %v2529_v49  ;;  %v2510_v40 = vpop.f32.mrb[70].mxu1  ;;  %6379 = vmatpush3.bf16.msra.mxu1 %v7485_v13  ;;  %v7489_v13 = vld [vmem:[%s9681_s6 + $0x18] sm:$0xff]  }
 0xee5   :  { %v8658_v36 = vadd.f32 %v2508_v47, %v7956_v35  ;;  %v2511_v45 = vadd.f32 %v2510_v40, %v178_v15  ;;  %v6821_v25 = vpop.f32.mrb[71].mxu1 }
 0xee7   :  { %v8661_v39 = vadd.f32 %v2511_v45, %v7974_v42  ;;  %v2532_v54 = vsel %vm184_vm3, %v8658_v36, 0.0 }
 0xee8   :  { %2533 = vadd.xlane.f32.xlu1 %v2532_v54  ;;  %v179_v54 = vld [vmem:[%s9676_s1 + $0x27] ss:$0 sm:$0xff] }
 0xee9   :  { %v2535_v0 = vsel %vm184_vm3, %v8661_v39, 0.0 }
 0xeea   :  { %2536 = vadd.xlane.f32.xlu0 %v2535_v0 }
 0xf44   :  { %v2522_v17 = vpop.xlane.xlu1 %2521 }
 0xf45   :  { %v2538_v62 = vmul.f32 0.015625, %v2522_v17 }
 0xf46   :  { %v2525_v43 = vpop.xlane.xlu0 %2524 }
 0xf47   :  { %v8668_v48 = vsub.f32 %v8638_v55, %v2538_v62  ;;  %v2539_v35 = vmul.f32 0.015625, %v2525_v43 }
 0xf49   :  { %v8671_v21 = vsub.f32 %v8641_v51, %v2539_v35  ;;  %v2550_v42 = vmul.f32 %v8668_v48, %v8668_v48  ;;  %v180_v35 = vld [vmem:[%s9676_s1 + $0x30] ss:$0 sm:$0xff] }
 0xf4b   :  { %v2556_v46 = vsel %vm184_vm3, %v2550_v42, 0.0  ;;  %v2551_v60 = vmul.f32 %v8671_v21, %v8671_v21 }
 0xf4c   :  { %2557 = vadd.xlane.f32.xlu1 %v2556_v46 }
 0xf4d   :  { %v2559_v31 = vsel %vm184_vm3, %v2551_v60, 0.0 }
 0xf4e   :  { %2560 = vadd.xlane.f32.xlu0 %v2559_v31 }
 0xf6d   :  { %v2528_v58 = vpop.xlane.xlu0 %2527 }
 0xf6e   :  { %v2540_v34 = vmul.f32 0.015625, %v2528_v58 }
 0xf70   :  { %v8704_v1 = vsub.f32 %v8648_v33, %v2540_v34 }
 0xf71   :  { %v2531_v2 = vpop.xlane.xlu0 %2530 }
 0xf72   :  { %v2541_v4 = vmul.f32 0.015625, %v2531_v2  ;;  %v2552_v53 = vmul.f32 %v8704_v1, %v8704_v1 }
 0xf74   :  { %v8709_v18 = vsub.f32 %v8651_v37, %v2541_v4  ;;  %v2562_v44 = vsel %vm184_vm3, %v2552_v53, 0.0 }
 0xf75   :  { %2563 = vadd.xlane.f32.xlu1 %v2562_v44  ;;  %v2534_v15 = vpop.xlane.xlu1 %2533 }
 0xf76   :  { %v2542_v29 = vmul.f32 0.015625, %v2534_v15  ;;  %v2553_v38 = vmul.f32 %v8709_v18, %v8709_v18 }
 0xf77   :  { %v2537_v59 = vpop.xlane.xlu0 %2536 }
 0xf78   :  { %v8715_v10 = vsub.f32 %v8658_v36, %v2542_v29  ;;  %v2543_v3 = vmul.f32 0.015625, %v2537_v59  ;;  %v2565_v57 = vsel %vm184_vm3, %v2553_v38, 0.0 }
 0xf79   :  { %2566 = vadd.xlane.f32.xlu0 %v2565_v57 }
 0xf7a   :  { %v8719_v52 = vsub.f32 %v8661_v39, %v2543_v3  ;;  %v2554_v22 = vmul.f32 %v8715_v10, %v8715_v10 }
 0xf7c   :  { %v2568_v63 = vsel %vm184_vm3, %v2554_v22, 0.0  ;;  %v2555_v6 = vmul.f32 %v8719_v52, %v8719_v52 }
 0xf7d   :  { %2569 = vadd.xlane.f32.xlu1 %v2568_v63 }
 0xf7e   :  { %v2571_v26 = vsel %vm184_vm3, %v2555_v6, 0.0 }
 0xf7f   :  { %2572 = vadd.xlane.f32.xlu0 %v2571_v26 }
 0xfd9   :  { %v2558_v27 = vpop.xlane.xlu1 %2557 }
 0xfda   :  { %v2574_v47 = vmul.f32 0.015625, %v2558_v27  ;;  %v7490_v27 = vld [vmem:[%s9681_s6 + $0x60] sm:$0xff]  }
 0xfdb   :  { %v2561_v41 = vpop.xlane.xlu0 %2560 }
 0xfdc   :  { %v2580_v49 = vadd.f32 1e-05, %v2574_v47  ;;  %v2575_v40 = vmul.f32 0.015625, %v2561_v41  ;;  %v7491_v47 = vld [vmem:[%s9681_s6 + $0x20] sm:$0xff]   ;;  %v7492_v41 = vld [vmem:[%s9681_s6 + $0x68] sm:$0xff]  }
 0xfde   :  { %7654 = vrsqrt.f32 %v2580_v49  ;;  %v2581_v45 = vadd.f32 1e-05, %v2575_v40  ;;  %v7493_v49 = vld [vmem:[%s9681_s6 + $0x28] sm:$0xff]   ;;  %v7494_v40 = vld [vmem:[%s9681_s6 + $0x70] sm:$0xff]  }
 0xfe0   :  { %7656 = vrsqrt.f32 %v2581_v45  ;;  %v7495_v45 = vld [vmem:[%s9681_s6 + $0x30] sm:$0xff]  }
 0xfe8   :  { %v7655_v25 = vpop.eup %7654 }
 0xfe9   :  { %v2592_v0 = vmul.f32 %v7655_v25, %v8668_v48  ;;  %v7496_v25 = vld [vmem:[%s9681_s6 + $0x78] sm:$0xff]  }
 0xfea   :  { %v7657_v17 = vpop.eup %7656 }
 0xfeb   :  { %v2598_v62 = vmul.f32 %v2592_v0, %v179_v54  ;;  %v2593_v43 = vmul.f32 %v7657_v17, %v8671_v21  ;;  %v5970_v0 = vld [vmem:[%s9676_s1 + $0x31] ss:$8 sm:$0x3] }
 0xfec   :  { %v2625_v17 = vrot.slane %v5970_v0, %v8061_v12 }
 0xfed   :  { %v2599_v42 = vmul.f32 %v2593_v43, %v179_v54  ;;  %v2604_v46 = vadd.f32 %v2598_v62, %v180_v35  ;;  %v2629_v62 = vrot.slane %v5970_v0, %v8066_v14 }
 0xfef   :  { %v2605_v60 = vadd.f32 %v2599_v42, %v180_v35 }
 0xff1   :  { %v2610_v31 = vpack.c.bf16 %v2605_v60, %v2604_v46 }
 0xff3   :  { %6069 = vmatmul.mubr.msk.bf16.vlgmr.msra.gmra.mrb[56].mxu0 %vm184_vm3, %v2610_v31 }
 0xff4   :  { %2723 = vmatprep.mubr.bf16.mxu0 %v7860_v19 }
0x1002   :  { %v2564_v7 = vpop.xlane.xlu1 %2563 }
0x1003   :  { %v2576_v16 = vmul.f32 0.015625, %v2564_v7 }
0x1005   :  { %v2582_v5 = vadd.f32 1e-05, %v2576_v16 }
0x1006   :  { %v2567_v48 = vpop.xlane.xlu0 %2566 }
0x1007   :  { %7658 = vrsqrt.f32 %v2582_v5  ;;  %v2577_v20 = vmul.f32 0.015625, %v2567_v48 }
0x1009   :  { %v2583_v28 = vadd.f32 1e-05, %v2577_v20 }
0x100a   :  { %v2570_v21 = vpop.xlane.xlu1 %2569 }
0x100b   :  { %7660 = vrsqrt.f32 %v2583_v28  ;;  %v2578_v50 = vmul.f32 0.015625, %v2570_v21 }
0x100c   :  { %v2573_v58 = vpop.xlane.xlu0 %2572 }
0x100d   :  { %v2584_v34 = vadd.f32 1e-05, %v2578_v50  ;;  %v2579_v56 = vmul.f32 0.015625, %v2573_v58 }
0x100f   :  { %7662 = vrsqrt.f32 %v2584_v34  ;;  %v2585_v23 = vadd.f32 1e-05, %v2579_v56 }
0x1011   :  { %v7659_v2 = vpop.eup %7658  ;;  %7664 = vrsqrt.f32 %v2585_v23 }
0x1012   :  { %v2594_v4 = vmul.f32 %v7659_v2, %v8704_v1 }
0x1014   :  { %v2600_v15 = vmul.f32 %v2594_v4, %v179_v54 }
0x1015   :  { %v7661_v53 = vpop.eup %7660 }
0x1016   :  { %v2595_v44 = vmul.f32 %v7661_v53, %v8709_v18  ;;  %v2606_v59 = vadd.f32 %v2600_v15, %v180_v35 }
0x1018   :  { %v2601_v29 = vmul.f32 %v2595_v44, %v179_v54 }
0x1019   :  { %v7663_v38 = vpop.eup %7662 }
0x101a   :  { %v2607_v3 = vadd.f32 %v2601_v29, %v180_v35  ;;  %v2596_v57 = vmul.f32 %v7663_v38, %v8715_v10  ;;  %v7486_v10 = vld [vmem:[%s9681_s6 + $0x50] sm:$0xff]  }
0x101b   :  { %v7665_v22 = vpop.eup %7664  ;;  %6380 = vmatprep.subr.bf16.mxu1 %v7486_v10 }
0x101c   :  { %v2611_v63 = vpack.c.bf16 %v2607_v3, %v2606_v59  ;;  %v2597_v6 = vmul.f32 %v7665_v22, %v8719_v52  ;;  %v2602_v26 = vmul.f32 %v2596_v57, %v179_v54  ;;  %v7487_v52 = vld [vmem:[%s9681_s6 + $0x10] sm:$0xff]  }
0x101d   :  { %6381 = vmatpush3.bf16.msra.mxu1 %v7487_v52 }
0x101e   :  { %6070 = vmatmul.mubr.msk.bf16.gmra.mrb[60].mxu0 %vm184_vm3, %v2611_v63  ;;  %v2603_v30 = vmul.f32 %v2597_v6, %v179_v54  ;;  %v2608_v24 = vadd.f32 %v2602_v26, %v180_v35  ;;  %6382 = vmatprep.subr.bf16.mxu1 %v7488_v9  ;;  %v7497_v54 = vld [vmem:[%s9681_s6 + $0x38] sm:$0xff]  }
0x101f   :  { %2733 = vmatprep.mubr.bf16.mxu0 %v7860_v19 }
0x1020   :  { %v2609_v1 = vadd.f32 %v2603_v30, %v180_v35 }
0x1021   :  { %6383 = vmatpush3.bf16.msra.mxu1 %v7489_v13 }
0x1022   :  { %v2612_v18 = vpack.c.bf16 %v2609_v1, %v2608_v24  ;;  %6384 = vmatprep.subr.bf16.mxu1 %v7490_v27 }
0x1025   :  { %6385 = vmatpush3.bf16.msra.mxu1 %v7491_v47 }
0x1026   :  { %6071 = vmatmul.mubr.msk.bf16.gmra.mrb[64].mxu0 %vm184_vm3, %v2612_v18  ;;  %6386 = vmatprep.subr.bf16.mxu1 %v7492_v41 }
0x1027   :  { %3205 = vmatprep.mubr.bf16.mxu0 %v7860_v19 }
0x1029   :  { %6387 = vmatpush3.bf16.msra.mxu1 %v7493_v49 }
0x102a   :  { %6388 = vmatprep.subr.bf16.mxu1 %v7494_v40 }
0x102d   :  { %6389 = vmatpush3.bf16.msra.mxu1 %v7495_v45 }
0x102e   :  { %6390 = vmatprep.subr.bf16.mxu1 %v7496_v25 }
0x1031   :  { %6391 = vmatpush3.bf16.msra.mxu1 %v7497_v54 }
0x1032   :  { %7154 = vmatprep.subr.bf16.mxu1 %v7861_v11 }
0x10c6   :  { %v2715_v43 = vpop.f32.mrb[56].mxu0 }
0x10c7   :  { %v2716_v35 = vadd.f32 %v2715_v43, %v2625_v17  ;;  %v2717_v42 = vpop.f32.mrb[57].mxu0 }
0x10c8   :  { %v2718_v46 = vadd.f32 %v2717_v42, %v2629_v62  ;;  %v2719_v60 = vpop.f32.mrb[58].mxu0 }
0x10c9   :  { %v2756_v31 = vmul.f32 0.70710677, %v2716_v35  ;;  %v2720_v7 = vadd.f32 %v2719_v60, %v2625_v17  ;;  %v2721_v16 = vpop.f32.mrb[59].mxu0  ;;  %v2744_v2 = vmul.f32 0.5, %v2716_v35 }
0x10ca   :  { %v2757_v5 = vmul.f32 0.70710677, %v2718_v46  ;;  %v2722_v48 = vadd.f32 %v2721_v16, %v2629_v62  ;;  %v2745_v44 = vmul.f32 0.5, %v2718_v46 }
0x10cb   :  { %7666 = verf.f32 %v2756_v31  ;;  %v2758_v20 = vmul.f32 0.70710677, %v2720_v7  ;;  %v2746_v4 = vmul.f32 0.5, %v2720_v7 }
0x10cc   :  { %7668 = verf.f32 %v2757_v5  ;;  %v2759_v28 = vmul.f32 0.70710677, %v2722_v48  ;;  %v2747_v15 = vmul.f32 0.5, %v2722_v48 }
0x10cd   :  { %7670 = verf.f32 %v2758_v20 }
0x10ce   :  { %7672 = verf.f32 %v2759_v28 }
0x10d5   :  { %v7667_v21 = vpop.eup %7666 }
0x10d6   :  { %v7669_v50 = vpop.eup %7668  ;;  %v2780_v58 = vadd.f32 1.0, %v7667_v21 }
0x10d7   :  { %v7671_v34 = vpop.eup %7670  ;;  %v2781_v56 = vadd.f32 1.0, %v7669_v50 }
0x10d8   :  { %v7673_v23 = vpop.eup %7672  ;;  %v2782_v53 = vadd.f32 1.0, %v7671_v34  ;;  %v2792_v38 = vmul.f32 %v2780_v58, %v2744_v2 }
0x10d9   :  { %v2783_v29 = vadd.f32 1.0, %v7673_v23  ;;  %v2793_v3 = vmul.f32 %v2781_v56, %v2745_v44 }
0x10da   :  { %v2794_v59 = vmul.f32 %v2782_v53, %v2746_v4 }
0x10db   :  { %v2795_v57 = vmul.f32 %v2783_v29, %v2747_v15 }
0x10dc   :  { %v2804_v22 = vpack.c.bf16 %v2794_v59, %v2792_v38 }
0x10dd   :  { %v2805_v63 = vpack.c.bf16 %v2795_v57, %v2793_v3 }
0x10df   :  { %2970 = vmatprep.mubr.bf16.mxu1 %v2805_v63 }
0x10e0   :  { %2971 = vmatmul.mubr.bf16.vlgmr.msra.gmra.mrb[72].mxu1 %v2804_v22 }
0x10f1   :  { %v2725_v6 = vpop.f32.mrb[60].mxu0 }
0x10f2   :  { %v2726_v26 = vadd.f32 %v2725_v6, %v2625_v17  ;;  %v2727_v30 = vpop.f32.mrb[61].mxu0 }
0x10f3   :  { %v2728_v1 = vadd.f32 %v2727_v30, %v2629_v62  ;;  %v2729_v24 = vpop.f32.mrb[62].mxu0 }
0x10f4   :  { %v2760_v18 = vmul.f32 0.70710677, %v2726_v26  ;;  %v2730_v10 = vadd.f32 %v2729_v24, %v2625_v17  ;;  %v2731_v52 = vpop.f32.mrb[63].mxu0  ;;  %v2748_v28 = vmul.f32 0.5, %v2726_v26 }
0x10f5   :  { %v2761_v9 = vmul.f32 0.70710677, %v2728_v1  ;;  %v2732_v13 = vadd.f32 %v2731_v52, %v2629_v62  ;;  %v2749_v58 = vmul.f32 0.5, %v2728_v1 }
0x10f6   :  { %7674 = verf.f32 %v2760_v18  ;;  %v2762_v27 = vmul.f32 0.70710677, %v2730_v10  ;;  %v2750_v21 = vmul.f32 0.5, %v2730_v10 }
0x10f7   :  { %7676 = verf.f32 %v2761_v9  ;;  %v2763_v47 = vmul.f32 0.70710677, %v2732_v13 }
0x10f8   :  { %7678 = verf.f32 %v2762_v27  ;;  %v183_v27 = vld [vmem:[%s9676_s1 + $0x32] ss:$0 sm:$0xff] }
0x10f9   :  { %7680 = verf.f32 %v2763_v47  ;;  %v2735_v41 = vpop.f32.mrb[64].mxu0 }
0x10fa   :  { %v2736_v49 = vadd.f32 %v2735_v41, %v2625_v17  ;;  %v2737_v40 = vpop.f32.mrb[65].mxu0 }
0x10fb   :  { %v2738_v45 = vadd.f32 %v2737_v40, %v2629_v62  ;;  %v2739_v25 = vpop.f32.mrb[66].mxu0 }
0x10fc   :  { %v2764_v54 = vmul.f32 0.70710677, %v2736_v49  ;;  %v2740_v0 = vadd.f32 %v2739_v25, %v2625_v17  ;;  %v2741_v43 = vpop.f32.mrb[67].mxu0  ;;  %v2751_v17 = vmul.f32 0.5, %v2732_v13  ;;  %v2752_v57 = vmul.f32 0.5, %v2736_v49 }
0x10fd   :  { %v2765_v35 = vmul.f32 0.70710677, %v2738_v45  ;;  %v2742_v42 = vadd.f32 %v2741_v43, %v2629_v62  ;;  %v2753_v6 = vmul.f32 0.5, %v2738_v45 }
0x10fe   :  { %7682 = verf.f32 %v2764_v54  ;;  %v2766_v46 = vmul.f32 0.70710677, %v2740_v0  ;;  %v2754_v22 = vmul.f32 0.5, %v2740_v0 }
0x10ff   :  { %7684 = verf.f32 %v2765_v35  ;;  %v2767_v60 = vmul.f32 0.70710677, %v2742_v42  ;;  %v2755_v26 = vmul.f32 0.5, %v2742_v42 }
0x1100   :  { %v7675_v31 = vpop.eup %7674  ;;  %7686 = verf.f32 %v2766_v46 }
0x1101   :  { %v7677_v7 = vpop.eup %7676  ;;  %v2784_v16 = vadd.f32 1.0, %v7675_v31  ;;  %7688 = verf.f32 %v2767_v60 }
0x1102   :  { %v7679_v5 = vpop.eup %7678  ;;  %v2785_v48 = vadd.f32 1.0, %v7677_v7 }
0x1103   :  { %v7681_v20 = vpop.eup %7680  ;;  %v2786_v50 = vadd.f32 1.0, %v7679_v5  ;;  %v2796_v56 = vmul.f32 %v2784_v16, %v2748_v28 }
0x1104   :  { %v2787_v34 = vadd.f32 1.0, %v7681_v20  ;;  %v2797_v23 = vmul.f32 %v2785_v48, %v2749_v58 }
0x1105   :  { %v2798_v62 = vmul.f32 %v2786_v50, %v2750_v21 }
0x1106   :  { %v2799_v2 = vmul.f32 %v2787_v34, %v2751_v17 }
0x1107   :  { %v2806_v4 = vpack.c.bf16 %v2798_v62, %v2796_v56 }
0x1108   :  { %v7683_v53 = vpop.eup %7682  ;;  %v2807_v44 = vpack.c.bf16 %v2799_v2, %v2797_v23 }
0x1109   :  { %v7685_v15 = vpop.eup %7684  ;;  %v2788_v29 = vadd.f32 1.0, %v7683_v53 }
0x110a   :  { %v7687_v38 = vpop.eup %7686  ;;  %v2789_v59 = vadd.f32 1.0, %v7685_v15  ;;  %2978 = vmatprep.mubr.bf16.mxu1 %v2807_v44 }
0x110b   :  { %v7689_v3 = vpop.eup %7688  ;;  %v2790_v63 = vadd.f32 1.0, %v7687_v38  ;;  %2979 = vmatmul.mubr.bf16.gmra.mrb[76].mxu1 %v2806_v4  ;;  %v2800_v1 = vmul.f32 %v2788_v29, %v2752_v57 }
0x110c   :  { %v2791_v30 = vadd.f32 1.0, %v7689_v3  ;;  %v2801_v18 = vmul.f32 %v2789_v59, %v2753_v6  ;;  %v7498_v6 = vld [vmem:[%s9678_s3 + $0x40] ss:$8 sps:$4 sm:$0xff]  }
0x110d   :  { %v2802_v24 = vmul.f32 %v2790_v63, %v2754_v22  ;;  %v7500_v63 = vld [vmem:[%s9678_s3 + $0x44] ss:$8 sps:$4 sm:$0xff]  }
0x110e   :  { %v2803_v10 = vmul.f32 %v2791_v30, %v2755_v26  ;;  %3173 = vmatprep.subr.bf16.mxu0 %v7500_v63  ;;  %v7503_v26 = vld [vmem:[%s9678_s3 + $0x54] ss:$8 sps:$4 sm:$0xff]   ;;  %v7501_v30 = vld [vmem:[%s9678_s3 + $0x50] ss:$8 sps:$4 sm:$0xff]  }
0x110f   :  { %v2808_v52 = vpack.c.bf16 %v2802_v24, %v2800_v1  ;;  %3174 = vmatpush1.bf16.msra.mxu0 %v7498_v6  ;;  %v7506_v1 = vld [vmem:[%s9678_s3 + $0x64] ss:$8 sps:$4 sm:$0xff]   ;;  %v7504_v24 = vld [vmem:[%s9678_s3 + $0x60] ss:$8 sps:$4 sm:$0xff]  }
0x1110   :  { %v2809_v9 = vpack.c.bf16 %v2803_v10, %v2801_v18  ;;  %3175 = vmatprep.subr.bf16.mxu0 %v7503_v26  ;;  %v7507_v10 = vld [vmem:[%s9678_s3 + $0x70] ss:$8 sps:$4 sm:$0xff]  }
0x1112   :  { %2986 = vmatprep.mubr.bf16.mxu1 %v2809_v9 }
0x1113   :  { %2987 = vmatmul.mubr.bf16.gmra.mrb[80].mxu1 %v2808_v52  ;;  %3176 = vmatpush1.bf16.msra.mxu0 %v7501_v30  ;;  %v7509_v52 = vld [vmem:[%s9678_s3 + $0x74] ss:$8 sps:$4 sm:$0xff]  }
0x1114   :  { %6843 = vmatprep.mubr.msk.f32.mxu1 %vm7864_vm4, %v7863_v32  ;;  %3177 = vmatprep.subr.bf16.mxu0 %v7506_v1 }
0x1117   :  { %3178 = vmatpush1.bf16.msra.mxu0 %v7504_v24 }
0x1118   :  { %3179 = vmatprep.subr.bf16.mxu0 %v7509_v52 }
0x111b   :  { %3180 = vmatpush1.bf16.msra.mxu0 %v7507_v10 }
0x111c   :  { %7150 = vmatprep.subr.bf16.mxu0 %v7861_v11 }
0x11b3   :  { %v6392_v13 = vpop.f32.mrb[72].mxu1 }
0x11b4   :  { %v6393_v47 = vpop.f32.mrb[73].mxu1 }
0x11b5   :  { %v6394_v41 = vadd.f32 %v6393_v47, %v6392_v13  ;;  %v6395_v49 = vpop.f32.mrb[74].mxu1 }
0x11b6   :  { %v6396_v40 = vpop.f32.mrb[75].mxu1 }
0x11b7   :  { %v2973_v45 = vadd.f32 %v6394_v41, %v183_v27  ;;  %v6397_v25 = vadd.f32 %v6396_v40, %v6395_v49 }
0x11b9   :  { %v8805_v54 = vadd.f32 %v2973_v45, %v8638_v55  ;;  %v2976_v0 = vadd.f32 %v6397_v25, %v183_v27 }
0x11bb   :  { %v8808_v43 = vadd.f32 %v2976_v0, %v8641_v51  ;;  %v3011_v35 = vsel %vm184_vm3, %v8805_v54, 0.0 }
0x11bc   :  { %3012 = vadd.xlane.f32.xlu1 %v3011_v35 }
0x11bd   :  { %v3014_v42 = vsel %vm184_vm3, %v8808_v43, 0.0 }
0x11be   :  { %3015 = vadd.xlane.f32.xlu0 %v3014_v42 }
0x11de   :  { %v6398_v46 = vpop.f32.mrb[76].mxu1 }
0x11df   :  { %v6399_v60 = vpop.f32.mrb[77].mxu1 }
0x11e0   :  { %v6400_v31 = vadd.f32 %v6399_v60, %v6398_v46  ;;  %v6401_v7 = vpop.f32.mrb[78].mxu1 }
0x11e1   :  { %v6402_v16 = vpop.f32.mrb[79].mxu1 }
0x11e2   :  { %v2981_v5 = vadd.f32 %v6400_v31, %v183_v27  ;;  %v6403_v55 = vadd.f32 %v6402_v16, %v6401_v7 }
0x11e4   :  { %v8815_v48 = vadd.f32 %v2981_v5, %v8648_v33  ;;  %v2984_v51 = vadd.f32 %v6403_v55, %v183_v27 }
0x11e6   :  { %v8818_v20 = vadd.f32 %v2984_v51, %v8651_v37  ;;  %v6404_v28 = vpop.f32.mrb[80].mxu1  ;;  %v3017_v21 = vsel %vm184_vm3, %v8815_v48, 0.0 }
0x11e7   :  { %v6405_v50 = vpop.f32.mrb[81].mxu1  ;;  %3018 = vadd.xlane.f32.xlu1 %v3017_v21 }
0x11e8   :  { %v6406_v58 = vadd.f32 %v6405_v50, %v6404_v28  ;;  %v6407_v17 = vpop.f32.mrb[82].mxu1  ;;  %v3020_v34 = vsel %vm184_vm3, %v8818_v20, 0.0 }
0x11e9   :  { %v6408_v56 = vpop.f32.mrb[83].mxu1  ;;  %3021 = vadd.xlane.f32.xlu0 %v3020_v34 }
0x11ea   :  { %v2989_v62 = vadd.f32 %v6406_v58, %v183_v27  ;;  %v6409_v33 = vadd.f32 %v6408_v56, %v6407_v17  ;;  %v3001_v56 = vld [vmem:[%s9676_s1 + $0x33] ss:$0 sm:$0xff] }
0x11ec   :  { %v8825_v23 = vadd.f32 %v2989_v62, %v8658_v36  ;;  %v2992_v37 = vadd.f32 %v6409_v33, %v183_v27 }
0x11ee   :  { %v8828_v2 = vadd.f32 %v2992_v37, %v8661_v39  ;;  %v3023_v4 = vsel %vm184_vm3, %v8825_v23, 0.0 }
0x11ef   :  { %3024 = vadd.xlane.f32.xlu1 %v3023_v4 }
0x11f0   :  { %v3026_v53 = vsel %vm184_vm3, %v8828_v2, 0.0 }
0x11f1   :  { %3027 = vadd.xlane.f32.xlu0 %v3026_v53  ;;  %v3002_v53 = vld [vmem:[%s9676_s1 + $0x34] ss:$0 sm:$0xff] }
0x1249   :  { %v3013_v44 = vpop.xlane.xlu1 %3012 }
0x124a   :  { %v3029_v15 = vmul.f32 0.015625, %v3013_v44 }
0x124b   :  { %v3016_v29 = vpop.xlane.xlu0 %3015 }
0x124c   :  { %v3035_v38 = vsub.f32 %v8805_v54, %v3029_v15  ;;  %v3030_v59 = vmul.f32 0.015625, %v3016_v29 }
0x124e   :  { %v3036_v36 = vsub.f32 %v8808_v43, %v3030_v59  ;;  %v3041_v3 = vmul.f32 %v3035_v38, %v3035_v38 }
0x1250   :  { %v3047_v39 = vsel %vm184_vm3, %v3041_v3, 0.0  ;;  %v3042_v57 = vmul.f32 %v3036_v36, %v3036_v36 }
0x1251   :  { %3048 = vadd.xlane.f32.xlu1 %v3047_v39 }
0x1252   :  { %v3050_v22 = vsel %vm184_vm3, %v3042_v57, 0.0 }
0x1253   :  { %3051 = vadd.xlane.f32.xlu0 %v3050_v22 }
0x1274   :  { %v3019_v18 = vpop.xlane.xlu1 %3018 }
0x1275   :  { %v3031_v9 = vmul.f32 0.015625, %v3019_v18 }
0x1276   :  { %v3022_v13 = vpop.xlane.xlu0 %3021 }
0x1277   :  { %v3037_v27 = vsub.f32 %v8815_v48, %v3031_v9  ;;  %v3032_v47 = vmul.f32 0.015625, %v3022_v13 }
0x1279   :  { %v3038_v41 = vsub.f32 %v8818_v20, %v3032_v47  ;;  %v3043_v49 = vmul.f32 %v3037_v27, %v3037_v27 }
0x127b   :  { %v3053_v40 = vsel %vm184_vm3, %v3043_v49, 0.0  ;;  %v3044_v45 = vmul.f32 %v3038_v41, %v3038_v41 }
0x127c   :  { %3054 = vadd.xlane.f32.xlu1 %v3053_v40  ;;  %v3025_v25 = vpop.xlane.xlu1 %3024 }
0x127d   :  { %v3033_v0 = vmul.f32 0.015625, %v3025_v25  ;;  %v3056_v35 = vsel %vm184_vm3, %v3044_v45, 0.0 }
0x127e   :  { %3057 = vadd.xlane.f32.xlu0 %v3056_v35  ;;  %v3028_v42 = vpop.xlane.xlu0 %3027 }
0x127f   :  { %v3039_v46 = vsub.f32 %v8825_v23, %v3033_v0  ;;  %v3034_v60 = vmul.f32 0.015625, %v3028_v42 }
0x1281   :  { %v3040_v31 = vsub.f32 %v8828_v2, %v3034_v60  ;;  %v3045_v7 = vmul.f32 %v3039_v46, %v3039_v46 }
0x1283   :  { %v3059_v16 = vsel %vm184_vm3, %v3045_v7, 0.0  ;;  %v3046_v5 = vmul.f32 %v3040_v31, %v3040_v31 }
0x1284   :  { %3060 = vadd.xlane.f32.xlu1 %v3059_v16 }
0x1285   :  { %v3062_v55 = vsel %vm184_vm3, %v3046_v5, 0.0 }
0x1286   :  { %3063 = vadd.xlane.f32.xlu0 %v3062_v55 }
0x12de   :  { %v3049_v51 = vpop.xlane.xlu1 %3048 }
0x12df   :  { %v3065_v28 = vmul.f32 0.015625, %v3049_v51 }
0x12e0   :  { %v3052_v21 = vpop.xlane.xlu0 %3051 }
0x12e1   :  { %v3071_v50 = vadd.f32 1e-05, %v3065_v28  ;;  %v3066_v58 = vmul.f32 0.015625, %v3052_v21 }
0x12e3   :  { %7690 = vrsqrt.f32 %v3071_v50  ;;  %v3072_v17 = vadd.f32 1e-05, %v3066_v58 }
0x12e5   :  { %7692 = vrsqrt.f32 %v3072_v17 }
0x12ed   :  { %v7691_v34 = vpop.eup %7690 }
0x12ee   :  { %v3083_v62 = vmul.f32 %v7691_v34, %v3035_v38 }
0x12ef   :  { %v7693_v33 = vpop.eup %7692 }
0x12f0   :  { %v3089_v37 = vmul.f32 %v3083_v62, %v3001_v56  ;;  %v3084_v4 = vmul.f32 %v7693_v33, %v3036_v36 }
0x12f2   :  { %v3090_v44 = vmul.f32 %v3084_v4, %v3001_v56  ;;  %v3095_v15 = vadd.f32 %v3089_v37, %v3002_v53 }
0x12f4   :  { %v3096_v29 = vadd.f32 %v3090_v44, %v3002_v53 }
0x12f6   :  { %v3101_v59 = vpack.c.bf16 %v3096_v29, %v3095_v15 }
0x12f8   :  { %6106 = vmatmul.mubr.msk.bf16.vlgmr.msra.gmra.mrb[68].mxu0 %vm184_vm3, %v3101_v59 }
0x12f9   :  { %3215 = vmatprep.mubr.bf16.mxu0 %v7860_v19 }
0x1309   :  { %v3055_v3 = vpop.xlane.xlu1 %3054 }
0x130a   :  { %v3067_v39 = vmul.f32 0.015625, %v3055_v3 }
0x130b   :  { %v3058_v57 = vpop.xlane.xlu0 %3057 }
0x130c   :  { %v3073_v22 = vadd.f32 1e-05, %v3067_v39  ;;  %v3068_v38 = vmul.f32 0.015625, %v3058_v57 }
0x130e   :  { %7694 = vrsqrt.f32 %v3073_v22  ;;  %v3074_v63 = vadd.f32 1e-05, %v3068_v38 }
0x1310   :  { %7696 = vrsqrt.f32 %v3074_v63 }
0x1311   :  { %v3061_v36 = vpop.xlane.xlu1 %3060 }
0x1312   :  { %v3069_v6 = vmul.f32 0.015625, %v3061_v36 }
0x1313   :  { %v3064_v26 = vpop.xlane.xlu0 %3063 }
0x1314   :  { %v3075_v30 = vadd.f32 1e-05, %v3069_v6  ;;  %v3070_v1 = vmul.f32 0.015625, %v3064_v26 }
0x1316   :  { %7698 = vrsqrt.f32 %v3075_v30  ;;  %v3076_v24 = vadd.f32 1e-05, %v3070_v1 }
0x1318   :  { %v7695_v18 = vpop.eup %7694  ;;  %7700 = vrsqrt.f32 %v3076_v24 }
0x1319   :  { %v3085_v10 = vmul.f32 %v7695_v18, %v3037_v27 }
0x131a   :  { %v7697_v52 = vpop.eup %7696 }
0x131b   :  { %v3086_v9 = vmul.f32 %v7697_v52, %v3038_v41  ;;  %v3091_v13 = vmul.f32 %v3085_v10, %v3001_v56  ;;  %v6088_v41 = vld [vmem:[%s9676_s1 + $0x35] ss:$8 sm:$0x3] }
0x131d   :  { %v3092_v47 = vmul.f32 %v3086_v9, %v3001_v56  ;;  %v3097_v49 = vadd.f32 %v3091_v13, %v3002_v53 }
0x131f   :  { %v3098_v40 = vadd.f32 %v3092_v47, %v3002_v53 }
0x1320   :  { %v7699_v45 = vpop.eup %7698 }
0x1321   :  { %v3102_v25 = vpack.c.bf16 %v3098_v40, %v3097_v49  ;;  %v3087_v0 = vmul.f32 %v7699_v45, %v3039_v46  ;;  %v3117_v46 = vrot.slane %v6088_v41, %v8061_v12 }
0x1322   :  { %v7701_v35 = vpop.eup %7700 }
0x1323   :  { %6107 = vmatmul.mubr.msk.bf16.gmra.mrb[72].mxu0 %vm184_vm3, %v3102_v25  ;;  %v3088_v42 = vmul.f32 %v7701_v35, %v3040_v31  ;;  %v3093_v60 = vmul.f32 %v3087_v0, %v3001_v56  ;;  %v8889_v31 = vrot.slane %v6088_v41, %v8066_v14 }
0x1324   :  { %3225 = vmatprep.mubr.bf16.mxu0 %v7860_v19 }
0x1325   :  { %v3094_v7 = vmul.f32 %v3088_v42, %v3001_v56  ;;  %v3099_v16 = vadd.f32 %v3093_v60, %v3002_v53 }
0x1327   :  { %v3100_v5 = vadd.f32 %v3094_v7, %v3002_v53 }
0x1329   :  { %v3103_v27 = vpack.c.bf16 %v3100_v5, %v3099_v16 }
0x132b   :  { %6108 = vmatmul.mubr.msk.bf16.gmra.mrb[76].mxu0 %vm184_vm3, %v3103_v27 }
0x132c   :  { %6828 = vmatprep.mubr.msk.f32.mxu0 %vm7864_vm4, %v7863_v32 }
0x13cb   :  { %v3207_v55 = vpop.f32.mrb[68].mxu0 }
0x13cc   :  { %v3209_v51 = vpop.f32.mrb[69].mxu0  ;;  %v8891_v21 = vadd.f32 %v3207_v55, %v3117_v46 }
0x13cd   :  { %v3211_v28 = vpop.f32.mrb[70].mxu0  ;;  %v3210_v17 = vadd.f32 %v3209_v51, %v8889_v31 }
0x13ce   :  { %v8893_v50 = vadd.f32 %v3211_v28, %v3117_v46  ;;  %v3213_v58 = vpop.f32.mrb[71].mxu0 }
0x13cf   :  { %v3214_v34 = vadd.f32 %v3213_v58, %v8889_v31 }
0x13d0   :  { %v8899_v56 = vpack.i.bf16 %v8893_v50, %v8891_v21 }
0x13d1   :  { %v7159_v62 = vpack.c.bf16 %v3214_v34, %v3210_v17  ;;  %v8901_v33 = vpack.i.bf16 %v3214_v34, %v3210_v17 }
0x13d2   :  { %7335 = vrot.lane.b32.xlu1 %v8899_v56, %s7862_s21 }
0x13f6   :  { %v3217_v37 = vpop.f32.mrb[72].mxu0 }
0x13f7   :  { %v8905_v4 = vadd.f32 %v3217_v37, %v3117_v46  ;;  %v3219_v53 = vpop.f32.mrb[73].mxu0 }
0x13f8   :  { %v3221_v44 = vpop.f32.mrb[74].mxu0  ;;  %v8940_v9 = vadd.f32 %v3219_v53, %v8889_v31 }
0x13f9   :  { %v3223_v15 = vpop.f32.mrb[75].mxu0  ;;  %3243 = vrot.lane.b32.xlu0 %v8905_v4, %s7862_s21  ;;  %v8909_v59 = vadd.f32 %v3221_v44, %v3117_v46 }
0x13fa   :  { %v3224_v57 = vadd.f32 %v3223_v15, %v8889_v31 }
0x13fe   :  { %v3227_v29 = vpop.f32.mrb[76].mxu0 }
0x13ff   :  { %v8911_v3 = vadd.f32 %v3227_v29, %v3117_v46  ;;  %v3229_v39 = vpop.f32.mrb[77].mxu0 }
0x1400   :  { %v3230_v22 = vadd.f32 %v3229_v39, %v8889_v31  ;;  %v3231_v38 = vpop.f32.mrb[78].mxu0 }
0x1401   :  { %v3233_v63 = vpop.f32.mrb[79].mxu0  ;;  %v8917_v36 = vpack.i.bf16 %v8911_v3, %v8909_v59  ;;  %v8923_v30 = vadd.f32 %v3231_v38, %v3117_v46 }
0x1402   :  { %v7162_v6 = vpack.c.bf16 %v3230_v22, %v3224_v57  ;;  %v8919_v26 = vpack.i.bf16 %v3230_v22, %v3224_v57  ;;  %v8963_v25 = vadd.f32 %v3233_v63, %v8889_v31 }
0x1403   :  { %7340 = vrot.lane.b32.xlu1 %v8917_v36, %s7862_s21 }
0x1407   :  { %3344 = vrot.lane.b32.xlu1 %v8923_v30, %s7862_s21  ;;  %s7872_s21 = smov [#allocation2]  }
0x140b   :  { %7345 = vrot.lane.b32.xlu1 %v8899_v56, %s7866_s22 }
0x1444   :  { %v7336_v1 = vpop.permute.xlu1 %7335 }
0x1445   :  { %v7338_v24 = vunpack.i.h.bf16 %v7336_v1  ;;  %v7337_v18 = vunpack.i.l.bf16 %v7336_v1 }
0x1447   :  { %v7151_v10 = vpack.c.bf16 %v7338_v24, %v7337_v18 }
0x1449   :  { %7153 = vmatpush3.bf16.xpose.msk.msra.mxu0 %vm8115_vm6, %v7151_v10 }
0x144a   :  { %6826 = vmatprep.subr.mxu0 %v7863_v32 }
0x146b   :  { %v3244_v52 = vpop.permute.xlu0 %3243 }
0x146c   :  { %6827 = vmatpush3.xpose.msk.msra.mxu0 %vm419_vm5, %v3244_v52 }
0x146d   :  { %7158 = vmatprep.subr.bf16.mxu0 %v7861_v11 }
0x146f   :  { %6829 = vmatmul.mubr.msk.f32.vlgmr.msra.gmra.mrb[54].mxu0 %vm419_vm5, %v8891_v21 }
0x1470   :  { %7160 = vmatpush3.bf16.msra.mxu0 %v7159_v62  ;;  %6831 = vmatprep.mubr.msk.f32.mxu0 %vm7864_vm4, %v7863_v32 }
0x1471   :  { %6856 = vmatprep.subr.mxu0 %v7863_v32 }
0x1473   :  { %6832 = vmatmul.mubr.msk.f32.gmra.mrb[80].mxu0 %vm419_vm5, %v8893_v50 }
0x1474   :  { %6857 = vmatpush3.msra.mxu0 %v8940_v9  ;;  %6834 = vmatprep.mubr.msk.f32.mxu0 %vm7864_vm4, %v7863_v32 }
0x1475   :  { %v7341_v13 = vpop.permute.xlu1 %7340  ;;  %7164 = vmatprep.subr.bf16.mxu0 %v7861_v11 }
0x1476   :  { %v7343_v47 = vunpack.i.h.bf16 %v7341_v13  ;;  %v7342_v49 = vunpack.i.l.bf16 %v7341_v13 }
0x1477   :  { %6835 = vmatmul.mubr.msk.f32.gmra.mrb[82].mxu0 %vm419_vm5, %v8905_v4 }
0x1478   :  { %v7155_v40 = vpack.c.bf16 %v7343_v47, %v7342_v49  ;;  %6858 = vmatprep.mubr.msk.f32.mxu0 %vm7864_vm4, %v7863_v32 }
0x1479   :  { %v3345_v45 = vpop.permute.xlu1 %3344 }
0x147a   :  { %7157 = vmatpush3.bf16.xpose.msk.msra.mxu1 %vm8115_vm6, %v7155_v40 }
0x147b   :  { %6841 = vmatprep.subr.mxu1 %v7863_v32 }
0x147d   :  { %v8993_v24 = vpop.permute.xlu1 %7345 }
0x1482   :  { %6842 = vmatpush3.xpose.msk.msra.mxu1 %vm419_vm5, %v3345_v45 }
0x1483   :  { %7161 = vmatprep.subr.bf16.mxu1 %v7861_v11 }
0x1485   :  { %6844 = vmatmul.mubr.msk.f32.vlgmr.msra.gmra.mrb[58].mxu1 %vm419_vm5, %v8909_v59 }
0x1486   :  { %7163 = vmatpush3.bf16.msra.mxu1 %v7162_v6  ;;  %6846 = vmatprep.mubr.msk.f32.mxu1 %vm7864_vm4, %v7863_v32 }
0x1487   :  { %6871 = vmatprep.subr.mxu1 %v7863_v32 }
0x1489   :  { %6847 = vmatmul.mubr.msk.f32.gmra.mrb[84].mxu1 %vm419_vm5, %v8911_v3 }
0x148a   :  { %6872 = vmatpush3.msra.mxu1 %v8963_v25  ;;  %6849 = vmatprep.mubr.msk.f32.mxu1 %vm7864_vm4, %v7863_v32 }
0x148b   :  { %7168 = vmatprep.subr.bf16.mxu1 %v7861_v11 }
0x148d   :  { %6850 = vmatmul.mubr.msk.f32.gmra.mrb[86].mxu1 %vm419_vm5, %v8923_v30 }
0x148e   :  { %6873 = vmatprep.mubr.msk.f32.mxu1 %vm7864_vm4, %v7863_v32 }
0x1542   :  { %v3323_v0 = vpop.f32.mrb[54].mxu0 }
0x1543   :  { %v3438_v35 = vmul.f32 0.25, %v3323_v0  ;;  %v6830_v42 = vpop.f32.mrb[55].mxu0 }
0x1545   :  { %v3444_v60 = vadd.f32 %v3438_v35, %v8157_v8 }
0x1546   :  { %v3328_v7 = vpop.f32.mrb[80].mxu0 }
0x1547   :  { %v3439_v16 = vmul.f32 0.25, %v3328_v7  ;;  %v6833_v5 = vpop.f32.mrb[81].mxu0  ;;  %v3450_v27 = vsel %vm625_vm8, %v3444_v60, -inf }
0x1548   :  { %3451 = vmax.xlane.f32.xlu1 %v3450_v27 }
0x1549   :  { %v3445_v41 = vadd.f32 %v3439_v16, %v8157_v8 }
0x154a   :  { %v3333_v46 = vpop.f32.mrb[82].mxu0 }
0x154b   :  { %v3440_v55 = vmul.f32 0.25, %v3333_v46  ;;  %v6836_v31 = vpop.f32.mrb[83].mxu0  ;;  %v3453_v51 = vsel %vm625_vm8, %v3445_v41, -inf }
0x154c   :  { %3454 = vmax.xlane.f32.xlu0 %v3453_v51 }
0x154d   :  { %v3446_v28 = vadd.f32 %v3440_v55, %v8157_v8 }
0x154f   :  { %v3456_v58 = vsel %vm625_vm8, %v3446_v28, -inf }
0x1550   :  { %3457 = vmax.xlane.f32.xlu0 %v3456_v58 }
0x1558   :  { %v3424_v17 = vpop.f32.mrb[58].mxu1 }
0x1559   :  { %v3441_v34 = vmul.f32 0.25, %v3424_v17  ;;  %v6845_v62 = vpop.f32.mrb[59].mxu1 }
0x155b   :  { %v3447_v37 = vadd.f32 %v3441_v34, %v8157_v8 }
0x155c   :  { %v3429_v53 = vpop.f32.mrb[84].mxu1 }
0x155d   :  { %v3442_v44 = vmul.f32 0.25, %v3429_v53  ;;  %v6848_v15 = vpop.f32.mrb[85].mxu1  ;;  %v3459_v29 = vsel %vm625_vm8, %v3447_v37, -inf }
0x155e   :  { %3460 = vmax.xlane.f32.xlu0 %v3459_v29 }
0x155f   :  { %v3448_v39 = vadd.f32 %v3442_v44, %v8157_v8 }
0x1560   :  { %v3434_v57 = vpop.f32.mrb[86].mxu1 }
0x1561   :  { %v3443_v22 = vmul.f32 0.25, %v3434_v57  ;;  %v6851_v38 = vpop.f32.mrb[87].mxu1  ;;  %v3462_v63 = vsel %vm625_vm8, %v3448_v39, -inf }
0x1562   :  { %3463 = vmax.xlane.f32.xlu1 %v3462_v63  ;;  %v7348_v63 = vunpack.i.h.bf16 %v8993_v24 }
0x1563   :  { %v3449_v6 = vadd.f32 %v3443_v22, %v8157_v8 }
0x1565   :  { %v3465_v1 = vsel %vm625_vm8, %v3449_v6, -inf }
0x1566   :  { %3466 = vmax.xlane.f32.xlu0 %v3465_v1 }
0x1573   :  { %7350 = vrot.lane.b32.xlu1 %v8917_v36, %s7866_s22 }
0x1577   :  { %3694 = vrot.lane.b32.xlu1 %v8891_v21, %s7867_s23 }
0x157c   :  { %3704 = vrot.lane.b32.xlu0 %v8905_v4, %s7866_s22 }
0x15d5   :  { %v3452_v18 = vpop.xlane.xlu1 %3451 }
0x15d6   :  { %v3468_v10 = vsub.f32 %v3444_v60, %v3452_v18 }
0x15d8   :  { %v3474_v52 = vmul.f32 1.442695, %v3468_v10 }
0x15d9   :  { %v3455_v13 = vpop.xlane.xlu0 %3454 }
0x15da   :  { %7702 = vpow2.f32 %v3474_v52  ;;  %v3469_v47 = vsub.f32 %v3445_v41, %v3455_v13 }
0x15dc   :  { %v3476_v49 = vmul.f32 1.442695, %v3469_v47 }
0x15dd   :  { %v3458_v0 = vpop.xlane.xlu0 %3457 }
0x15de   :  { %7704 = vpow2.f32 %v3476_v49  ;;  %v3470_v41 = vsub.f32 %v3446_v28, %v3458_v0 }
0x15e0   :  { %v3478_v55 = vmul.f32 1.442695, %v3470_v41 }
0x15e4   :  { %v7703_v40 = vpop.eup %7702 }
0x15e5   :  { %v3486_v45 = vsel %vm625_vm8, %v7703_v40, 0.0 }
0x15e6   :  { %3487 = vadd.xlane.f32.xlu1 %v3486_v45 }
0x15e8   :  { %v7705_v35 = vpop.eup %7704 }
0x15e9   :  { %v3489_v42 = vsel %vm625_vm8, %v7705_v35, 0.0 }
0x15ea   :  { %3490 = vadd.xlane.f32.xlu0 %v3489_v42 }
0x15eb   :  { %v3461_v7 = vpop.xlane.xlu0 %3460 }
0x15ec   :  { %v3471_v16 = vsub.f32 %v3447_v37, %v3461_v7 }
0x15ee   :  { %v3480_v5 = vmul.f32 1.442695, %v3471_v16 }
0x15ef   :  { %v3464_v46 = vpop.xlane.xlu1 %3463 }
0x15f0   :  { %7706 = vpow2.f32 %v3480_v5  ;;  %v3472_v31 = vsub.f32 %v3448_v39, %v3464_v46 }
0x15f1   :  { %7708 = vpow2.f32 %v3478_v55 }
0x15f2   :  { %v3482_v51 = vmul.f32 1.442695, %v3472_v31 }
0x15f3   :  { %v3467_v17 = vpop.xlane.xlu0 %3466  ;;  %v7351_v29 = vpop.permute.xlu1 %7350 }
0x15f4   :  { %7710 = vpow2.f32 %v3482_v51  ;;  %v3473_v37 = vsub.f32 %v3449_v6, %v3467_v17  ;;  %v7347_v6 = vunpack.i.l.bf16 %v8993_v24  ;;  %v7353_v47 = vunpack.i.h.bf16 %v7351_v29 }
0x15f5   :  { %v7352_v49 = vunpack.i.l.bf16 %v7351_v29 }
0x15f6   :  { %v3484_v53 = vmul.f32 1.442695, %v3473_v37  ;;  %v7165_v10 = vpack.c.bf16 %v7348_v63, %v7347_v6 }
0x15f7   :  { %3696 = vrot.lane.b32.xlu1 %v8893_v50, %s7867_s23  ;;  %v3695_v39 = vpop.permute.xlu1 %3694  ;;  %v3705_v57 = vpop.permute.xlu0 %3704  ;;  %v7169_v0 = vpack.c.bf16 %v7353_v47, %v7352_v49 }
0x15f8   :  { %7712 = vpow2.f32 %v3484_v53 }
0x15fa   :  { %v7707_v60 = vpop.eup %7706 }
0x15fb   :  { %v3495_v27 = vsel %vm625_vm8, %v7707_v60, 0.0  ;;  %v9002_v58 = vpop.eup %7708 }
0x15fc   :  { %3496 = vadd.xlane.f32.xlu0 %v3495_v27  ;;  %v3492_v34 = vsel %vm625_vm8, %v9002_v58, 0.0 }
0x15fe   :  { %v9006_v62 = vpop.eup %7710 }
0x15ff   :  { %v3498_v28 = vsel %vm625_vm8, %v9006_v62, 0.0 }
0x1602   :  { %v9010_v44 = vpop.eup %7712 }
0x1603   :  { %v3501_v15 = vsel %vm625_vm8, %v9010_v44, 0.0 }
0x1612   :  { %3698 = vrot.lane.b32.xlu0 %v8905_v4, %s7867_s23 }
0x161b   :  { %3493 = vadd.xlane.f32.xlu1 %v3492_v34 }
0x161f   :  { %3499 = vadd.xlane.f32.xlu1 %v3498_v28 }
0x1630   :  { %3808 = vrot.lane.b32.xlu1 %v8923_v30, %s7866_s22 }
0x1631   :  { %3502 = vadd.xlane.f32.xlu0 %v3501_v15 }
0x1634   :  { %3800 = vrot.lane.b32.xlu1 %v8911_v3, %s7867_s23 }
0x1638   :  { %7355 = vrot.lane.b32.xlu1 %v8901_v33, %s7867_s23 }
0x163c   :  { %7360 = vrot.lane.b32.xlu1 %v8899_v56, %s7868_s24 }
0x1640   :  { %7365 = vrot.lane.b32.xlu1 %v8919_v26, %s7867_s23 }
0x1644   :  { %4088 = vrot.lane.b32.xlu1 %v8963_v25, %s7867_s23 }
0x1647   :  { %3798 = vrot.lane.b32.xlu0 %v8909_v59, %s7867_s23 }
0x164b   :  { %3802 = vrot.lane.b32.xlu0 %v8923_v30, %s7867_s23 }
0x164f   :  { %3987 = vrot.lane.b32.xlu0 %v8940_v9, %s7867_s23  ;;  %s5954_s23 = sshll.u32 %s7872_s21, 4  ;;  %s5955_s23 = int_to_ptr.vmem [resolvable:$true] %s5954_s23 }
0x1650   :  { %p7841_p1 = scmp.lt.s32.totalorder %s5955_s23, %s5955_s23 }
0x1673   :  { %v3488_v22 = vpop.xlane.xlu1 %3487 }
0x1674   :  { %7714 = vrcp.f32 %v3488_v22 }
0x1677   :  { %v3491_v38 = vpop.xlane.xlu0 %3490 }
0x1678   :  { %7716 = vrcp.f32 %v3491_v38 }
0x167e   :  { %v7715_v1 = vpop.eup %7714 }
0x167f   :  { %v3510_v18 = vmul.f32 %v7715_v1, %v7703_v40 }
0x1681   :  { %6859 = vmatmul.mubr.msk.f32.vlgmr.msra.gmra.mrb[84].mxu0 %vm625_vm8, %v3510_v18 }
0x1682   :  { %v7717_v52 = vpop.eup %7716  ;;  %7167 = vmatpush3.bf16.xpose.msk.msra.mxu0 %vm8115_vm6, %v7165_v10  ;;  %6861 = vmatprep.mubr.msk.f32.mxu0 %vm7864_vm4, %v7863_v32 }
0x1683   :  { %v3511_v13 = vmul.f32 %v7717_v52, %v7705_v35  ;;  %6886 = vmatprep.subr.mxu0 %v7863_v32  ;;  %v3697_v35 = vpop.permute.xlu1 %3696 }
0x1685   :  { %6862 = vmatmul.mubr.msk.f32.gmra.mrb[86].mxu0 %vm625_vm8, %v3511_v13 }
0x1686   :  { %6864 = vmatprep.mubr.msk.f32.mxu0 %vm7864_vm4, %v7863_v32 }
0x1689   :  { %v3497_v24 = vpop.xlane.xlu0 %3496 }
0x168a   :  { %6887 = vmatpush3.xpose.msk.msra.mxu0 %vm419_vm5, %v3705_v57  ;;  %7718 = vrcp.f32 %v3497_v24 }
0x168b   :  { %7172 = vmatprep.subr.bf16.mxu0 %v7861_v11 }
0x168d   :  { %v3699_v17 = vpop.permute.xlu0 %3698 }
0x1694   :  { %v7719_v40 = vpop.eup %7718 }
0x1695   :  { %v3513_v45 = vmul.f32 %v7719_v40, %v7707_v60 }
0x1697   :  { %6874 = vmatmul.mubr.msk.f32.vlgmr.msra.gmra.mrb[88].mxu1 %vm625_vm8, %v3513_v45 }
0x1698   :  { %7171 = vmatpush3.bf16.xpose.msk.msra.mxu1 %vm8115_vm6, %v7169_v0  ;;  %6876 = vmatprep.mubr.msk.f32.mxu1 %vm7864_vm4, %v7863_v32 }
0x1699   :  { %6901 = vmatprep.subr.mxu1 %v7863_v32 }
0x16a8   :  { %v3494_v42 = vpop.xlane.xlu1 %3493 }
0x16a9   :  { %7720 = vrcp.f32 %v3494_v42 }
0x16ac   :  { %v3500_v7 = vpop.xlane.xlu1 %3499 }
0x16ad   :  { %7722 = vrcp.f32 %v3500_v7 }
0x16b0   :  { %v3809_v16 = vpop.permute.xlu1 %3808 }
0x16b1   :  { %6902 = vmatpush3.xpose.msk.msra.mxu1 %vm419_vm5, %v3809_v16 }
0x16b2   :  { %7175 = vmatprep.subr.bf16.mxu1 %v7861_v11 }
0x16b3   :  { %v7721_v5 = vpop.eup %7720 }
0x16b4   :  { %v3801_v60 = vpop.permute.xlu1 %3800  ;;  %v3512_v27 = vmul.f32 %v7721_v5, %v9002_v58 }
0x16b6   :  { %6865 = vmatmul.mubr.msk.f32.gmra.mrb[88].mxu0 %vm625_vm8, %v3512_v27 }
0x16b7   :  { %v7723_v41 = vpop.eup %7722  ;;  %6888 = vmatprep.mubr.msk.f32.mxu0 %vm7864_vm4, %v7863_v32 }
0x16b8   :  { %v7356_v46 = vpop.permute.xlu1 %7355  ;;  %v3514_v55 = vmul.f32 %v7723_v41, %v9006_v62 }
0x16b9   :  { %v7358_v31 = vunpack.i.h.bf16 %v7356_v46  ;;  %v7357_v51 = vunpack.i.l.bf16 %v7356_v46 }
0x16ba   :  { %6877 = vmatmul.mubr.msk.f32.gmra.mrb[90].mxu1 %vm625_vm8, %v3514_v55  ;;  %6889 = vmatmul.mubr.msk.f32.vlgmr.msra.gmra.mrb[90].mxu0 %vm419_vm5, %v3695_v39 }
0x16bb   :  { %v7173_v34 = vpack.c.bf16 %v7358_v31, %v7357_v51  ;;  %6891 = vmatprep.mubr.msk.f32.mxu0 %vm7864_vm4, %v7863_v32  ;;  %6879 = vmatprep.mubr.msk.f32.mxu1 %vm7864_vm4, %v7863_v32 }
0x16bc   :  { %v9068_v62 = vpop.permute.xlu1 %7360 }
0x16bd   :  { %7174 = vmatpush3.bf16.msra.mxu0 %v7173_v34 }
0x16be   :  { %6892 = vmatmul.mubr.msk.f32.gmra.mrb[92].mxu0 %vm419_vm5, %v3697_v35  ;;  %v3503_v58 = vpop.xlane.xlu0 %3502  ;;  %6916 = vmatprep.subr.mxu0 %v7863_v32 }
0x16bf   :  { %7724 = vrcp.f32 %v3503_v58  ;;  %6894 = vmatprep.mubr.msk.f32.mxu0 %vm7864_vm4, %v7863_v32 }
0x16c0   :  { %v7366_v53 = vpop.permute.xlu1 %7365 }
0x16c1   :  { %v7368_v57 = vunpack.i.h.bf16 %v7366_v53  ;;  %v7367_v22 = vunpack.i.l.bf16 %v7366_v53 }
0x16c2   :  { %6895 = vmatmul.mubr.msk.f32.gmra.mrb[94].mxu0 %vm419_vm5, %v3699_v17  ;;  %v3799_v37 = vpop.permute.xlu0 %3798 }
0x16c3   :  { %6918 = vmatprep.mubr.msk.f32.mxu0 %vm7864_vm4, %v7863_v32  ;;  %v7176_v38 = vpack.c.bf16 %v7368_v57, %v7367_v22 }
0x16c6   :  { %v3803_v28 = vpop.permute.xlu0 %3802 }
0x16c9   :  { %v7725_v15 = vpop.eup %7724 }
0x16ca   :  { %v3988_v29 = vpop.permute.xlu0 %3987  ;;  %v3515_v39 = vmul.f32 %v7725_v15, %v9010_v44  ;;  %v4089_v44 = vpop.permute.xlu1 %4088 }
0x16cb   :  { %6917 = vmatpush3.msra.mxu0 %v3988_v29 }
0x16cc   :  { %6880 = vmatmul.mubr.msk.f32.gmra.mrb[92].mxu1 %vm625_vm8, %v3515_v39  ;;  %7178 = vmatprep.subr.bf16.mxu0 %v7861_v11 }
0x16cd   :  { %6903 = vmatprep.mubr.msk.f32.mxu1 %vm7864_vm4, %v7863_v32 }
0x16d0   :  { %6904 = vmatmul.mubr.msk.f32.vlgmr.msra.gmra.mrb[94].mxu1 %vm419_vm5, %v3799_v37 }
0x16d1   :  { %7177 = vmatpush3.bf16.msra.mxu1 %v7176_v38  ;;  %6906 = vmatprep.mubr.msk.f32.mxu1 %vm7864_vm4, %v7863_v32 }
0x16d2   :  { %6931 = vmatprep.subr.mxu1 %v7863_v32 }
0x16d4   :  { %6907 = vmatmul.mubr.msk.f32.gmra.mrb[96].mxu1 %vm419_vm5, %v3801_v60 }
0x16d5   :  { %6932 = vmatpush3.msra.mxu1 %v4089_v44  ;;  %6909 = vmatprep.mubr.msk.f32.mxu1 %vm7864_vm4, %v7863_v32 }
0x16d6   :  { %7182 = vmatprep.subr.bf16.mxu1 %v7861_v11 }
0x16d8   :  { %6910 = vmatmul.mubr.msk.f32.gmra.mrb[98].mxu1 %vm419_vm5, %v3803_v28 }
0x16d9   :  { %6933 = vmatprep.mubr.msk.f32.mxu1 %vm7864_vm4, %v7863_v32 }
0x1754   :  { %v9089_v63 = vpop.f32.mrb[84].mxu0 }
0x1755   :  { %v6860_v6 = vpop.f32.mrb[85].mxu0 }
0x1758   :  { %v9091_v1 = vpop.f32.mrb[86].mxu0 }
0x1759   :  { %v6863_v18 = vpop.f32.mrb[87].mxu0 }
0x176a   :  { %v9093_v10 = vpop.f32.mrb[88].mxu1 }
0x176b   :  { %v6875_v52 = vpop.f32.mrb[89].mxu1 }
0x1789   :  { %v9095_v13 = vpop.f32.mrb[88].mxu0 }
0x178a   :  { %v6866_v24 = vpop.f32.mrb[89].mxu0 }
0x178d   :  { %v9097_v47 = vpop.f32.mrb[90].mxu1  ;;  %v3784_v49 = vpop.f32.mrb[90].mxu0 }
0x178e   :  { %v3902_v40 = vmul.f32 0.25, %v3784_v49  ;;  %v6878_v45 = vpop.f32.mrb[91].mxu1  ;;  %v6890_v0 = vpop.f32.mrb[91].mxu0 }
0x1790   :  { %v3908_v35 = vadd.f32 %v3902_v40, %v8157_v8 }
0x1791   :  { %v3789_v42 = vpop.f32.mrb[92].mxu0 }
0x1792   :  { %v3903_v7 = vmul.f32 0.25, %v3789_v42  ;;  %v6893_v16 = vpop.f32.mrb[93].mxu0  ;;  %v3914_v5 = vsel %vm625_vm8, %v3908_v35, -inf }
0x1793   :  { %3915 = vmax.xlane.f32.xlu1 %v3914_v5 }
0x1794   :  { %v3909_v60 = vadd.f32 %v3903_v7, %v8157_v8 }
0x1795   :  { %v3794_v27 = vpop.f32.mrb[94].mxu0 }
0x1796   :  { %v3904_v41 = vmul.f32 0.25, %v3794_v27  ;;  %v6896_v46 = vpop.f32.mrb[95].mxu0  ;;  %v3917_v55 = vsel %vm625_vm8, %v3909_v60, -inf }
0x1797   :  { %3918 = vmax.xlane.f32.xlu0 %v3917_v55 }
0x1798   :  { %v3910_v31 = vadd.f32 %v3904_v41, %v8157_v8 }
0x179a   :  { %v3920_v51 = vsel %vm625_vm8, %v3910_v31, -inf }
0x179b   :  { %3921 = vmax.xlane.f32.xlu0 %v3920_v51 }
0x179f   :  { %v9105_v17 = vpop.f32.mrb[92].mxu1 }
0x17a0   :  { %v6881_v34 = vpop.f32.mrb[93].mxu1 }
0x17a3   :  { %v3888_v58 = vpop.f32.mrb[94].mxu1 }
0x17a4   :  { %v3905_v37 = vmul.f32 0.25, %v3888_v58  ;;  %v6905_v28 = vpop.f32.mrb[95].mxu1 }
0x17a6   :  { %v3911_v53 = vadd.f32 %v3905_v37, %v8157_v8 }
0x17a7   :  { %v3893_v15 = vpop.f32.mrb[96].mxu1 }
0x17a8   :  { %v3906_v29 = vmul.f32 0.25, %v3893_v15  ;;  %v6908_v39 = vpop.f32.mrb[97].mxu1  ;;  %v3923_v57 = vsel %vm625_vm8, %v3911_v53, -inf }
0x17a9   :  { %3924 = vmax.xlane.f32.xlu0 %v3923_v57 }
0x17aa   :  { %v3912_v22 = vadd.f32 %v3906_v29, %v8157_v8 }
0x17ab   :  { %v3898_v38 = vpop.f32.mrb[98].mxu1 }
0x17ac   :  { %v3907_v44 = vmul.f32 0.25, %v3898_v38  ;;  %v6911_v6 = vpop.f32.mrb[99].mxu1  ;;  %v3926_v18 = vsel %vm625_vm8, %v3912_v22, -inf }
0x17ad   :  { %3927 = vmax.xlane.f32.xlu1 %v3926_v18 }
0x17ae   :  { %v3913_v52 = vadd.f32 %v3907_v44, %v8157_v8 }
0x17b0   :  { %v3929_v24 = vsel %vm625_vm8, %v3913_v52, -inf }
0x17b1   :  { %3930 = vmax.xlane.f32.xlu0 %v3929_v24 }
0x17be   :  { %4192 = vrot.lane.b32.xlu1 %v8905_v4, %s7868_s24 }
0x17c7   :  { %4182 = vrot.lane.b32.xlu0 %v8891_v21, %s7869_s25 }
0x1820   :  { %v3916_v49 = vpop.xlane.xlu1 %3915 }
0x1821   :  { %v3932_v40 = vsub.f32 %v3908_v35, %v3916_v49 }
0x1823   :  { %v3938_v45 = vmul.f32 1.442695, %v3932_v40  ;;  %v7363_v40 = vunpack.i.h.bf16 %v9068_v62 }
0x1824   :  { %v3919_v0 = vpop.xlane.xlu0 %3918 }
0x1825   :  { %7726 = vpow2.f32 %v3938_v45  ;;  %v3933_v42 = vsub.f32 %v3909_v60, %v3919_v0  ;;  %v7362_v45 = vunpack.i.l.bf16 %v9068_v62 }
0x1827   :  { %v3940_v7 = vmul.f32 1.442695, %v3933_v42 }
0x1828   :  { %v3922_v35 = vpop.xlane.xlu0 %3921 }
0x1829   :  { %7728 = vpow2.f32 %v3940_v7  ;;  %v3934_v46 = vsub.f32 %v3910_v31, %v3922_v35  ;;  %v7179_v7 = vpack.c.bf16 %v7363_v40, %v7362_v45 }
0x182b   :  { %v3942_v60 = vmul.f32 1.442695, %v3934_v46 }
0x182d   :  { %7730 = vpow2.f32 %v3942_v60 }
0x182f   :  { %v7727_v16 = vpop.eup %7726 }
0x1830   :  { %v3950_v5 = vsel %vm625_vm8, %v7727_v16, 0.0 }
0x1831   :  { %3951 = vadd.xlane.f32.xlu1 %v3950_v5 }
0x1833   :  { %v7729_v27 = vpop.eup %7728 }
0x1834   :  { %v3953_v41 = vsel %vm625_vm8, %v7729_v27, 0.0 }
0x1835   :  { %3954 = vadd.xlane.f32.xlu0 %v3953_v41 }
0x1836   :  { %v3925_v55 = vpop.xlane.xlu0 %3924 }
0x1837   :  { %v3935_v51 = vsub.f32 %v3911_v53, %v3925_v55  ;;  %v7731_v57 = vpop.eup %7730 }
0x1838   :  { %v3956_v38 = vsel %vm625_vm8, %v7731_v57, 0.0 }
0x1839   :  { %v3944_v58 = vmul.f32 1.442695, %v3935_v51 }
0x183a   :  { %v3928_v34 = vpop.xlane.xlu1 %3927 }
0x183b   :  { %v3936_v37 = vsub.f32 %v3912_v22, %v3928_v34  ;;  %7732 = vpow2.f32 %v3944_v58 }
0x183d   :  { %v3946_v15 = vmul.f32 1.442695, %v3936_v37 }
0x183e   :  { %v3931_v28 = vpop.xlane.xlu0 %3930 }
0x183f   :  { %v3937_v29 = vsub.f32 %v3913_v52, %v3931_v28  ;;  %7734 = vpow2.f32 %v3946_v15  ;;  %v4193_v52 = vpop.permute.xlu1 %4192 }
0x1841   :  { %v3948_v39 = vmul.f32 1.442695, %v3937_v29 }
0x1842   :  { %7370 = vrot.lane.b32.xlu1 %v8917_v36, %s7868_s24  ;;  %v4183_v24 = vpop.permute.xlu0 %4182 }
0x1843   :  { %7736 = vpow2.f32 %v3948_v39 }
0x1845   :  { %v7733_v44 = vpop.eup %7732 }
0x1846   :  { %v3959_v31 = vsel %vm625_vm8, %v7733_v44, 0.0 }
0x1849   :  { %v9125_v6 = vpop.eup %7734 }
0x184a   :  { %v3962_v53 = vsel %vm625_vm8, %v9125_v6, 0.0 }
0x184b   :  { %4186 = vrot.lane.b32.xlu0 %v8905_v4, %s7869_s25 }
0x184d   :  { %v9129_v22 = vpop.eup %7736 }
0x184e   :  { %v3965_v18 = vsel %vm625_vm8, %v9129_v22, 0.0 }
0x1866   :  { %3957 = vadd.xlane.f32.xlu1 %v3956_v38 }
0x186a   :  { %3960 = vadd.xlane.f32.xlu0 %v3959_v31 }
0x186e   :  { %3963 = vadd.xlane.f32.xlu0 %v3962_v53 }
0x1872   :  { %3966 = vadd.xlane.f32.xlu0 %v3965_v18 }
0x1877   :  { %4184 = vrot.lane.b32.xlu1 %v8893_v50, %s7869_s25 }
0x187b   :  { %4296 = vrot.lane.b32.xlu1 %v8923_v30, %s7868_s24 }
0x187f   :  { %4288 = vrot.lane.b32.xlu1 %v8911_v3, %s7869_s25 }
0x1883   :  { %7375 = vrot.lane.b32.xlu1 %v8901_v33, %s7869_s25 }
0x1887   :  { %7380 = vrot.lane.b32.xlu1 %v8899_v56, %s7870_s26 }
0x1888   :  { %4286 = vrot.lane.b32.xlu0 %v8909_v59, %s7869_s25 }
0x188b   :  { %7385 = vrot.lane.b32.xlu1 %v8919_v26, %s7869_s25 }
0x188c   :  { %4290 = vrot.lane.b32.xlu0 %v8923_v30, %s7869_s25 }
0x188f   :  { %4570 = vrot.lane.b32.xlu1 %v8963_v25, %s7869_s25 }
0x1890   :  { %4472 = vrot.lane.b32.xlu0 %v8940_v9, %s7869_s25  ;;  %s7836_s25 = scalar_lea.vmem %s5955_s23, 32 }
0x1891   :  { %p7837_p0 = scmp.ne.s32.totalorder %s5955_s23, %s7836_s25  ;;  %p7842_p2 = scmp.lt.s32.totalorder %s7836_s25, %s7836_s25 }
0x1893   :  { %p7843_p3 = por %p7842_p2, %p7841_p1 }
0x1895   :  { %p7844_p4 = pnand %p7843_p3, %p7837_p0 }
0x18be   :  { %v3952_v49 = vpop.xlane.xlu1 %3951 }
0x18bf   :  { %7738 = vrcp.f32 %v3952_v49 }
0x18c2   :  { %v3955_v56 = vpop.xlane.xlu0 %3954  ;;  %v7371_v62 = vpop.permute.xlu1 %7370 }
0x18c3   :  { %7740 = vrcp.f32 %v3955_v56  ;;  %v7373_v28 = vunpack.i.h.bf16 %v7371_v62  ;;  %v7372_v15 = vunpack.i.l.bf16 %v7371_v62 }
0x18c5   :  { %v7183_v53 = vpack.c.bf16 %v7373_v28, %v7372_v15 }
0x18c9   :  { %v7739_v0 = vpop.eup %7738 }
0x18ca   :  { %v3974_v42 = vmul.f32 %v7739_v0, %v7727_v16  ;;  %v4187_v16 = vpop.permute.xlu0 %4186 }
0x18cc   :  { %6919 = vmatmul.mubr.msk.f32.vlgmr.msra.gmra.mrb[96].mxu0 %vm625_vm8, %v3974_v42 }
0x18cd   :  { %v7741_v5 = vpop.eup %7740  ;;  %7181 = vmatpush3.bf16.xpose.msk.msra.mxu0 %vm8115_vm6, %v7179_v7  ;;  %6921 = vmatprep.mubr.msk.f32.mxu0 %vm7864_vm4, %v7863_v32 }
0x18ce   :  { %v3975_v41 = vmul.f32 %v7741_v5, %v7729_v27  ;;  %6946 = vmatprep.subr.mxu0 %v7863_v32 }
0x18d0   :  { %6922 = vmatmul.mubr.msk.f32.gmra.mrb[98].mxu0 %vm625_vm8, %v3975_v41 }
0x18d1   :  { %6924 = vmatprep.mubr.msk.f32.mxu0 %vm7864_vm4, %v7863_v32 }
0x18d5   :  { %6947 = vmatpush3.xpose.msk.msra.mxu0 %vm419_vm5, %v4193_v52 }
0x18d6   :  { %7186 = vmatprep.subr.bf16.mxu0 %v7861_v11 }
0x18f3   :  { %v3958_v35 = vpop.xlane.xlu1 %3957 }
0x18f4   :  { %7742 = vrcp.f32 %v3958_v35 }
0x18f7   :  { %v4185_v46 = vpop.permute.xlu1 %4184  ;;  %v3961_v55 = vpop.xlane.xlu0 %3960 }
0x18f8   :  { %7744 = vrcp.f32 %v3961_v55 }
0x18fb   :  { %v4297_v60 = vpop.permute.xlu1 %4296  ;;  %v3964_v27 = vpop.xlane.xlu0 %3963 }
0x18fc   :  { %7746 = vrcp.f32 %v3964_v27 }
0x18fe   :  { %v7743_v51 = vpop.eup %7742 }
0x18ff   :  { %v4289_v34 = vpop.permute.xlu1 %4288  ;;  %v3967_v58 = vpop.xlane.xlu0 %3966  ;;  %v3976_v37 = vmul.f32 %v7743_v51, %v7731_v57 }
0x1900   :  { %7748 = vrcp.f32 %v3967_v58 }
0x1901   :  { %6925 = vmatmul.mubr.msk.f32.gmra.mrb[100].mxu0 %vm625_vm8, %v3976_v37 }
0x1902   :  { %v7745_v29 = vpop.eup %7744  ;;  %6948 = vmatprep.mubr.msk.f32.mxu0 %vm7864_vm4, %v7863_v32 }
0x1903   :  { %v3977_v39 = vmul.f32 %v7745_v29, %v7733_v44  ;;  %v7376_v38 = vpop.permute.xlu1 %7375  ;;  %v4287_v31 = vpop.permute.xlu0 %4286 }
0x1904   :  { %v7378_v18 = vunpack.i.h.bf16 %v7376_v38  ;;  %v7377_v52 = vunpack.i.l.bf16 %v7376_v38 }
0x1905   :  { %6934 = vmatmul.mubr.msk.f32.vlgmr.msra.gmra.mrb[100].mxu1 %vm625_vm8, %v3977_v39  ;;  %6949 = vmatmul.mubr.msk.f32.vlgmr.msra.gmra.mrb[102].mxu0 %vm419_vm5, %v4183_v24 }
0x1906   :  { %v7747_v57 = vpop.eup %7746  ;;  %v7187_v49 = vpack.c.bf16 %v7378_v18, %v7377_v52  ;;  %7185 = vmatpush3.bf16.xpose.msk.msra.mxu1 %vm8115_vm6, %v7183_v53  ;;  %6936 = vmatprep.mubr.msk.f32.mxu1 %vm7864_vm4, %v7863_v32 }
0x1907   :  { %v9175_v56 = vpop.permute.xlu1 %7380  ;;  %v4291_v44 = vpop.permute.xlu0 %4290  ;;  %6951 = vmatprep.mubr.msk.f32.mxu0 %vm7864_vm4, %v7863_v32  ;;  %v3978_v40 = vmul.f32 %v7747_v57, %v9125_v6  ;;  %6961 = vmatprep.subr.mxu1 %v7863_v32 }
0x1908   :  { %7188 = vmatpush3.bf16.msra.mxu0 %v7187_v49 }
0x1909   :  { %6937 = vmatmul.mubr.msk.f32.gmra.mrb[102].mxu1 %vm625_vm8, %v3978_v40  ;;  %6952 = vmatmul.mubr.msk.f32.gmra.mrb[104].mxu0 %vm419_vm5, %v4185_v46 }
0x190a   :  { %v7749_v24 = vpop.eup %7748  ;;  %6976 = vmatprep.subr.mxu0 %v7863_v32  ;;  %6939 = vmatprep.mubr.msk.f32.mxu1 %vm7864_vm4, %v7863_v32 }
0x190b   :  { %v7386_v45 = vpop.permute.xlu1 %7385  ;;  %v4473_v0 = vpop.permute.xlu0 %4472  ;;  %6954 = vmatprep.mubr.msk.f32.mxu0 %vm7864_vm4, %v7863_v32  ;;  %v3979_v6 = vmul.f32 %v7749_v24, %v9129_v22 }
0x190c   :  { %v7388_v42 = vunpack.i.h.bf16 %v7386_v45  ;;  %v7387_v7 = vunpack.i.l.bf16 %v7386_v45  ;;  %6977 = vmatpush3.msra.mxu0 %v4473_v0 }
0x190d   :  { %6940 = vmatmul.mubr.msk.f32.gmra.mrb[104].mxu1 %vm625_vm8, %v3979_v6  ;;  %6955 = vmatmul.mubr.msk.f32.gmra.mrb[106].mxu0 %vm419_vm5, %v4187_v16 }
0x190e   :  { %v7190_v5 = vpack.c.bf16 %v7388_v42, %v7387_v7  ;;  %6962 = vmatpush3.xpose.msk.msra.mxu1 %vm419_vm5, %v4297_v60  ;;  %6963 = vmatprep.mubr.msk.f32.mxu1 %vm7864_vm4, %v7863_v32 }
0x190f   :  { %7189 = vmatprep.subr.bf16.mxu1 %v7861_v11  ;;  %6978 = vmatprep.mubr.msk.f32.mxu0 %vm7864_vm4, %v7863_v32  ;;  %v4571_v22 = vpop.permute.xlu1 %4570 }
0x1910   :  { %7192 = vmatprep.subr.bf16.mxu0 %v7861_v11 }
0x1911   :  { %6964 = vmatmul.mubr.msk.f32.vlgmr.msra.gmra.mrb[106].mxu1 %vm419_vm5, %v4287_v31 }
0x1912   :  { %7191 = vmatpush3.bf16.msra.mxu1 %v7190_v5  ;;  %6966 = vmatprep.mubr.msk.f32.mxu1 %vm7864_vm4, %v7863_v32 }
0x1913   :  { %6991 = vmatprep.subr.mxu1 %v7863_v32 }
0x1915   :  { %6967 = vmatmul.mubr.msk.f32.gmra.mrb[108].mxu1 %vm419_vm5, %v4289_v34 }
0x1916   :  { %6992 = vmatpush3.msra.mxu1 %v4571_v22  ;;  %6969 = vmatprep.mubr.msk.f32.mxu1 %vm7864_vm4, %v7863_v32 }
0x1917   :  { %7196 = vmatprep.subr.bf16.mxu1 %v7861_v11 }
0x1919   :  { %6970 = vmatmul.mubr.msk.f32.gmra.mrb[110].mxu1 %vm419_vm5, %v4291_v44 }
0x191a   :  { %6993 = vmatprep.mubr.msk.f32.mxu1 %vm7864_vm4, %v7863_v32 }
0x199f   :  { %v9209_v41 = vpop.f32.mrb[96].mxu0 }
0x19a0   :  { %v6920_v62 = vpop.f32.mrb[97].mxu0 }
0x19a3   :  { %v9211_v16 = vpop.f32.mrb[98].mxu0 }
0x19a4   :  { %v7404_v35 = vpack.i.bf16 %v9211_v16, %v9209_v41  ;;  %v6923_v46 = vpop.f32.mrb[99].mxu0 }
0x19d4   :  { %v9215_v55 = vpop.f32.mrb[100].mxu0 }
0x19d5   :  { %v6926_v60 = vpop.f32.mrb[101].mxu0 }
0x19d8   :  { %v9217_v27 = vpop.f32.mrb[100].mxu1  ;;  %v4272_v51 = vpop.f32.mrb[102].mxu0 }
0x19d9   :  { %v7419_v34 = vpack.i.bf16 %v9217_v27, %v9215_v55  ;;  %v4390_v58 = vmul.f32 0.25, %v4272_v51  ;;  %v6935_v37 = vpop.f32.mrb[101].mxu1  ;;  %v6950_v28 = vpop.f32.mrb[103].mxu0 }
0x19db   :  { %v4396_v15 = vadd.f32 %v4390_v58, %v8157_v8 }
0x19dc   :  { %v9222_v29 = vpop.f32.mrb[102].mxu1  ;;  %v4277_v39 = vpop.f32.mrb[104].mxu0 }
0x19dd   :  { %v4391_v38 = vmul.f32 0.25, %v4277_v39  ;;  %v6938_v31 = vpop.f32.mrb[103].mxu1  ;;  %v6953_v53 = vpop.f32.mrb[105].mxu0  ;;  %v4402_v18 = vsel %vm625_vm8, %v4396_v15, -inf }
0x19de   :  { %4403 = vmax.xlane.f32.xlu1 %v4402_v18 }
0x19df   :  { %v4397_v52 = vadd.f32 %v4391_v38, %v8157_v8 }
0x19e0   :  { %v9226_v57 = vpop.f32.mrb[104].mxu1  ;;  %v4282_v49 = vpop.f32.mrb[106].mxu0 }
0x19e1   :  { %v7434_v44 = vpack.i.bf16 %v9226_v57, %v9222_v29  ;;  %v4392_v40 = vmul.f32 0.25, %v4282_v49  ;;  %v6941_v24 = vpop.f32.mrb[105].mxu1  ;;  %v6956_v45 = vpop.f32.mrb[107].mxu0  ;;  %v4405_v0 = vsel %vm625_vm8, %v4397_v52, -inf  ;;  %v7520_v29 = vld [vmem:[%s9680_s5 + $0x60] ss:$8 sps:$4 sm:$0xff]  }
0x19e2   :  { %4406 = vmax.xlane.f32.xlu0 %v4405_v0  ;;  %v7525_v57 = vld [vmem:[%s9680_s5 + $0x74] ss:$8 sps:$4 sm:$0xff]  }
0x19e3   :  { %v4398_v6 = vadd.f32 %v4392_v40, %v8157_v8 }
0x19e4   :  { %v4376_v42 = vpop.f32.mrb[106].mxu1 }
0x19e5   :  { %v4393_v7 = vmul.f32 0.25, %v4376_v42  ;;  %v6965_v5 = vpop.f32.mrb[107].mxu1  ;;  %v4408_v22 = vsel %vm625_vm8, %v4398_v6, -inf }
0x19e6   :  { %4409 = vmax.xlane.f32.xlu0 %v4408_v22 }
0x19e7   :  { %v4399_v62 = vadd.f32 %v4393_v7, %v8157_v8 }
0x19e8   :  { %v4381_v46 = vpop.f32.mrb[108].mxu1 }
0x19e9   :  { %v4394_v60 = vmul.f32 0.25, %v4381_v46  ;;  %v6968_v51 = vpop.f32.mrb[109].mxu1  ;;  %v4411_v58 = vsel %vm625_vm8, %v4399_v62, -inf }
0x19ea   :  { %4412 = vmax.xlane.f32.xlu0 %v4411_v58 }
0x19eb   :  { %v4400_v37 = vadd.f32 %v4394_v60, %v8157_v8 }
0x19ec   :  { %v4386_v28 = vpop.f32.mrb[110].mxu1 }
0x19ed   :  { %v4395_v39 = vmul.f32 0.25, %v4386_v28  ;;  %v6971_v38 = vpop.f32.mrb[111].mxu1  ;;  %v4414_v31 = vsel %vm625_vm8, %v4400_v37, -inf }
0x19ee   :  { %4415 = vmax.xlane.f32.xlu1 %v4414_v31 }
0x19ef   :  { %v4401_v53 = vadd.f32 %v4395_v39, %v8157_v8 }
0x19f1   :  { %v4417_v18 = vsel %vm625_vm8, %v4401_v53, -inf }
0x19f2   :  { %4418 = vmax.xlane.f32.xlu0 %v4417_v18 }
0x19ff   :  { %4674 = vrot.lane.b32.xlu1 %v8905_v4, %s7870_s26 }
0x1a08   :  { %4664 = vrot.lane.b32.xlu0 %v8891_v21, %s7871_s27 }
0x1a6b   :  { %v4404_v49 = vpop.xlane.xlu1 %4403 }
0x1a6c   :  { %v4420_v40 = vsub.f32 %v4396_v15, %v4404_v49 }
0x1a6e   :  { %v4426_v24 = vmul.f32 1.442695, %v4420_v40 }
0x1a6f   :  { %v4407_v45 = vpop.xlane.xlu0 %4406 }
0x1a70   :  { %7750 = vpow2.f32 %v4426_v24  ;;  %v4421_v0 = vsub.f32 %v4397_v52, %v4407_v45 }
0x1a72   :  { %v4428_v42 = vmul.f32 1.442695, %v4421_v0 }
0x1a73   :  { %v4410_v21 = vpop.xlane.xlu0 %4409 }
0x1a74   :  { %7752 = vpow2.f32 %v4428_v42  ;;  %v4422_v15 = vsub.f32 %v4398_v6, %v4410_v21  ;;  %v7383_v21 = vunpack.i.h.bf16 %v9175_v56 }
0x1a76   :  { %v4430_v52 = vmul.f32 1.442695, %v4422_v15  ;;  %v7382_v15 = vunpack.i.l.bf16 %v9175_v56 }
0x1a77   :  { %v4413_v60 = vpop.xlane.xlu0 %4412 }
0x1a78   :  { %v4423_v51 = vsub.f32 %v4399_v62, %v4413_v60  ;;  %7754 = vpow2.f32 %v4430_v52 }
0x1a7a   :  { %v7751_v7 = vpop.eup %7750  ;;  %v4432_v28 = vmul.f32 1.442695, %v4423_v51  ;;  %v7193_v51 = vpack.c.bf16 %v7383_v21, %v7382_v15 }
0x1a7b   :  { %v4438_v5 = vsel %vm625_vm8, %v7751_v7, 0.0  ;;  %v4416_v58 = vpop.xlane.xlu1 %4415 }
0x1a7c   :  { %4439 = vadd.xlane.f32.xlu1 %v4438_v5  ;;  %v4424_v39 = vsub.f32 %v4400_v37, %v4416_v58  ;;  %7756 = vpow2.f32 %v4432_v28 }
0x1a7e   :  { %v7753_v22 = vpop.eup %7752  ;;  %v4434_v31 = vmul.f32 1.442695, %v4424_v39 }
0x1a7f   :  { %v4441_v46 = vsel %vm625_vm8, %v7753_v22, 0.0  ;;  %v4419_v38 = vpop.xlane.xlu0 %4418 }
0x1a80   :  { %4442 = vadd.xlane.f32.xlu0 %v4441_v46  ;;  %v4425_v18 = vsub.f32 %v4401_v53, %v4419_v38  ;;  %7758 = vpow2.f32 %v4434_v31  ;;  %v4675_v53 = vpop.permute.xlu1 %4674 }
0x1a82   :  { %v4436_v49 = vmul.f32 1.442695, %v4425_v18  ;;  %v7755_v40 = vpop.eup %7754 }
0x1a83   :  { %v4665_v42 = vpop.permute.xlu0 %4664 }
0x1a84   :  { %7760 = vpow2.f32 %v4436_v49 }
0x1a86   :  { %v7757_v24 = vpop.eup %7756 }
0x1a87   :  { %v4447_v6 = vsel %vm625_vm8, %v7757_v24, 0.0 }
0x1a8a   :  { %v7759_v45 = vpop.eup %7758 }
0x1a8b   :  { %v4450_v62 = vsel %vm625_vm8, %v7759_v45, 0.0 }
0x1a8d   :  { %7390 = vrot.lane.b32.xlu1 %v8917_v36, %s7870_s26  ;;  %v4444_v36 = vsel %vm625_vm8, %v7755_v40, 0.0 }
0x1a8e   :  { %v7761_v0 = vpop.eup %7760 }
0x1a8f   :  { %v4453_v37 = vsel %vm625_vm8, %v7761_v0, 0.0 }
0x1a96   :  { %4778 = vrot.lane.b32.xlu0 %v8923_v30, %s7870_s26 }
0x1ab1   :  { %4445 = vadd.xlane.f32.xlu1 %v4444_v36 }
0x1ab5   :  { %4448 = vadd.xlane.f32.xlu0 %v4447_v6 }
0x1ab9   :  { %4451 = vadd.xlane.f32.xlu0 %v4450_v62 }
0x1abd   :  { %4454 = vadd.xlane.f32.xlu0 %v4453_v37 }
0x1ac2   :  { %4666 = vrot.lane.b32.xlu1 %v8893_v50, %s7871_s27 }
0x1ac6   :  { %4668 = vrot.lane.b32.xlu1 %v8905_v4, %s7871_s27 }
0x1ad3   :  { %4768 = vrot.lane.b32.xlu0 %v8909_v59, %s7871_s27 }
0x1b09   :  { %v4440_v5 = vpop.xlane.xlu1 %4439 }
0x1b0a   :  { %7762 = vrcp.f32 %v4440_v5 }
0x1b0d   :  { %v4443_v46 = vpop.xlane.xlu0 %4442  ;;  %v7391_v59 = vpop.permute.xlu1 %7390 }
0x1b0e   :  { %7764 = vrcp.f32 %v4443_v46  ;;  %v7393_v31 = vunpack.i.h.bf16 %v7391_v59  ;;  %v7392_v18 = vunpack.i.l.bf16 %v7391_v59 }
0x1b10   :  { %v7197_v6 = vpack.c.bf16 %v7393_v31, %v7392_v18 }
0x1b11   :  { %v4779_v56 = vpop.permute.xlu0 %4778 }
0x1b14   :  { %v7763_v60 = vpop.eup %7762 }
0x1b15   :  { %v4462_v52 = vmul.f32 %v7763_v60, %v7751_v7 }
0x1b17   :  { %6979 = vmatmul.mubr.msk.f32.vlgmr.msra.gmra.mrb[108].mxu0 %vm625_vm8, %v4462_v52 }
0x1b18   :  { %v7765_v50 = vpop.eup %7764  ;;  %7195 = vmatpush3.bf16.xpose.msk.msra.mxu0 %vm8115_vm6, %v7193_v51  ;;  %6981 = vmatprep.mubr.msk.f32.mxu0 %vm7864_vm4, %v7863_v32 }
0x1b19   :  { %v4463_v4 = vmul.f32 %v7765_v50, %v7753_v22  ;;  %7006 = vmatprep.subr.mxu0 %v7863_v32 }
0x1b1b   :  { %6982 = vmatmul.mubr.msk.f32.gmra.mrb[110].mxu0 %vm625_vm8, %v4463_v4 }
0x1b1c   :  { %6984 = vmatprep.mubr.msk.f32.mxu0 %vm7864_vm4, %v7863_v32 }
0x1b20   :  { %7007 = vmatpush3.xpose.msk.msra.mxu0 %vm419_vm5, %v4675_v53 }
0x1b21   :  { %7200 = vmatprep.subr.bf16.mxu0 %v7861_v11 }
0x1b3e   :  { %v4446_v7 = vpop.xlane.xlu1 %4445 }
0x1b3f   :  { %7766 = vrcp.f32 %v4446_v7 }
0x1b42   :  { %v4449_v58 = vpop.xlane.xlu0 %4448  ;;  %v4667_v37 = vpop.permute.xlu1 %4666 }
0x1b43   :  { %7768 = vrcp.f32 %v4449_v58 }
0x1b46   :  { %v4452_v28 = vpop.xlane.xlu0 %4451  ;;  %v4669_v53 = vpop.permute.xlu1 %4668 }
0x1b47   :  { %7770 = vrcp.f32 %v4452_v28 }
0x1b49   :  { %v7767_v22 = vpop.eup %7766 }
0x1b4a   :  { %v4455_v39 = vpop.xlane.xlu0 %4454  ;;  %v4464_v38 = vmul.f32 %v7767_v22, %v7755_v40 }
0x1b4b   :  { %7772 = vrcp.f32 %v4455_v39 }
0x1b4c   :  { %6985 = vmatmul.mubr.msk.f32.gmra.mrb[112].mxu0 %vm625_vm8, %v4464_v38 }
0x1b4d   :  { %v7769_v49 = vpop.eup %7768  ;;  %7008 = vmatprep.mubr.msk.f32.mxu0 %vm7864_vm4, %v7863_v32 }
0x1b4e   :  { %v4465_v36 = vmul.f32 %v7769_v49, %v7757_v24 }
0x1b50   :  { %6994 = vmatmul.mubr.msk.f32.vlgmr.msra.gmra.mrb[112].mxu1 %vm625_vm8, %v4465_v36  ;;  %7009 = vmatmul.mubr.msk.f32.vlgmr.msra.gmra.mrb[114].mxu0 %vm419_vm5, %v4665_v42 }
0x1b51   :  { %v7771_v62 = vpop.eup %7770  ;;  %7199 = vmatpush3.bf16.xpose.msk.msra.mxu1 %vm8115_vm6, %v7197_v6  ;;  %6996 = vmatprep.mubr.msk.f32.mxu1 %vm7864_vm4, %v7863_v32 }
0x1b52   :  { %7011 = vmatprep.mubr.msk.f32.mxu0 %vm7864_vm4, %v7863_v32  ;;  %v4466_v40 = vmul.f32 %v7771_v62, %v7759_v45  ;;  %7021 = vmatprep.subr.mxu1 %v7863_v32  ;;  %v4769_v45 = vpop.permute.xlu0 %4768 }
0x1b54   :  { %6997 = vmatmul.mubr.msk.f32.gmra.mrb[114].mxu1 %vm625_vm8, %v4466_v40  ;;  %7012 = vmatmul.mubr.msk.f32.gmra.mrb[116].mxu0 %vm419_vm5, %v4667_v37 }
0x1b55   :  { %v7773_v24 = vpop.eup %7772  ;;  %6999 = vmatprep.mubr.msk.f32.mxu1 %vm7864_vm4, %v7863_v32  ;;  %7014 = vmatprep.mubr.msk.f32.mxu0 %vm7864_vm4, %v7863_v32 }
0x1b56   :  { %v4467_v61 = vmul.f32 %v7773_v24, %v7761_v0 }
0x1b58   :  { %7000 = vmatmul.mubr.msk.f32.gmra.mrb[116].mxu1 %vm625_vm8, %v4467_v61  ;;  %7015 = vmatmul.mubr.msk.f32.gmra.mrb[118].mxu0 %vm419_vm5, %v4669_v53 }
0x1b59   :  { %7022 = vmatpush3.xpose.msk.msra.mxu1 %vm419_vm5, %v4779_v56  ;;  %7023 = vmatprep.mubr.msk.f32.mxu1 %vm7864_vm4, %v7863_v32 }
0x1b5a   :  { %7203 = vmatprep.subr.bf16.mxu1 %v7861_v11  ;;  %7038 = vmatprep.mubr.msk.f32.mxu0 %vm7864_vm4, %v7863_v32 }
0x1b5c   :  { %7024 = vmatmul.mubr.msk.f32.vlgmr.msra.gmra.mrb[118].mxu1 %vm419_vm5, %v4769_v45 }
0x1b5d   :  { %7026 = vmatprep.mubr.msk.f32.mxu1 %vm7864_vm4, %v7863_v32 }
0x1bea   :  { %v9301_v0 = vpop.f32.mrb[108].mxu0 }
0x1beb   :  { %v6980_v42 = vpop.f32.mrb[109].mxu0 }
0x1bee   :  { %v9303_v5 = vpop.f32.mrb[110].mxu0 }
0x1bef   :  { %v7409_v46 = vpack.i.bf16 %v9303_v5, %v9301_v0  ;;  %v6983_v21 = vpop.f32.mrb[111].mxu0 }
0x1c1f   :  { %v9307_v15 = vpop.f32.mrb[112].mxu0 }
0x1c20   :  { %v6986_v11 = vpop.f32.mrb[113].mxu0 }
0x1c23   :  { %v9309_v60 = vpop.f32.mrb[112].mxu1  ;;  %v4754_v52 = vpop.f32.mrb[114].mxu0 }
0x1c24   :  { %v7424_v51 = vpack.i.bf16 %v9309_v60, %v9307_v15  ;;  %v4872_v50 = vmul.f32 0.25, %v4754_v52  ;;  %v6995_v4 = vpop.f32.mrb[113].mxu1  ;;  %v7010_v59 = vpop.f32.mrb[115].mxu0 }
0x1c26   :  { %v4878_v56 = vadd.f32 %v4872_v50, %v8157_v8 }
0x1c27   :  { %v9314_v7 = vpop.f32.mrb[114].mxu1  ;;  %v4759_v58 = vpop.f32.mrb[116].mxu0 }
0x1c28   :  { %v4873_v28 = vmul.f32 0.25, %v4759_v58  ;;  %v6998_v22 = vpop.f32.mrb[115].mxu1  ;;  %v7013_v39 = vpop.f32.mrb[117].mxu0  ;;  %v4884_v38 = vsel %vm625_vm8, %v4878_v56, -inf }
0x1c29   :  { %4885 = vmax.xlane.f32.xlu1 %v4884_v38 }
0x1c2a   :  { %v4879_v31 = vadd.f32 %v4873_v28, %v8157_v8 }
0x1c2b   :  { %v9318_v18 = vpop.f32.mrb[116].mxu1  ;;  %v4764_v49 = vpop.f32.mrb[118].mxu0 }
0x1c2c   :  { %v7439_v36 = vpack.i.bf16 %v9318_v18, %v9314_v7  ;;  %v4874_v6 = vmul.f32 0.25, %v4764_v49  ;;  %v7001_v62 = vpop.f32.mrb[117].mxu1  ;;  %v7016_v37 = vpop.f32.mrb[119].mxu0  ;;  %v4887_v40 = vsel %vm625_vm8, %v4879_v31, -inf  ;;  %v7526_v7 = vld [vmem:[%s9681_s6 + $0xc0] sm:$0xff]  }
0x1c2d   :  { %4888 = vmax.xlane.f32.xlu0 %v4887_v40  ;;  %v7527_v18 = vld [vmem:[%s9681_s6 + $0x80] sm:$0xff]  }
0x1c2e   :  { %v4880_v24 = vadd.f32 %v4874_v6, %v8157_v8 }
0x1c2f   :  { %v4858_v61 = vpop.f32.mrb[118].mxu1 }
0x1c30   :  { %v4875_v53 = vmul.f32 0.25, %v4858_v61  ;;  %v7025_v45 = vpop.f32.mrb[119].mxu1  ;;  %v4890_v42 = vsel %vm625_vm8, %v4880_v24, -inf }
0x1c31   :  { %4891 = vmax.xlane.f32.xlu0 %v4890_v42 }
0x1c32   :  { %v4881_v21 = vadd.f32 %v4875_v53, %v8157_v8 }
0x1c34   :  { %v4893_v11 = vsel %vm625_vm8, %v4881_v21, -inf }
0x1c35   :  { %4894 = vmax.xlane.f32.xlu0 %v4893_v11 }
0x1c3a   :  { %7395 = vrot.lane.b32.xlu1 %v8901_v33, %s7871_s27 }
0x1c3e   :  { %4770 = vrot.lane.b32.xlu1 %v8911_v3, %s7871_s27 }
0x1c42   :  { %7400 = vrot.lane.b32.xlu1 %v8919_v26, %s7871_s27 }
0x1c4b   :  { %4954 = vrot.lane.b32.xlu0 %v8940_v9, %s7871_s27 }
0x1cb6   :  { %v4886_v52 = vpop.xlane.xlu1 %4885 }
0x1cb7   :  { %v4902_v50 = vsub.f32 %v4878_v56, %v4886_v52 }
0x1cb9   :  { %v4908_v4 = vmul.f32 1.442695, %v4902_v50 }
0x1cba   :  { %v7396_v59 = vpop.permute.xlu1 %7395  ;;  %v4889_v58 = vpop.xlane.xlu0 %4888 }
0x1cbb   :  { %7774 = vpow2.f32 %v4908_v4  ;;  %v7398_v28 = vunpack.i.h.bf16 %v7396_v59  ;;  %v7397_v22 = vunpack.i.l.bf16 %v7396_v59  ;;  %v4903_v39 = vsub.f32 %v4879_v31, %v4889_v58 }
0x1cbd   :  { %v7201_v38 = vpack.c.bf16 %v7398_v28, %v7397_v22  ;;  %v4910_v33 = vmul.f32 1.442695, %v4903_v39 }
0x1cbe   :  { %v4771_v49 = vpop.permute.xlu1 %4770  ;;  %v4892_v6 = vpop.xlane.xlu0 %4891 }
0x1cbf   :  { %7776 = vpow2.f32 %v4910_v33  ;;  %v4904_v3 = vsub.f32 %v4880_v24, %v4892_v6  ;;  %7027 = vmatmul.mubr.msk.f32.gmra.mrb[120].mxu1 %vm419_vm5, %v4771_v49  ;;  %7202 = vmatpush3.bf16.msra.mxu0 %v7201_v38  ;;  %v7510_v38 = vld [vmem:[%s9679_s4 + $0x20] sm:$0xff]   ;;  %v7511_v33 = vld [vmem:[%s9679_s4 + $0x28] sm:$0xff]   ;;  %v7512_v49 = vld [vmem:[%s9679_s4 + $0x30] sm:$0xff]  }
0x1cc0   :  { %7036 = vmatprep.subr.mxu0 %v7863_v32  ;;  %7029 = vmatprep.mubr.msk.f32.mxu1 %vm7864_vm4, %v7863_v32  ;;  %v7513_v6 = vld [vmem:[%s9679_s4 + $0x38] sm:$0xff]  }
0x1cc1   :  { %v4912_v26 = vmul.f32 1.442695, %v4904_v3 }
0x1cc2   :  { %v7401_v9 = vpop.permute.xlu1 %7400  ;;  %v4895_v56 = vpop.xlane.xlu0 %4894 }
0x1cc3   :  { %7778 = vpow2.f32 %v4912_v26  ;;  %v7403_v62 = vunpack.i.h.bf16 %v7401_v9  ;;  %v7402_v31 = vunpack.i.l.bf16 %v7401_v9  ;;  %v4905_v37 = vsub.f32 %v4881_v21, %v4895_v56 }
0x1cc5   :  { %v7775_v40 = vpop.eup %7774  ;;  %v7204_v61 = vpack.c.bf16 %v7403_v62, %v7402_v31  ;;  %v4914_v53 = vmul.f32 1.442695, %v4905_v37 }
0x1cc6   :  { %v4955_v45 = vpop.permute.xlu0 %4954  ;;  %v4920_v24 = vsel %vm625_vm8, %v7775_v40, 0.0 }
0x1cc7   :  { %7780 = vpow2.f32 %v4914_v53  ;;  %4921 = vadd.xlane.f32.xlu1 %v4920_v24  ;;  %7037 = vmatpush3.msra.mxu0 %v4955_v45 }
0x1cc8   :  { %7205 = vmatpush3.bf16.msra.mxu1 %v7204_v61  ;;  %7062 = vmatprep.subr.bf16.mxu0 %v7863_v32 }
0x1cc9   :  { %v7777_v42 = vpop.eup %7776  ;;  %7051 = vmatprep.subr.mxu1 %v7863_v32 }
0x1cca   :  { %v4923_v11 = vsel %vm625_vm8, %v7777_v42, 0.0 }
0x1ccb   :  { %4924 = vadd.xlane.f32.xlu0 %v4923_v11 }
0x1ccd   :  { %v7779_v52 = vpop.eup %7778 }
0x1cce   :  { %v4926_v21 = vsel %vm625_vm8, %v7779_v52, 0.0 }
0x1ccf   :  { %4927 = vadd.xlane.f32.xlu1 %v4926_v21 }
0x1cd1   :  { %v7781_v50 = vpop.eup %7780 }
0x1cd2   :  { %v4929_v4 = vsel %vm625_vm8, %v7781_v50, 0.0 }
0x1cd3   :  { %4930 = vadd.xlane.f32.xlu0 %v4929_v4 }
0x1ce0   :  { %4772 = vrot.lane.b32.xlu1 %v8923_v30, %s7871_s27 }
0x1ce4   :  { %7405 = vrot.lane.b32.xlu1 %v7404_v35, %s7870_s26 }
0x1ce9   :  { %5052 = vrot.lane.b32.xlu0 %v8963_v25, %s7871_s27 }
0x1ced   :  { %7410 = vrot.lane.b32.xlu0 %v7409_v46, %s7868_s24 }
0x1cf1   :  { %7420 = vrot.lane.b32.xlu0 %v7419_v34, %s7870_s26 }
0x1d54   :  { %v4922_v59 = vpop.xlane.xlu1 %4921 }
0x1d55   :  { %7782 = vrcp.f32 %v4922_v59 }
0x1d58   :  { %v4925_v30 = vpop.xlane.xlu0 %4924 }
0x1d59   :  { %7784 = vrcp.f32 %v4925_v30 }
0x1d5c   :  { %v4928_v58 = vpop.xlane.xlu1 %4927 }
0x1d5d   :  { %7786 = vrcp.f32 %v4928_v58 }
0x1d5f   :  { %v7783_v41 = vpop.eup %7782 }
0x1d60   :  { %v4944_v16 = vmul.f32 %v7783_v41, %v7775_v40  ;;  %v4773_v35 = vpop.permute.xlu1 %4772  ;;  %v4931_v25 = vpop.xlane.xlu0 %4930 }
0x1d61   :  { %7788 = vrcp.f32 %v4931_v25  ;;  %7030 = vmatmul.mubr.msk.f32.gmra.mrb[122].mxu1 %vm419_vm5, %v4773_v35 }
0x1d62   :  { %7039 = vmatmul.mubr.msk.f32.vlgmr.msra.gmra.mrb[120].mxu0 %vm625_vm8, %v4944_v16  ;;  %7053 = vmatprep.mubr.msk.f32.mxu1 %vm7864_vm4, %v7863_v32 }
0x1d63   :  { %v7785_v55 = vpop.eup %7784  ;;  %7041 = vmatprep.mubr.msk.f32.mxu0 %vm7864_vm4, %v7863_v32  ;;  %7063 = vmatpush3.bf16.msra.mxu0 %v7510_v38 }
0x1d64   :  { %v5053_v27 = vpop.permute.xlu0 %5052  ;;  %v4945_v34 = vmul.f32 %v7785_v55, %v7777_v42  ;;  %7064 = vmatprep.subr.bf16.mxu0 %v7863_v32  ;;  %v7406_v59 = vpop.permute.xlu1 %7405 }
0x1d65   :  { %7052 = vmatpush3.msra.mxu1 %v5053_v27  ;;  %v7408_v60 = vunpack.i.h.bf16 %v7406_v59 }
0x1d66   :  { %7042 = vmatmul.mubr.msk.f32.gmra.mrb[122].mxu0 %vm625_vm8, %v4945_v34 }
0x1d67   :  { %v7787_v0 = vpop.eup %7786  ;;  %7044 = vmatprep.mubr.msk.f32.mxu0 %vm7864_vm4, %v7863_v32  ;;  %7065 = vmatpush3.bf16.msra.mxu0 %v7511_v33  ;;  %v5219_v16 = vsel %vm419_vm5, %v9091_v1, %v7408_v60 }
0x1d68   :  { %v4946_v5 = vmul.f32 %v7787_v0, %v7779_v52  ;;  %7066 = vmatprep.subr.bf16.mxu0 %v7863_v32  ;;  %v7411_v15 = vpop.permute.xlu0 %7410 }
0x1d69   :  { %v7413_v30 = vunpack.i.h.bf16 %v7411_v15  ;;  %v7412_v58 = vunpack.i.l.bf16 %v7411_v15 }
0x1d6a   :  { %7045 = vmatmul.mubr.msk.f32.gmra.mrb[124].mxu0 %vm625_vm8, %v4946_v5 }
0x1d6b   :  { %v7789_v46 = vpop.eup %7788  ;;  %7070 = vmatprep.mubr.msk.bf16.mxu0 %vm7864_vm4, %v7863_v32  ;;  %7067 = vmatpush3.bf16.msra.mxu0 %v7512_v49  ;;  %v5225_v55 = vsel %vm2400_vm9, %v5219_v16, %v7413_v30 }
0x1d6c   :  { %v4947_v28 = vmul.f32 %v7789_v46, %v7781_v50  ;;  %7068 = vmatprep.subr.bf16.mxu0 %v7863_v32  ;;  %v7421_v34 = vpop.permute.xlu0 %7420 }
0x1d6e   :  { %7054 = vmatmul.mubr.msk.f32.vlgmr.msra.gmra.mrb[124].mxu1 %vm625_vm8, %v4947_v28 }
0x1d6f   :  { %7056 = vmatprep.mubr.msk.f32.mxu1 %vm7864_vm4, %v7863_v32  ;;  %7069 = vmatpush3.bf16.msra.mxu0 %v7513_v6 }
0x1d70   :  { %6513 = vmatprep.subr.bf16.mxu0 %v7526_v7 }
0x1d92   :  { %v4863_v22 = vpop.f32.mrb[120].mxu1 }
0x1d93   :  { %v7028_v39 = vpop.f32.mrb[121].mxu1  ;;  %v4876_v11 = vmul.f32 0.25, %v4863_v22  ;;  %v7423_v22 = vunpack.i.h.bf16 %v7421_v34 }
0x1d94   :  { %v7422_v39 = vunpack.i.l.bf16 %v7421_v34 }
0x1d95   :  { %v4882_v21 = vadd.f32 %v4876_v11, %v8157_v8  ;;  %v5221_v33 = vsel %vm419_vm5, %v9093_v10, %v7423_v22 }
0x1d96   :  { %v5220_v49 = vsel %vm419_vm5, %v9095_v13, %v7422_v39 }
0x1d97   :  { %v4896_v4 = vsel %vm625_vm8, %v4882_v21, -inf }
0x1e34   :  { %v4868_v3 = vpop.f32.mrb[122].mxu1 }
0x1e35   :  { %v7031_v26 = vpop.f32.mrb[123].mxu1  ;;  %v5034_v9 = vpop.f32.mrb[120].mxu0  ;;  %v4877_v42 = vmul.f32 0.25, %v4868_v3 }
0x1e36   :  { %v7040_v56 = vpop.f32.mrb[121].mxu0 }
0x1e37   :  { %v4883_v52 = vadd.f32 %v4877_v42, %v8157_v8 }
0x1e39   :  { %v5039_v62 = vpop.f32.mrb[122].mxu0  ;;  %v4899_v50 = vsel %vm625_vm8, %v4883_v52, -inf }
0x1e3a   :  { %v7414_v31 = vpack.i.bf16 %v5039_v62, %v5034_v9  ;;  %v7043_v37 = vpop.f32.mrb[123].mxu0 }
0x1e3c   :  { %7415 = vrot.lane.b32.xlu1 %v7414_v31, %s7866_s22 }
0x1e3d   :  { %v5044_v40 = vpop.f32.mrb[124].mxu0 }
0x1e3e   :  { %v7046_v61 = vpop.f32.mrb[125].mxu0 }
0x1e40   :  { %7425 = vrot.lane.b32.xlu1 %v7424_v51, %s7868_s24  ;;  %v7407_v51 = vunpack.i.l.bf16 %v7406_v59 }
0x1e41   :  { %v5132_v53 = vpop.f32.mrb[124].mxu1 }
0x1e42   :  { %v7429_v45 = vpack.i.bf16 %v5132_v53, %v5044_v40  ;;  %v7055_v24 = vpop.f32.mrb[125].mxu1  ;;  %v5218_v35 = vsel %vm419_vm5, %v9089_v63, %v7407_v51 }
0x1e43   :  { %v5224_v27 = vsel %vm2400_vm9, %v5218_v35, %v7412_v58 }
0x1e44   :  { %7430 = vrot.lane.b32.xlu0 %v7429_v45, %s7866_s22 }
0x1e63   :  { %4900 = vmax.xlane.f32.xlu0 %v4899_v50  ;;  %v9428_v50 = vld [vmem:[%s9676_s1 + $0x36] ss:$0 sm:$0xff] }
0x1e64   :  { %4897 = vmax.xlane.f32.xlu1 %v4896_v4 }
0x1eae   :  { %v7416_v41 = vpop.permute.xlu1 %7415 }
0x1eaf   :  { %v7418_v8 = vunpack.i.h.bf16 %v7416_v41  ;;  %v7417_v25 = vunpack.i.l.bf16 %v7416_v41 }
0x1eb1   :  { %v5231_v0 = vsel %vm74_vm0, %v5225_v55, %v7418_v8  ;;  %v5230_v5 = vsel %vm74_vm0, %v5224_v27, %v7417_v25 }
0x1eb2   :  { %v5236_v46 = vpack.c.bf16 %v5231_v0, %v5230_v5  ;;  %v7426_v28 = vpop.permute.xlu1 %7425 }
0x1eb3   :  { %v7428_v38 = vunpack.i.h.bf16 %v7426_v28  ;;  %v7427_v1 = vunpack.i.l.bf16 %v7426_v28 }
0x1eb4   :  { %7071 = vmatmul.mubr.msk.bf16.vlgmr.msra.gmra.mrb[128].mxu0 %vm184_vm3, %v5236_v46 }
0x1eb5   :  { %7074 = vmatprep.mubr.msk.bf16.mxu0 %vm7864_vm4, %v7863_v32  ;;  %v5227_v26 = vsel %vm2400_vm9, %v5221_v33, %v7428_v38  ;;  %v5226_v9 = vsel %vm2400_vm9, %v5220_v49, %v7427_v1  ;;  %6514 = vmatpush3.bf16.msra.mxu0 %v7527_v18 }
0x1eb6   :  { %v7431_v63 = vpop.permute.xlu0 %7430 }
0x1eb7   :  { %v7433_v6 = vunpack.i.h.bf16 %v7431_v63  ;;  %v7432_v3 = vunpack.i.l.bf16 %v7431_v63 }
0x1eb9   :  { %v5233_v56 = vsel %vm74_vm0, %v5227_v26, %v7433_v6  ;;  %v5232_v62 = vsel %vm74_vm0, %v5226_v9, %v7432_v3 }
0x1eba   :  { %v5237_v31 = vpack.c.bf16 %v5233_v56, %v5232_v62 }
0x1ebc   :  { %7075 = vmatmul.mubr.msk.bf16.gmra.mrb[132].mxu0 %vm184_vm3, %v5237_v31 }
0x1ebd   :  { %7078 = vmatprep.mubr.msk.bf16.mxu0 %vm7864_vm4, %v7863_v32 }
0x1ef0   :  { %v4901_v10 = vpop.xlane.xlu0 %4900 }
0x1ef1   :  { %v4907_v37 = vsub.f32 %v4883_v52, %v4901_v10  ;;  %v4898_v40 = vpop.xlane.xlu1 %4897 }
0x1ef2   :  { %v4906_v13 = vsub.f32 %v4882_v21, %v4898_v40 }
0x1ef3   :  { %v4918_v61 = vmul.f32 1.442695, %v4907_v37 }
0x1ef4   :  { %v4916_v53 = vmul.f32 1.442695, %v4906_v13 }
0x1ef6   :  { %7790 = vpow2.f32 %v4916_v53 }
0x1ef7   :  { %7792 = vpow2.f32 %v4918_v61 }
0x1f00   :  { %v7791_v45 = vpop.eup %7790 }
0x1f01   :  { %v4932_v24 = vsel %vm625_vm8, %v7791_v45, 0.0  ;;  %v7793_v42 = vpop.eup %7792 }
0x1f02   :  { %4933 = vadd.xlane.f32.xlu0 %v4932_v24  ;;  %v4935_v11 = vsel %vm625_vm8, %v7793_v42, 0.0  ;;  %v7516_v24 = vld [vmem:[%s9680_s5 + $0x44] ss:$8 sps:$4 sm:$0xff]  }
0x1f03   :  { %5506 = vmatprep.subr.bf16.mxu1 %v7516_v24 }
0x1f06   :  { %4936 = vadd.xlane.f32.xlu0 %v4935_v11  ;;  %v7519_v11 = vld [vmem:[%s9680_s5 + $0x54] ss:$8 sps:$4 sm:$0xff]  }
0x1f87   :  { %v5315_v52 = vpop.f32.mrb[128].mxu0 }
0x1f88   :  { %v5316_v21 = vadd.f32 %v5315_v52, %v9428_v50  ;;  %v7072_v4 = vpop.f32.mrb[129].mxu0  ;;  %v7517_v52 = vld [vmem:[%s9680_s5 + $0x50] ss:$8 sps:$4 sm:$0xff]  }
0x1f89   :  { %v5318_v59 = vpop.f32.mrb[130].mxu0 }
0x1f8a   :  { %v9432_v15 = vadd.f32 %v5316_v21, %v8805_v54  ;;  %v5319_v60 = vadd.f32 %v5318_v59, %v9428_v50  ;;  %v7073_v51 = vpop.f32.mrb[131].mxu0  ;;  %v7522_v21 = vld [vmem:[%s9680_s5 + $0x64] ss:$8 sps:$4 sm:$0xff]  }
0x1f8c   :  { %v5339_v30 = vadd.f32 %v5319_v60, %v8808_v43  ;;  %v5344_v58 = vsel %vm184_vm3, %v9432_v15, 0.0  ;;  %v7529_v60 = vld [vmem:[%s9681_s6 + $0x88] sm:$0xff]  }
0x1f8d   :  { %5345 = vadd.xlane.f32.xlu1 %v5344_v58 }
0x1f8e   :  { %v5347_v41 = vsel %vm184_vm3, %v5339_v30, 0.0 }
0x1f8f   :  { %v4934_v16 = vpop.xlane.xlu0 %4933  ;;  %5348 = vadd.xlane.f32.xlu0 %v5347_v41  ;;  %v5323_v35 = vpop.f32.mrb[132].mxu0 }
0x1f90   :  { %7794 = vrcp.f32 %v4934_v16  ;;  %v5324_v8 = vadd.f32 %v5323_v35, %v9428_v50  ;;  %v7076_v25 = vpop.f32.mrb[133].mxu0 }
0x1f91   :  { %v5326_v54 = vpop.f32.mrb[134].mxu0 }
0x1f92   :  { %v5340_v55 = vadd.f32 %v5324_v8, %v8815_v48  ;;  %v5327_v27 = vadd.f32 %v5326_v54, %v9428_v50  ;;  %v7077_v34 = vpop.f32.mrb[135].mxu0 }
0x1f93   :  { %v4937_v43 = vpop.xlane.xlu0 %4936 }
0x1f94   :  { %v9443_v0 = vadd.f32 %v5327_v27, %v8818_v20  ;;  %7796 = vrcp.f32 %v4937_v43  ;;  %v5350_v5 = vsel %vm184_vm3, %v5340_v55, 0.0 }
0x1f95   :  { %5351 = vadd.xlane.f32.xlu1 %v5350_v5 }
0x1f96   :  { %v5353_v46 = vsel %vm184_vm3, %v9443_v0, 0.0 }
0x1f97   :  { %5354 = vadd.xlane.f32.xlu0 %v5353_v46 }
0x1f9a   :  { %v7795_v28 = vpop.eup %7794 }
0x1f9b   :  { %v4948_v22 = vmul.f32 %v7795_v28, %v7791_v45 }
0x1f9d   :  { %7057 = vmatmul.mubr.msk.f32.gmra.mrb[126].mxu1 %vm625_vm8, %v4948_v22  ;;  %v9524_v22 = vld [vmem:[%s9676_s1 + $0x37] ss:$0 sm:$0xff] }
0x1f9e   :  { %v7797_v48 = vpop.eup %7796  ;;  %7059 = vmatprep.mubr.msk.f32.mxu1 %vm7864_vm4, %v7863_v32 }
0x1f9f   :  { %v4949_v39 = vmul.f32 %v7797_v48, %v7793_v42  ;;  %v7514_v42 = vld [vmem:[%s9680_s5 + $0x40] ss:$8 sps:$4 sm:$0xff]  }
0x1fa0   :  { %5507 = vmatpush1.bf16.msra.mxu1 %v7514_v42 }
0x1fa1   :  { %7060 = vmatmul.mubr.msk.f32.gmra.mrb[128].mxu1 %vm625_vm8, %v4949_v39  ;;  %5508 = vmatprep.subr.bf16.mxu1 %v7519_v11 }
0x1fa2   :  { %5538 = vmatprep.mubr.bf16.mxu1 %v7860_v19 }
0x1fa4   :  { %5509 = vmatpush1.bf16.msra.mxu1 %v7517_v52 }
0x1fa5   :  { %5510 = vmatprep.subr.bf16.mxu1 %v7522_v21 }
0x1fa8   :  { %5511 = vmatpush1.bf16.msra.mxu1 %v7520_v29 }
0x1fa9   :  { %5512 = vmatprep.subr.bf16.mxu1 %v7525_v57 }
0x201a   :  { %v5346_v20 = vpop.xlane.xlu1 %5345 }
0x201b   :  { %v5362_v38 = vmul.f32 0.015625, %v5346_v20 }
0x201c   :  { %v5349_v1 = vpop.xlane.xlu0 %5348 }
0x201d   :  { %v9454_v63 = vsub.f32 %v9432_v15, %v5362_v38  ;;  %v5363_v33 = vmul.f32 0.015625, %v5349_v1  ;;  %v9532_v1 = vld [vmem:[%s9676_s1 + $0x40] ss:$0 sm:$0xff] }
0x201f   :  { %v9456_v49 = vsub.f32 %v5339_v30, %v5363_v33  ;;  %v5374_v6 = vmul.f32 %v9454_v63, %v9454_v63 }
0x2021   :  { %v5380_v3 = vsel %vm184_vm3, %v5374_v6, 0.0  ;;  %v5375_v26 = vmul.f32 %v9456_v49, %v9456_v49 }
0x2022   :  { %5381 = vadd.xlane.f32.xlu1 %v5380_v3  ;;  %v5352_v9 = vpop.xlane.xlu1 %5351 }
0x2023   :  { %v5364_v56 = vmul.f32 0.015625, %v5352_v9  ;;  %v5383_v62 = vsel %vm184_vm3, %v5375_v26, 0.0 }
0x2024   :  { %5384 = vadd.xlane.f32.xlu0 %v5383_v62  ;;  %v5355_v31 = vpop.xlane.xlu0 %5354 }
0x2025   :  { %v9464_v10 = vsub.f32 %v5340_v55, %v5364_v56  ;;  %v5365_v37 = vmul.f32 0.015625, %v5355_v31 }
0x2027   :  { %v9467_v40 = vsub.f32 %v9443_v0, %v5365_v37  ;;  %v5376_v13 = vmul.f32 %v9464_v10, %v9464_v10 }
0x2029   :  { %v5386_v61 = vsel %vm184_vm3, %v5376_v13, 0.0  ;;  %v5377_v53 = vmul.f32 %v9467_v40, %v9467_v40 }
0x202a   :  { %5387 = vadd.xlane.f32.xlu1 %v5386_v61 }
0x202b   :  { %v5389_v45 = vsel %vm184_vm3, %v5377_v53, 0.0 }
0x202c   :  { %5390 = vadd.xlane.f32.xlu0 %v5389_v45 }
0x203b   :  { %7435 = vrot.lane.b32.xlu1 %v7434_v44, %s7870_s26  ;;  %v7523_v44 = vld [vmem:[%s9680_s5 + $0x70] ss:$8 sps:$4 sm:$0xff]  }
0x203c   :  { %5513 = vmatpush1.bf16.msra.mxu1 %v7523_v44 }
0x203d   :  { %7082 = vmatprep.subr.bf16.mxu1 %v7863_v32 }
0x2042   :  { %7440 = vrot.lane.b32.xlu0 %v7439_v36, %s7868_s24  ;;  %v7528_v36 = vld [vmem:[%s9681_s6 + $0xc8] sm:$0xff]  }
0x2043   :  { %6515 = vmatprep.subr.bf16.mxu0 %v7528_v36 }
0x2044   :  { %6516 = vmatpush3.bf16.msra.mxu0 %v7529_v60  ;;  %v7534_v60 = vld [vmem:[%s9681_s6 + $0xe0] sm:$0xff]  }
0x2070   :  { %v5137_v4 = vpop.f32.mrb[126].mxu1 }
0x2071   :  { %v7058_v59 = vpop.f32.mrb[127].mxu1 }
0x2072   :  { %v7533_v59 = vld [vmem:[%s9681_s6 + $0x98] sm:$0xff]  }
0x2074   :  { %v5142_v51 = vpop.f32.mrb[128].mxu1 }
0x2075   :  { %v7444_v30 = vpack.i.bf16 %v5142_v51, %v5137_v4  ;;  %v7061_v58 = vpop.f32.mrb[129].mxu1  ;;  %v7532_v4 = vld [vmem:[%s9681_s6 + $0xd8] sm:$0xff]   ;;  %v7535_v51 = vld [vmem:[%s9681_s6 + $0xa0] sm:$0xff]  }
0x2076   :  { %v7537_v58 = vld [vmem:[%s9681_s6 + $0xa8] sm:$0xff]  }
0x2077   :  { %7445 = vrot.lane.b32.xlu1 %v7444_v30, %s7866_s22  ;;  %v7536_v30 = vld [vmem:[%s9681_s6 + $0xe8] sm:$0xff]  }
0x20af   :  { %v5382_v41 = vpop.xlane.xlu1 %5381 }
0x20b0   :  { %v5398_v16 = vmul.f32 0.015625, %v5382_v41  ;;  %v7538_v41 = vld [vmem:[%s9681_s6 + $0xf0] sm:$0xff]  }
0x20b1   :  { %v5385_v35 = vpop.xlane.xlu0 %5384 }
0x20b2   :  { %v5404_v8 = vadd.f32 1e-05, %v5398_v16  ;;  %v5399_v25 = vmul.f32 0.015625, %v5385_v35  ;;  %v7539_v16 = vld [vmem:[%s9681_s6 + $0xb0] sm:$0xff]   ;;  %v7540_v35 = vld [vmem:[%s9681_s6 + $0xf8] sm:$0xff]  }
0x20b4   :  { %7798 = vrsqrt.f32 %v5404_v8  ;;  %v5405_v54 = vadd.f32 1e-05, %v5399_v25  ;;  %v7541_v8 = vld [vmem:[%s9681_s6 + $0xb8] sm:$0xff]   ;;  %v6089_v25 = vld [vmem:[%s9676_s1 + $0x41] ss:$8 sm:$0x3] }
0x20b6   :  { %7800 = vrsqrt.f32 %v5405_v54  ;;  %v9596_v54 = vrot.slane %v6089_v25, %v8061_v12 }
0x20b7   :  { %v5388_v55 = vpop.xlane.xlu1 %5387 }
0x20b8   :  { %v5400_v27 = vmul.f32 0.015625, %v5388_v55  ;;  %v9599_v55 = vrot.slane %v6089_v25, %v8066_v14 }
0x20b9   :  { %v5391_v34 = vpop.xlane.xlu0 %5390 }
0x20ba   :  { %v5406_v43 = vadd.f32 1e-05, %v5400_v27  ;;  %v5401_v5 = vmul.f32 0.015625, %v5391_v34 }
0x20bc   :  { %7802 = vrsqrt.f32 %v5406_v43  ;;  %v5407_v46 = vadd.f32 1e-05, %v5401_v5 }
0x20bd   :  { %v7441_v45 = vpop.permute.xlu0 %7440 }
0x20be   :  { %v7799_v28 = vpop.eup %7798  ;;  %7804 = vrsqrt.f32 %v5407_v46  ;;  %v7443_v24 = vunpack.i.h.bf16 %v7441_v45  ;;  %v7442_v42 = vunpack.i.l.bf16 %v7441_v45 }
0x20bf   :  { %v5416_v48 = vmul.f32 %v7799_v28, %v9454_v63 }
0x20c0   :  { %v7801_v39 = vpop.eup %7800 }
0x20c1   :  { %v5422_v20 = vmul.f32 %v5416_v48, %v9524_v22  ;;  %v5417_v38 = vmul.f32 %v7801_v39, %v9456_v49 }
0x20c3   :  { %v5423_v33 = vmul.f32 %v5417_v38, %v9524_v22  ;;  %v5428_v6 = vadd.f32 %v5422_v20, %v9532_v1 }
0x20c5   :  { %v5429_v3 = vadd.f32 %v5423_v33, %v9532_v1 }
0x20c6   :  { %v7803_v26 = vpop.eup %7802 }
0x20c7   :  { %v5418_v9 = vmul.f32 %v7803_v26, %v9464_v10  ;;  %v5434_v63 = vpack.c.bf16 %v5429_v3, %v5428_v6  ;;  %v7436_v10 = vpop.permute.xlu1 %7435 }
0x20c8   :  { %v7805_v56 = vpop.eup %7804  ;;  %v7438_v53 = vunpack.i.h.bf16 %v7436_v10 }
0x20c9   :  { %v5419_v62 = vmul.f32 %v7805_v56, %v9467_v40  ;;  %6212 = vmatmul.mubr.msk.bf16.vlgmr.msra.gmra.mrb[132].mxu1 %vm184_vm3, %v5434_v63  ;;  %v5424_v49 = vmul.f32 %v5418_v9, %v9524_v22  ;;  %v7437_v40 = vunpack.i.l.bf16 %v7436_v10 }
0x20ca   :  { %5548 = vmatprep.mubr.bf16.mxu1 %v7860_v19  ;;  %v5223_v11 = vsel %vm419_vm5, %v9105_v17, %v7438_v53  ;;  %v7530_v17 = vld [vmem:[%s9681_s6 + $0xd0] sm:$0xff]  }
0x20cb   :  { %v5425_v31 = vmul.f32 %v5419_v62, %v9524_v22  ;;  %v5430_v37 = vadd.f32 %v5424_v49, %v9532_v1  ;;  %v5222_v52 = vsel %vm419_vm5, %v9097_v47, %v7437_v40  ;;  %v5229_v44 = vsel %vm2400_vm9, %v5223_v11, %v7443_v24  ;;  %v7531_v47 = vld [vmem:[%s9681_s6 + $0x90] sm:$0xff]   ;;  %6517 = vmatprep.subr.bf16.mxu0 %v7530_v17 }
0x20cc   :  { %v5228_v7 = vsel %vm2400_vm9, %v5222_v52, %v7442_v42  ;;  %6518 = vmatpush3.bf16.msra.mxu0 %v7531_v47 }
0x20cd   :  { %v5431_v13 = vadd.f32 %v5425_v31, %v9532_v1  ;;  %6519 = vmatprep.subr.bf16.mxu0 %v7532_v4 }
0x20cf   :  { %v5435_v61 = vpack.c.bf16 %v5431_v13, %v5430_v37 }
0x20d0   :  { %6520 = vmatpush3.bf16.msra.mxu0 %v7533_v59 }
0x20d1   :  { %6213 = vmatmul.mubr.msk.bf16.gmra.mrb[136].mxu1 %vm184_vm3, %v5435_v61  ;;  %6521 = vmatprep.subr.bf16.mxu0 %v7534_v60 }
0x20d2   :  { %5558 = vmatprep.mubr.bf16.mxu1 %v7860_v19 }
0x20d4   :  { %6522 = vmatpush3.bf16.msra.mxu0 %v7535_v51 }
0x20d5   :  { %6523 = vmatprep.subr.bf16.mxu0 %v7536_v30 }
0x20d8   :  { %6524 = vmatpush3.bf16.msra.mxu0 %v7537_v58 }
0x20d9   :  { %6525 = vmatprep.subr.bf16.mxu0 %v7538_v41 }
0x20dc   :  { %6526 = vmatpush3.bf16.msra.mxu0 %v7539_v16 }
0x20dd   :  { %6527 = vmatprep.subr.bf16.mxu0 %v7540_v35 }
0x20e0   :  { %6528 = vmatpush3.bf16.msra.mxu0 %v7541_v8 }
0x20e9   :  { %v7446_v21 = vpop.permute.xlu1 %7445 }
0x20ea   :  { %v7448_v29 = vunpack.i.h.bf16 %v7446_v21  ;;  %v7447_v57 = vunpack.i.l.bf16 %v7446_v21 }
0x20ec   :  { %v5234_v19 = vsel %vm74_vm0, %v5228_v7, %v7447_v57  ;;  %v5235_v18 = vsel %vm74_vm0, %v5229_v44, %v7448_v29 }
0x20ed   :  { %v5238_v36 = vpack.c.bf16 %v5235_v18, %v5234_v19 }
0x20ef   :  { %7079 = vmatmul.mubr.msk.bf16.gmra.mrb[136].mxu0 %vm184_vm3, %v5238_v36 }
0x219c   :  { %v5540_v27 = vpop.f32.mrb[132].mxu1 }
0x219d   :  { %v5541_v34 = vadd.f32 %v5540_v27, %v9596_v54  ;;  %v5542_v43 = vpop.f32.mrb[133].mxu1 }
0x219e   :  { %v5543_v5 = vadd.f32 %v5542_v43, %v9599_v55  ;;  %v5544_v46 = vpop.f32.mrb[134].mxu1 }
0x219f   :  { %v5581_v28 = vmul.f32 0.70710677, %v5541_v34  ;;  %v5545_v48 = vadd.f32 %v5544_v46, %v9596_v54  ;;  %v5546_v39 = vpop.f32.mrb[135].mxu1  ;;  %v5569_v42 = vmul.f32 0.5, %v5541_v34 }
0x21a0   :  { %v5582_v20 = vmul.f32 0.70710677, %v5543_v5  ;;  %v5547_v38 = vadd.f32 %v5546_v39, %v9599_v55  ;;  %v5570_v21 = vmul.f32 0.5, %v5543_v5 }
0x21a1   :  { %7806 = verf.f32 %v5581_v28  ;;  %v5583_v12 = vmul.f32 0.70710677, %v5545_v48  ;;  %v5571_v11 = vmul.f32 0.5, %v5545_v48 }
0x21a2   :  { %7808 = verf.f32 %v5582_v20  ;;  %v5584_v33 = vmul.f32 0.70710677, %v5547_v38  ;;  %v5572_v29 = vmul.f32 0.5, %v5547_v38 }
0x21a3   :  { %7810 = verf.f32 %v5583_v12 }
0x21a4   :  { %7812 = verf.f32 %v5584_v33  ;;  %v5550_v14 = vpop.f32.mrb[136].mxu1 }
0x21a5   :  { %v5551_v6 = vadd.f32 %v5550_v14, %v9596_v54  ;;  %v5552_v3 = vpop.f32.mrb[137].mxu1 }
0x21a6   :  { %v5553_v26 = vadd.f32 %v5552_v3, %v9599_v55  ;;  %v5554_v9 = vpop.f32.mrb[138].mxu1 }
0x21a7   :  { %v5585_v63 = vmul.f32 0.70710677, %v5551_v6  ;;  %v5555_v56 = vadd.f32 %v5554_v9, %v9596_v54  ;;  %v5556_v62 = vpop.f32.mrb[139].mxu1  ;;  %v5573_v58 = vmul.f32 0.5, %v5551_v6 }
0x21a8   :  { %v5586_v49 = vmul.f32 0.70710677, %v5553_v26  ;;  %v5557_v31 = vadd.f32 %v5556_v62, %v9599_v55  ;;  %v5574_v35 = vmul.f32 0.5, %v5553_v26 }
0x21a9   :  { %7814 = verf.f32 %v5585_v63  ;;  %v5587_v37 = vmul.f32 0.70710677, %v5555_v56  ;;  %v5575_v41 = vmul.f32 0.5, %v5555_v56 }
0x21aa   :  { %7816 = verf.f32 %v5586_v49  ;;  %v5588_v13 = vmul.f32 0.70710677, %v5557_v31  ;;  %v5576_v8 = vmul.f32 0.5, %v5557_v31 }
0x21ab   :  { %v7807_v61 = vpop.eup %7806  ;;  %7818 = verf.f32 %v5587_v37 }
0x21ac   :  { %v7809_v10 = vpop.eup %7808  ;;  %v5605_v53 = vadd.f32 1.0, %v7807_v61  ;;  %7820 = verf.f32 %v5588_v13 }
0x21ad   :  { %v7811_v40 = vpop.eup %7810  ;;  %v5606_v45 = vadd.f32 1.0, %v7809_v10 }
0x21ae   :  { %v7813_v24 = vpop.eup %7812  ;;  %v5607_v52 = vadd.f32 1.0, %v7811_v40  ;;  %v5617_v44 = vmul.f32 %v5605_v53, %v5569_v42 }
0x21af   :  { %v5608_v57 = vadd.f32 1.0, %v7813_v24  ;;  %v5618_v19 = vmul.f32 %v5606_v45, %v5570_v21 }
0x21b0   :  { %v5619_v7 = vmul.f32 %v5607_v52, %v5571_v11  ;;  %v3010_v11 = vld [vmem:[%s9676_s1 + $0x42] ss:$0 sm:$0xff] }
0x21b1   :  { %v5620_v18 = vmul.f32 %v5608_v57, %v5572_v29 }
0x21b2   :  { %v5629_v36 = vpack.c.bf16 %v5619_v7, %v5617_v44 }
0x21b3   :  { %v7815_v17 = vpop.eup %7814  ;;  %v5630_v47 = vpack.c.bf16 %v5620_v18, %v5618_v19 }
0x21b4   :  { %v7817_v4 = vpop.eup %7816  ;;  %v5609_v59 = vadd.f32 1.0, %v7815_v17 }
0x21b5   :  { %v7819_v60 = vpop.eup %7818  ;;  %v5610_v51 = vadd.f32 1.0, %v7817_v4  ;;  %5796 = vmatprep.mubr.bf16.mxu0 %v5630_v47 }
0x21b6   :  { %v7821_v30 = vpop.eup %7820  ;;  %v5611_v16 = vadd.f32 1.0, %v7819_v60  ;;  %5797 = vmatmul.mubr.bf16.vlgmr.msra.gmra.mrb[140].mxu0 %v5629_v36  ;;  %v5621_v27 = vmul.f32 %v5609_v59, %v5573_v58 }
0x21b7   :  { %v5612_v25 = vadd.f32 1.0, %v7821_v30  ;;  %v5622_v43 = vmul.f32 %v5610_v51, %v5574_v35 }
0x21b8   :  { %v5623_v34 = vmul.f32 %v5611_v16, %v5575_v41 }
0x21b9   :  { %v5624_v5 = vmul.f32 %v5612_v25, %v5576_v8 }
0x21ba   :  { %v5631_v46 = vpack.c.bf16 %v5623_v34, %v5621_v27 }
0x21bb   :  { %v5632_v28 = vpack.c.bf16 %v5624_v5, %v5622_v43 }
0x21bd   :  { %5803 = vmatprep.mubr.bf16.mxu0 %v5632_v28 }
0x21be   :  { %5804 = vmatmul.mubr.bf16.gmra.mrb[144].mxu0 %v5631_v46 }
0x21c2   :  { %v5331_v48 = vpop.f32.mrb[136].mxu0 }
0x21c3   :  { %v5332_v39 = vadd.f32 %v5331_v48, %v9428_v50  ;;  %v7080_v20 = vpop.f32.mrb[137].mxu0 }
0x21c4   :  { %v5334_v38 = vpop.f32.mrb[138].mxu0 }
0x21c5   :  { %v5342_v12 = vadd.f32 %v5332_v39, %v8825_v23  ;;  %v5335_v33 = vadd.f32 %v5334_v38, %v9428_v50  ;;  %v7081_v14 = vpop.f32.mrb[139].mxu0  ;;  %v7543_v38 = vld [vmem:[%s9682_s7 + $0x8] sm:$0xff]  }
0x21c7   :  { %v5343_v6 = vadd.f32 %v5335_v33, %v8828_v2  ;;  %v5356_v3 = vsel %vm184_vm3, %v5342_v12, 0.0  ;;  %v7545_v33 = vld [vmem:[%s9682_s7 + $0x18] sm:$0xff]  }
0x21c8   :  { %5357 = vadd.xlane.f32.xlu1 %v5356_v3 }
0x21c9   :  { %v5359_v26 = vsel %vm184_vm3, %v5343_v6, 0.0 }
0x21ca   :  { %5360 = vadd.xlane.f32.xlu0 %v5359_v26 }
0x2255   :  { %v5358_v9 = vpop.xlane.xlu1 %5357 }
0x2256   :  { %v5366_v63 = vmul.f32 0.015625, %v5358_v9  ;;  %v5819_v9 = vld [vmem:[%s9676_s1 + $0x43] ss:$0 sm:$0xff] }
0x2257   :  { %v5361_v56 = vpop.xlane.xlu0 %5360 }
0x2258   :  { %v5372_v62 = vsub.f32 %v5342_v12, %v5366_v63  ;;  %v5367_v49 = vmul.f32 0.015625, %v5361_v56  ;;  %v7544_v12 = vld [vmem:[%s9682_s7 + $0x10] sm:$0xff]  }
0x225a   :  { %v5373_v31 = vsub.f32 %v5343_v6, %v5367_v49  ;;  %v5378_v37 = vmul.f32 %v5372_v62, %v5372_v62 }
0x225c   :  { %v5392_v23 = vsel %vm184_vm3, %v5378_v37, 0.0  ;;  %v5379_v13 = vmul.f32 %v5373_v31, %v5373_v31 }
0x225d   :  { %5393 = vadd.xlane.f32.xlu0 %v5392_v23 }
0x225e   :  { %v5395_v50 = vsel %vm184_vm3, %v5379_v13, 0.0 }
0x225f   :  { %5396 = vadd.xlane.f32.xlu1 %v5395_v50 }
0x2289   :  { %v6529_v2 = vpop.f32.mrb[140].mxu0 }
0x228a   :  { %v6530_v61 = vpop.f32.mrb[141].mxu0 }
0x228b   :  { %v6531_v10 = vadd.f32 %v6530_v61, %v6529_v2  ;;  %v6532_v53 = vpop.f32.mrb[142].mxu0 }
0x228c   :  { %v6533_v40 = vpop.f32.mrb[143].mxu0 }
0x228d   :  { %v5799_v29 = vadd.f32 %v6531_v10, %v3010_v11 }
0x228f   :  { %v5817_v7 = vadd.f32 %v5799_v29, %v9432_v15 }
0x2291   :  { %v6535_v45 = vpop.f32.mrb[144].mxu0 }
0x2292   :  { %v6536_v24 = vpop.f32.mrb[145].mxu0 }
0x2293   :  { %v6538_v42 = vpop.f32.mrb[146].mxu0 }
0x2294   :  { %v6539_v52 = vpop.f32.mrb[147].mxu0 }
0x2295   :  { %v6540_v21 = vadd.f32 %v6539_v52, %v6538_v42 }
0x2297   :  { %v5808_v57 = vadd.f32 %v6540_v21, %v3010_v11 }
0x2299   :  { %v5818_v44 = vadd.f32 %v5808_v57, %v9443_v0 }
0x229b   :  { %v5824_v19 = vrot.slane %v5818_v44, 7 }
0x229d   :  { %v5826_v18 = vsel %vm5825_vm10, %v5824_v19, %v5817_v7 }
0x229e   :  { %v5829_v36 = vsel %vm5828_vm11, %v5826_v18, 0.0 }
0x229f   :  { %5830 = vadd.xlane.f32.xlu0 %v5829_v36 }
0x22ea   :  { %v5394_v17 = vpop.xlane.xlu0 %5393 }
0x22eb   :  { %v5402_v47 = vmul.f32 0.015625, %v5394_v17 }
0x22ec   :  { %v5397_v4 = vpop.xlane.xlu1 %5396 }
0x22ed   :  { %v5408_v59 = vadd.f32 1e-05, %v5402_v47  ;;  %v5403_v60 = vmul.f32 0.015625, %v5397_v4 }
0x22ef   :  { %7822 = vrsqrt.f32 %v5408_v59  ;;  %v5409_v51 = vadd.f32 1e-05, %v5403_v60 }
0x22f1   :  { %7824 = vrsqrt.f32 %v5409_v51 }
0x22f9   :  { %v7823_v30 = vpop.eup %7822 }
0x22fa   :  { %v5420_v0 = vmul.f32 %v7823_v30, %v5372_v62 }
0x22fb   :  { %v7825_v58 = vpop.eup %7824 }
0x22fc   :  { %v5421_v41 = vmul.f32 %v7825_v58, %v5373_v31  ;;  %v5426_v15 = vmul.f32 %v5420_v0, %v9524_v22 }
0x22fe   :  { %v5427_v16 = vmul.f32 %v5421_v41, %v9524_v22  ;;  %v5432_v35 = vadd.f32 %v5426_v15, %v9532_v1 }
0x2300   :  { %v5433_v8 = vadd.f32 %v5427_v16, %v9532_v1  ;;  %v7542_v1 = vld [vmem:[%s9682_s7] sm:$0xff]  }
0x2301   :  { %7083 = vmatpush3.bf16.msra.mxu1 %v7542_v1 }
0x2302   :  { %v5436_v25 = vpack.c.bf16 %v5433_v8, %v5432_v35  ;;  %7084 = vmatprep.subr.bf16.mxu1 %v7863_v32 }
0x2304   :  { %6214 = vmatmul.mubr.msk.bf16.gmra.mrb[140].mxu1 %vm184_vm3, %v5436_v25 }
0x2305   :  { %7090 = vmatprep.mubr.msk.bf16.mxu1 %vm7864_vm4, %v7863_v32  ;;  %7085 = vmatpush3.bf16.msra.mxu1 %v7543_v38 }
0x2306   :  { %7086 = vmatprep.subr.bf16.mxu1 %v7863_v32 }
0x2309   :  { %7087 = vmatpush3.bf16.msra.mxu1 %v7544_v12 }
0x230a   :  { %7088 = vmatprep.subr.bf16.mxu1 %v7863_v32  ;;  %v5820_v32 = vld [vmem:[%s9676_s1 + $0x44] ss:$0 sm:$0xff] }
0x230d   :  { %7089 = vmatpush3.bf16.msra.mxu1 %v7545_v33 }
0x232c   :  { %v5831_v27 = vpop.xlane.xlu0 %5830 }
0x232d   :  { %v5832_v34 = vmul.f32 0.015625, %v5831_v27  ;;  %v5821_v27 = vld [vmem:[%s9676_s1 + $0x45] ss:$0 sm:$0xff] }
0x232f   :  { %v5834_v43 = vrot.slane %v5832_v34, 1  ;;  %v5837_v5 = vsub.f32 %v5817_v7, %v5832_v34 }
0x2331   :  { %v5838_v46 = vsub.f32 %v5818_v44, %v5834_v43  ;;  %v5839_v48 = vmul.f32 %v5837_v5, %v5837_v5 }
0x2333   :  { %v5840_v28 = vmul.f32 %v5838_v46, %v5838_v46 }
0x2335   :  { %v5843_v39 = vrot.slane %v5840_v28, 7 }
0x2337   :  { %v5844_v22 = vsel %vm5825_vm10, %v5843_v39, %v5839_v48 }
0x2338   :  { %v5846_v20 = vsel %vm5828_vm11, %v5844_v22, 0.0 }
0x2339   :  { %5847 = vadd.xlane.f32.xlu1 %v5846_v20 }
0x23c6   :  { %v5848_v14 = vpop.xlane.xlu1 %5847 }
0x23c7   :  { %v5849_v6 = vmul.f32 0.015625, %v5848_v14 }
0x23c9   :  { %v5850_v3 = vadd.f32 1e-05, %v5849_v6 }
0x23cb   :  { %7826 = vrsqrt.f32 %v5850_v3 }
0x23d5   :  { %v7827_v26 = vpop.eup %7826 }
0x23d6   :  { %v5853_v63 = vrot.slane %v7827_v26, 1  ;;  %v5856_v56 = vmul.f32 %v7827_v26, %v5837_v5 }
0x23d7   :  { %v5560_v62 = vpop.f32.mrb[140].mxu1 }
0x23d8   :  { %v5857_v49 = vmul.f32 %v5853_v63, %v5838_v46  ;;  %v5858_v31 = vmul.f32 %v5856_v56, %v5819_v9  ;;  %v5561_v37 = vadd.f32 %v5560_v62, %v9596_v54  ;;  %v5562_v23 = vpop.f32.mrb[141].mxu1 }
0x23d9   :  { %v5563_v13 = vadd.f32 %v5562_v23, %v9599_v55  ;;  %v5564_v50 = vpop.f32.mrb[142].mxu1 }
0x23da   :  { %v5859_v2 = vmul.f32 %v5857_v49, %v5819_v9  ;;  %v5860_v61 = vadd.f32 %v5858_v31, %v5820_v32  ;;  %v5589_v10 = vmul.f32 0.70710677, %v5561_v37  ;;  %v5566_v53 = vpop.f32.mrb[143].mxu1  ;;  %v5565_v45 = vadd.f32 %v5564_v50, %v9596_v54 }
0x23db   :  { %v5590_v40 = vmul.f32 0.70710677, %v5563_v13  ;;  %v5567_v24 = vadd.f32 %v5566_v53, %v9599_v55  ;;  %v5577_v59 = vmul.f32 0.5, %v5561_v37  ;;  %v5578_v30 = vmul.f32 0.5, %v5563_v13 }
0x23dc   :  { %v5861_v42 = vadd.f32 %v5859_v2, %v5820_v32  ;;  %7828 = verf.f32 %v5589_v10  ;;  %v5591_v11 = vmul.f32 0.70710677, %v5565_v45  ;;  %v5862_v52 = vpack.c.bf16 %v5860_v61, %v5860_v61 }
0x23dd   :  { %7830 = verf.f32 %v5590_v40  ;;  %v5592_v29 = vmul.f32 0.70710677, %v5567_v24  ;;  %v5579_v60 = vmul.f32 0.5, %v5565_v45  ;;  %v5580_v0 = vmul.f32 0.5, %v5567_v24 }
0x23de   :  { %v5863_v21 = vpack.c.bf16 %v5861_v42, %v5861_v42  ;;  %7832 = verf.f32 %v5591_v11  ;;  %v5874_v44 = vunpack.c.l.b16 %v5862_v52 }
0x23df   :  { %7834 = verf.f32 %v5592_v29 }
0x23e0   :  { %v5875_v57 = vunpack.c.l.b16 %v5863_v21 }
0x23e2   :  { %v5876_v7 = vrot.slane %v5875_v57, 7 }
0x23e4   :  { %v5877_v19 = vsel %vm5825_vm10, %v5876_v7, %v5874_v44 }
0x23e5   :  { %v5878_v18 = vpack.c.b16 %v5877_v19, %v5877_v19 }
0x23e6   :  { %v7829_v36 = vpop.eup %7828 }
0x23e7   :  { %v7831_v17 = vpop.eup %7830  ;;  %7091 = vmatmul.mubr.msk.bf16.vlgmr.msra.gmra.mrb[144].mxu1 %vm184_vm3, %v5878_v18  ;;  %v5613_v54 = vadd.f32 1.0, %v7829_v36 }
0x23e8   :  { %v7833_v55 = vpop.eup %7832  ;;  %v5614_v47 = vadd.f32 1.0, %v7831_v17 }
0x23e9   :  { %v7835_v4 = vpop.eup %7834  ;;  %v5615_v51 = vadd.f32 1.0, %v7833_v55  ;;  %v5625_v41 = vmul.f32 %v5613_v54, %v5577_v59 }
0x23ea   :  { %v5616_v58 = vadd.f32 1.0, %v7835_v4  ;;  %v5626_v16 = vmul.f32 %v5614_v47, %v5578_v30 }
0x23eb   :  { %v5627_v15 = vmul.f32 %v5615_v51, %v5579_v60 }
0x23ec   :  { %v5628_v35 = vmul.f32 %v5616_v58, %v5580_v0 }
0x23ed   :  { %v5633_v8 = vpack.c.bf16 %v5627_v15, %v5625_v41 }
0x23ee   :  { %v5634_v25 = vpack.c.bf16 %v5628_v35, %v5626_v16 }
0x23f0   :  { %5810 = vmatprep.mubr.bf16.mxu0 %v5634_v25 }
0x23f1   :  { %5811 = vmatmul.mubr.bf16.gmra.mrb[148].mxu0 %v5633_v8 }
0x24ba   :  { %v5940_v34 = vpop.f32.mrb[144].mxu1 }
0x24bb   :  { %v5941_v43 = vadd.f32 %v5940_v34, %v5821_v27  ;;  %v7092_v5 = vpop.f32.mrb[145].mxu1 }
0x24bc   :  { %v5943_v46 = vpop.f32.mrb[146].mxu1 }
0x24bd   :  { %v7093_v28 = vpop.f32.mrb[147].mxu1  ;;  %5947 = vst.msk [vmem:[#allocation2] sm:$0x3] %vm5946_vm12, %v5941_v43 }
0x24be   :  { %7847 = shalt.err (!%p7844_p4)
}
0x24bf   :  { %s7848_s1 = scalar_lea.hbm %s9683_s8, 32 }
0x24c0   :  { %p7849_p5 = scmp.ne.s32.totalorder %s9683_s8, %s7848_s1  ;;  %p7852_p6 = scmp.lt.u32.totalorder %s7848_s1, %s9683_s8 }
0x24c2   :  { %p7854_p7 = pnand %p7852_p6, %p7849_p5 }
0x24c4   :  { %7857 = shalt.err (!%p7854_p7)
}
0x24c5   :  { %5957 = dma.vmem_to_hbm [thread:$0]  %s5955_s23, 32, %s9683_s8, [#allocation3]   ;;  %v6541_v48 = vpop.f32.mrb[148].mxu0 }
0x24c6   :  { %v6542_v39 = vpop.f32.mrb[149].mxu0 }
0x24c7   :  { %v6544_v22 = vpop.f32.mrb[150].mxu0 }
0x24c8   :  { %v6545_v20 = vpop.f32.mrb[151].mxu0 }
0x24c9   :  { %7858 = dma.done.wait [#allocation3], 32  }
0x24ca   :  { %7859 = vsyncadd [#allocation3], 4294967264 }
0x24cb   :  { %5961 = vsyncpa [#allocation3], 1 }

</bundles_post_ra>
